<compile_context>
chip_gen: v5e
topology: v5e:2x2
jax: 0.10.0
libtpu: 0.0.40
codegen_flags: <defaults>
</compile_context>

<pallas_src>
import functools

import jax
import jax.numpy as jnp
from jax.experimental import pallas as pl
from jax.experimental.pallas import tpu as pltpu

_F32 = jnp.float32
_BF16 = jnp.bfloat16


def _topdown_kernel(*refs, rnn_size, cb_weight, has_mask, attn_bf16):
    if has_mask:
        (fcxt_ref, attf_ref, pattf_ref, mask_ref, h_st_ref, c_st_ref,
         a_wh_ref, a_wfx_ref, a_whh_ref, a_b_ref,
         l_wa_ref, l_wh_ref, l_whh_ref, l_b_ref,
         h2a_w_ref, h2a_b_ref, alpha_w_ref,
         out_ref, h_new_ref, c_new_ref) = refs
    else:
        mask_ref = None
        (fcxt_ref, attf_ref, pattf_ref, h_st_ref, c_st_ref,
         a_wh_ref, a_wfx_ref, a_whh_ref, a_b_ref,
         l_wa_ref, l_wh_ref, l_whh_ref, l_b_ref,
         h2a_w_ref, h2a_b_ref, alpha_w_ref,
         out_ref, h_new_ref, c_new_ref) = refs

    R = rnn_size
    f32, bf16 = _F32, _BF16

    def lstm_gates_to_hc(gates, c_prev):
        # PyTorch nn.LSTMCell gate order: i, f, g, o (bias = b_ih + b_hh).
        i = jax.nn.sigmoid(gates[:, 0 * R:1 * R])
        f = jax.nn.sigmoid(gates[:, 1 * R:2 * R])
        g = jnp.tanh(gates[:, 2 * R:3 * R])
        o = jax.nn.sigmoid(gates[:, 3 * R:4 * R])
        c_new = f * c_prev + i * g
        h_new = o * jnp.tanh(c_new)
        return h_new, c_new

    h0 = h_st_ref[0]              # att-lstm hidden   (state[0][0])
    c0 = c_st_ref[0]
    h1 = h_st_ref[1]              # lang-lstm hidden  (state[0][1] == state[0][-1])
    c1 = c_st_ref[1]

    prev_h = h1.astype(bf16)
    fcxt = fcxt_ref[...].astype(bf16)        # [fc | xt], fused in the wrapper

    # ---- att LSTM: input was cat([prev_h, fc, xt]); W_ih pre-split/fused ----
    att_gates = (
        jnp.dot(prev_h, a_wh_ref[...], preferred_element_type=f32)
        + jnp.dot(fcxt, a_wfx_ref[...], preferred_element_type=f32)
        + jnp.dot(h0.astype(bf16), a_whh_ref[...], preferred_element_type=f32)
        + a_b_ref[...]
    )
    h_att, c_att = lstm_gates_to_hc(att_gates, c0)

    # ---- CB_Attention ----
    att_h = (jnp.dot(h_att.astype(bf16), h2a_w_ref[...],
                     preferred_element_type=f32)
             + h2a_b_ref[...])                                     # (TB, H) f32
    # big (TB, A, H) elementwise add + tanh: bf16 on v6e/v7x (bf16 VPU/EUP
    # paths), f32 on v5e; alpha_w stays f32 so the lane reduce accumulates
    # in f32.  alpha_net bias is uniform over the softmax axis -> dropped.
    cdt = bf16 if attn_bf16 else f32
    dot = jnp.tanh(pattf_ref[...].astype(cdt) + att_h.astype(cdt)[:, None, :])
    alpha = jnp.sum(dot * alpha_w_ref[...], axis=2)                # (TB, A) f32
    alpha = alpha - jnp.max(alpha, axis=1, keepdims=True)
    w = jnp.exp(alpha)
    if has_mask:
        w = w * mask_ref[...]
    denom = jnp.sum(w, axis=1, keepdims=True)
    # single normalization covers softmax (and mask renorm when masked);
    # approx reciprocal sits on the otherwise-idle EUP slot (ok at 5e-2 tol;
    # use approx=False for tight-accuracy inference/training).
    w = w * pl.reciprocal(denom, approx=True)
    # attention-weighted sum on the VPU (broadcast-mul, f32 accumulate) + XLU
    # (sublane reduce): an M=1 batched MXU matmul would use <1% of MXU rows.
    att_res = jnp.sum(attf_ref[...] * w[:, :, None], axis=1)       # (TB, R) f32
    # TODO(synk): for very large A*H on v7x (64 MiB/TC) chunk the attention
    # over A (two-pass / online softmax) to decouple TB from A*H.

    # ---- lang LSTM: input was cat([att_res, h_att]); W_ih pre-split ----
    lang_gates = (
        jnp.dot(att_res.astype(bf16), l_wa_ref[...], preferred_element_type=f32)
        + jnp.dot(h_att.astype(bf16), l_wh_ref[...], preferred_element_type=f32)
        + jnp.dot(prev_h, l_whh_ref[...], preferred_element_type=f32)
        + l_b_ref[...]
    )
    h_lang, c_lang = lstm_gates_to_hc(lang_gates, c1)

    # new state is stacked *before* the cb mixing (as in the PyTorch module)
    h_new_ref[0] = h_att
    h_new_ref[1] = h_lang
    c_new_ref[0] = c_att
    c_new_ref[1] = c_lang

    # ---- cb cross-batch mixing: row 2k pairs with 2k+1 (inside the tile) ----
    if cb_weight != 0.0:
        tb = h_lang.shape[0]
        relu = jnp.maximum(h_lang, 0.0)
        up = pltpu.roll(relu, shift=1, axis=0)         # up[i]   = relu[i-1]
        down = pltpu.roll(relu, shift=tb - 1, axis=0)   # down[i] = relu[i+1]
        parity = jax.lax.broadcasted_iota(jnp.int32, (tb, 1), 0) & 1
        partner_relu = jnp.where(parity == 0, down, up)  # relu(h_lang[i ^ 1])
        h_out = h_lang + cb_weight * partner_relu
    else:
        h_out = h_lang

    # F.dropout in eval mode -> identity
    out_ref[...] = h_out


# ------------------------- one-time (hoisted) prep ---------------------------
def prepare_topdown_params(params, rnn_size):
    """Split/fuse the packed LSTM input weights and cast all MXU operands to
    bf16.  Call ONCE and reuse across decode steps (hoisted HBM traffic)."""
    R = rnn_size
    a_w = jnp.asarray(params["att_w_ih_t"])    # (2R+E, 4R): rows [prev_h|fc|xt]
    l_w = jnp.asarray(params["lang_w_ih_t"])   # (2R, 4R):   rows [att_res|h_att]
    return {
        "a_wh": a_w[:R].astype(_BF16),
        "a_wfx": a_w[R:].astype(_BF16),        # fused [fc | xt] rows (K = R+E)
        "a_whh": jnp.asarray(params["att_w_hh_t"]).astype(_BF16),
        "att_b": jnp.asarray(params["att_b"]).astype(_F32),
        "l_wa": l_w[:R].astype(_BF16),
        "l_wh": l_w[R:].astype(_BF16),
        "l_whh": jnp.asarray(params["lang_w_hh_t"]).astype(_BF16),
        "lang_b": jnp.asarray(params["lang_b"]).astype(_F32),
        "h2a_w": jnp.asarray(params["h2att_w_t"]).astype(_BF16),
        "h2a_b": jnp.asarray(params["h2att_b"]).astype(_F32),
        "alpha_w": jnp.asarray(params["alpha_w"]).astype(_F32),
        # alpha_b: uniform pre-softmax bias -> mathematical no-op, not shipped.
    }


def prepare_att_features(att_feats, p_att_feats):
    """Cast the two dominant streamed tensors to bf16 ONCE (outside the loop)."""
    return att_feats.astype(_BF16), p_att_feats.astype(_BF16)


def _default_attn_bf16():
    # bf16 VPU/EUP exist on v6e/v7x; v5e and older are f32-only elementwise.
    try:
        kind = jax.devices()[0].device_kind.lower()
    except Exception:
        return False
    return ("v6" in kind) or ("v7" in kind)


def _pick_batch_tile(B):
    # >=4 grid steps when possible (prefetch/compute overlap + megacore split),
    # 8-aligned sublanes for the (TB, ...) f32 blocks; fall back to B.
    for steps in (4, 8, 2, 16):
        if B % steps == 0:
            tb = B // steps
            if tb >= 8 and tb % 8 == 0 and tb % 2 == 0:
                return tb
    return B


def _cost_estimate(B, A, R, E, H, has_mask, weight_bytes):
    flops = (8 * B * R * (3 * R + E)       # att-LSTM gates (K = R, R+E, R)
             + 24 * B * R * R              # lang-LSTM gates (K = R, R, R)
             + 2 * B * R * H               # h2att
             + 3 * B * A * H               # attention add + alpha mul/reduce
             + 2 * B * A * R               # attention-weighted sum
             + 40 * B * R)                 # gate/cb elementwise epilogue
    transcendentals = B * A * H + B * A + 10 * B * R
    bytes_accessed = (4 * B * (R + E)      # fc|xt (f32)
                      + 2 * B * A * R      # att_feats (bf16)
                      + 2 * B * A * H      # p_att_feats (bf16)
                      + (4 * B * A if has_mask else 0)
                      + 16 * B * R         # h/c state in
                      + 20 * B * R         # out + new h/c state
                      + weight_bytes)
    return pl.CostEstimate(flops=int(flops), transcendentals=int(transcendentals),
                           bytes_accessed=int(bytes_accessed))


def _derive_vmem_limit(TB, A, R, E, H, has_mask, attn_bf16, weight_bytes,
                       single_buffer_weights):
    f, bf = 4, 2
    act_in = (TB * (R + E) * f + TB * A * R * bf + TB * A * H * bf
              + (TB * A * f if has_mask else 0) + 2 * (2 * TB * R * f))
    act_out = TB * R * f + 2 * (2 * TB * R * f)
    pipelined = 2 * (act_in + act_out)                 # double-buffered tiles
    w = weight_bytes * (1 if single_buffer_weights else 2)
    # big in-kernel temporaries: (TB,A,H) tanh operand/result + f32 products
    scratch = TB * A * H * (bf if attn_bf16 else f) + TB * A * H * f + TB * A * R * f
    total = pipelined + w + scratch + (4 << 20)
    # clamp: >=16 MiB so tiny shapes don't starve the pipeline, <=56 MiB to
    # stay inside v7x's 64 MiB/TC physical VMEM (ample on v5e/v6e's 128 MiB).
    return int(min(max(total, 16 << 20), 56 << 20))


# --------------------------------- wrapper ------------------------------------
def cb_topdown_core(xt, fc_feats, att_feats_bf, p_att_feats_bf, state, prep,
                    att_masks=None, *, cb_weight=0.5, batch_tile=None,
                    attn_bf16=None, vmem_limit_bytes=None,
                    single_buffer_weights=True):
    """One decode step.  `prep` comes from prepare_topdown_params, att/p_att
    feats from prepare_att_features (both hoisted out of the decode loop)."""
    B, R = fc_feats.shape
    E = xt.shape[-1]
    A = att_feats_bf.shape[1]
    H = p_att_feats_bf.shape[-1]
    h_state, c_state = state                    # each (2, B, R)

    if attn_bf16 is None:
        attn_bf16 = _default_attn_bf16()
    TB = _pick_batch_tile(B) if batch_tile is None else batch_tile
    assert B % TB == 0 and TB % 2 == 0, (
        "batch tile must divide B and be even so cb pairs stay inside a tile")
    grid = (B // TB,)
    has_mask = att_masks is not None

    # cheap per-step prep: fuse [fc | xt] so the att-LSTM input projection is a
    # single well-filled K=(R+E) MXU contraction instead of a K=E tail matmul.
    fcxt = jnp.concatenate([fc_feats, xt], axis=1).astype(_F32)

    weights = [prep["a_wh"], prep["a_wfx"], prep["a_whh"], prep["att_b"],
               prep["l_wa"], prep["l_wh"], prep["l_whh"], prep["lang_b"],
               prep["h2a_w"], prep["h2a_b"], prep["alpha_w"]]
    weight_bytes = int(sum(int(w.size) * w.dtype.itemsize for w in weights))

    def tile_spec(*tail):
        n = len(tail)
        return pl.BlockSpec((TB,) + tail, lambda i, n=n: (i,) + (0,) * n)

    def state_spec():
        return pl.BlockSpec((2, TB, R), lambda i: (0, i, 0))

    def resident_spec(arr, single_buffer):
        idx = lambda i, n=arr.ndim: (0,) * n
        if single_buffer:
            # constant block index -> no second buffer needed; halves the VMEM
            # footprint of the resident weights.
            return pl.BlockSpec(arr.shape, idx, pipeline_mode=pl.Buffered(1))
        return pl.BlockSpec(arr.shape, idx)

    inputs = [fcxt, att_feats_bf, p_att_feats_bf]
    act_specs = [tile_spec(R + E), tile_spec(A, R), tile_spec(A, H)]
    if has_mask:
        # mask stays f32: a 2-D bf16 block with an 8-row sublane tile would
        # fight bf16's (16,128) layout, and the (B, A) mask is tiny anyway.
        inputs.append(att_masks.astype(_F32))
        act_specs.append(tile_spec(A))
    inputs += [h_state, c_state] + weights

    out_shape = (jax.ShapeDtypeStruct((B, R), _F32),     # output (after cb mix)
                 jax.ShapeDtypeStruct((2, B, R), _F32),   # new h state
                 jax.ShapeDtypeStruct((2, B, R), _F32))   # new c state
    out_specs = (pl.BlockSpec((TB, R), lambda i: (i, 0)),
                 state_spec(), state_spec())

    kernel = functools.partial(_topdown_kernel, rnn_size=R, cb_weight=cb_weight,
                               has_mask=has_mask, attn_bf16=attn_bf16)
    cost = _cost_estimate(B, A, R, E, H, has_mask, weight_bytes)

    def _run(single_buffer):
        limit = vmem_limit_bytes
        if limit is None:
            limit = _derive_vmem_limit(TB, A, R, E, H, has_mask, attn_bf16,
                                       weight_bytes, single_buffer)
        in_specs = (act_specs + [state_spec(), state_spec()]
                    + [resident_spec(w, single_buffer) for w in weights])
        return pl.pallas_call(
            kernel,
            grid=grid,
            in_specs=in_specs,
            out_specs=out_specs,
            out_shape=out_shape,
            cost_estimate=cost,
            compiler_params=pltpu.CompilerParams(
                # batch tiles are independent -> shard across v7x's 2 TensorCores
                dimension_semantics=("parallel",),
                vmem_limit_bytes=limit,
            ),
        )(*inputs)

    if single_buffer_weights:
        try:
            out, h_new, c_new = _run(True)
        except Exception:
            # TODO(synk): pipeline_mode=pl.Buffered(1) unsupported on this jax
            # version; fall back to default double-buffered resident weights.
            out, h_new, c_new = _run(False)
    else:
        out, h_new, c_new = _run(False)
    return out, (h_new, c_new)


# ----------------------------- pure-JAX reference -----------------------------
def _reference(xt, fc, attf, pattf, state, params, cb_weight, att_masks=None):
    def lstm(x, h, c, w_ih_t, w_hh_t, b):
        R = h.shape[1]
        g = x @ w_ih_t + h @ w_hh_t + b
        i, f = jax.nn.sigmoid(g[:, :R]), jax.nn.sigmoid(g[:, R:2 * R])
        gg, o = jnp.tanh(g[:, 2 * R:3 * R]), jax.nn.sigmoid(g[:, 3 * R:])
        c_new = f * c + i * gg
        return o * jnp.tanh(c_new), c_new

    h_stack, c_stack = state
    prev_h = h_stack[-1]
    h_att, c_att = lstm(jnp.concatenate([prev_h, fc, xt], 1),
                        h_stack[0], c_stack[0],
                        params["att_w_ih_t"], params["att_w_hh_t"], params["att_b"])
    att_h = h_att @ params["h2att_w_t"] + params["h2att_b"]
    dot = jnp.tanh(pattf + att_h[:, None, :])
    alpha = jnp.sum(dot * params["alpha_w"], axis=2) + params["alpha_b"]
    w = jax.nn.softmax(alpha, axis=1)
    if att_masks is not None:
        w = w * att_masks
        w = w / jnp.sum(w, axis=1, keepdims=True)
    att_res = jnp.einsum("ba,bar->br", w, attf)
    h_lang, c_lang = lstm(jnp.concatenate([att_res, h_att], 1),
                          h_stack[1], c_stack[1],
                          params["lang_w_ih_t"], params["lang_w_hh_t"],
                          params["lang_b"])
    B, R = h_lang.shape
    h3 = h_lang.reshape(B // 2, 2, R)
    h_out = (h3 + cb_weight * jax.nn.relu(h3[:, ::-1, :])).reshape(B, R)
    return h_out, (jnp.stack([h_att, h_lang]), jnp.stack([c_att, c_lang]))


if __name__ == "__main__":
    # small shapes; B even, auto batch tile picks TB=8 -> 4 grid steps
    B, E, R, H, A = 32, 40, 32, 32, 16
    CB_WEIGHT = 0.5

    key = jax.random.PRNGKey(0)
    ks = jax.random.split(key, 20)
    f32 = jnp.float32

    xt = jax.random.normal(ks[0], (B, E), f32)
    fc_feats = jax.random.normal(ks[1], (B, R), f32)
    att_feats = jax.random.normal(ks[2], (B, A, R), f32)
    p_att_feats = jax.random.normal(ks[3], (B, A, H), f32)
    state = (jax.random.normal(ks[4], (2, B, R), f32) * 0.1,
             jax.random.normal(ks[5], (2, B, R), f32) * 0.1)

    params = {
        # att_lstm: input = prev_h(R) | fc(R) | xt(E)  ->  4R gates (i,f,g,o)
        "att_w_ih_t": jax.random.normal(ks[6], (2 * R + E, 4 * R), f32) * 0.1,
        "att_w_hh_t": jax.random.normal(ks[7], (R, 4 * R), f32) * 0.1,
        "att_b": jax.random.normal(ks[8], (1, 4 * R), f32) * 0.1,   # b_ih + b_hh
        # lang_lstm: input = att(R) | h_att(R)
        "lang_w_ih_t": jax.random.normal(ks[9], (2 * R, 4 * R), f32) * 0.1,
        "lang_w_hh_t": jax.random.normal(ks[10], (R, 4 * R), f32) * 0.1,
        "lang_b": jax.random.normal(ks[11], (1, 4 * R), f32) * 0.1,
        # attention
        "h2att_w_t": jax.random.normal(ks[12], (R, H), f32) * 0.1,
        "h2att_b": jax.random.normal(ks[13], (1, H), f32) * 0.1,
        "alpha_w": jax.random.normal(ks[14], (1, 1, H), f32) * 0.1,
        "alpha_b": jax.random.normal(ks[15], (1, 1), f32) * 0.1,   # no-op in kernel
    }

    # one-time prep (hoisted out of the per-decode-step path)
    prep = prepare_topdown_params(params, rnn_size=R)
    attf_bf, pattf_bf = prepare_att_features(att_feats, p_att_feats)

    TOL = 5e-2   # bf16 MXU matmuls / bf16 attention tanh / approx reciprocal

    # --- no-mask path (mask input/math skipped at compile time) ---
    out, new_state = cb_topdown_core(xt, fc_feats, attf_bf, pattf_bf, state,
                                     prep, att_masks=None, cb_weight=CB_WEIGHT)
    jax.block_until_ready(out)
    jax.block_until_ready(new_state)
    ref_out, ref_state = _reference(xt, fc_feats, att_feats, p_att_feats,
                                    state, params, CB_WEIGHT, att_masks=None)
    assert jnp.allclose(out, ref_out, atol=TOL), "output mismatch (no mask)"
    assert jnp.allclose(new_state[0], ref_state[0], atol=TOL), "h state mismatch"
    assert jnp.allclose(new_state[1], ref_state[1], atol=TOL), "c state mismatch"

    # --- masked path ---
    mask = (jax.random.uniform(ks[16], (B, A)) > 0.3).astype(f32)
    mask = mask.at[:, 0].set(1.0)     # keep every row non-empty (avoid 0-denominator)
    out_m, state_m = cb_topdown_core(xt, fc_feats, attf_bf, pattf_bf, state,
                                     prep, att_masks=mask, cb_weight=CB_WEIGHT)
    jax.block_until_ready(out_m)
    jax.block_until_ready(state_m)
    ref_out_m, ref_state_m = _reference(xt, fc_feats, att_feats, p_att_feats,
                                        state, params, CB_WEIGHT, att_masks=mask)
    assert jnp.allclose(out_m, ref_out_m, atol=TOL), "output mismatch (mask)"
    assert jnp.allclose(state_m[0], ref_state_m[0], atol=TOL), "h state mismatch (mask)"
    assert jnp.allclose(state_m[1], ref_state_m[1], atol=TOL), "c state mismatch (mask)"

    print("KERNEL_OK")
</pallas_src>

<mosaic_0001>
module attributes {stable_mosaic.version = 11 : i64} {
  func.func @_topdown_kernel(%arg0: i32, %arg1: memref<8x72xf32, #tpu.memory_space<vmem>>, %arg2: memref<8x16x32xbf16, #tpu.memory_space<vmem>>, %arg3: memref<8x16x32xbf16, #tpu.memory_space<vmem>>, %arg4: memref<2x8x32xf32, #tpu.memory_space<vmem>>, %arg5: memref<2x8x32xf32, #tpu.memory_space<vmem>>, %arg6: memref<32x128xbf16, #tpu.memory_space<vmem>>, %arg7: memref<72x128xbf16, #tpu.memory_space<vmem>>, %arg8: memref<32x128xbf16, #tpu.memory_space<vmem>>, %arg9: memref<1x128xf32, #tpu.memory_space<vmem>>, %arg10: memref<32x128xbf16, #tpu.memory_space<vmem>>, %arg11: memref<32x128xbf16, #tpu.memory_space<vmem>>, %arg12: memref<32x128xbf16, #tpu.memory_space<vmem>>, %arg13: memref<1x128xf32, #tpu.memory_space<vmem>>, %arg14: memref<32x32xbf16, #tpu.memory_space<vmem>>, %arg15: memref<1x32xf32, #tpu.memory_space<vmem>>, %arg16: memref<1x1x32xf32, #tpu.memory_space<vmem>>, %arg17: memref<8x32xf32, #tpu.memory_space<vmem>>, %arg18: memref<2x8x32xf32, #tpu.memory_space<vmem>>, %arg19: memref<2x8x32xf32, #tpu.memory_space<vmem>>) attributes {dimension_semantics = [#tpu.dimension_semantics<parallel>], iteration_bounds = array<i64: 4>, scalar_prefetch = 0 : i64, scratch_operands = 0 : i64, tpu.core_type = #tpu.core_type<tc>, window_params = [{transform_indices = @transform_0, window_bounds = array<i64: 8, 72>}, {transform_indices = @transform_1, window_bounds = array<i64: 8, 16, 32>}, {transform_indices = @transform_2, window_bounds = array<i64: 8, 16, 32>}, {transform_indices = @transform_3, window_bounds = array<i64: 2, 8, 32>}, {transform_indices = @transform_4, window_bounds = array<i64: 2, 8, 32>}, {pipeline_mode = #tpu.pipeline_mode<synchronous>, transform_indices = @transform_5, window_bounds = array<i64: 32, 128>}, {pipeline_mode = #tpu.pipeline_mode<synchronous>, transform_indices = @transform_6, window_bounds = array<i64: 72, 128>}, {pipeline_mode = #tpu.pipeline_mode<synchronous>, transform_indices = @transform_7, window_bounds = array<i64: 32, 128>}, {pipeline_mode = #tpu.pipeline_mode<synchronous>, transform_indices = @transform_8, window_bounds = array<i64: 1, 128>}, {pipeline_mode = #tpu.pipeline_mode<synchronous>, transform_indices = @transform_9, window_bounds = array<i64: 32, 128>}, {pipeline_mode = #tpu.pipeline_mode<synchronous>, transform_indices = @transform_10, window_bounds = array<i64: 32, 128>}, {pipeline_mode = #tpu.pipeline_mode<synchronous>, transform_indices = @transform_11, window_bounds = array<i64: 32, 128>}, {pipeline_mode = #tpu.pipeline_mode<synchronous>, transform_indices = @transform_12, window_bounds = array<i64: 1, 128>}, {pipeline_mode = #tpu.pipeline_mode<synchronous>, transform_indices = @transform_13, window_bounds = array<i64: 32, 32>}, {pipeline_mode = #tpu.pipeline_mode<synchronous>, transform_indices = @transform_14, window_bounds = array<i64: 1, 32>}, {pipeline_mode = #tpu.pipeline_mode<synchronous>, transform_indices = @transform_15, window_bounds = array<i64: 1, 1, 32>}, {transform_indices = @transform_16, window_bounds = array<i64: 8, 32>}, {transform_indices = @transform_17, window_bounds = array<i64: 2, 8, 32>}, {transform_indices = @transform_18, window_bounds = array<i64: 2, 8, 32>}]} {
    %c0 = arith.constant 0 : index
    %c0_0 = arith.constant 0 : index
    %c0_1 = arith.constant 0 : index
    %0 = vector.load %arg4[%c0, %c0_0, %c0_1] : memref<2x8x32xf32, #tpu.memory_space<vmem>>, vector<1x8x32xf32>
    %1 = vector.shape_cast %0 : vector<1x8x32xf32> to vector<8x32xf32>
    %c0_2 = arith.constant 0 : index
    %c0_3 = arith.constant 0 : index
    %c0_4 = arith.constant 0 : index
    %2 = vector.load %arg5[%c0_2, %c0_3, %c0_4] : memref<2x8x32xf32, #tpu.memory_space<vmem>>, vector<1x8x32xf32>
    %3 = vector.shape_cast %2 : vector<1x8x32xf32> to vector<8x32xf32>
    %c1 = arith.constant 1 : index
    %c0_5 = arith.constant 0 : index
    %c0_6 = arith.constant 0 : index
    %4 = vector.load %arg4[%c1, %c0_5, %c0_6] : memref<2x8x32xf32, #tpu.memory_space<vmem>>, vector<1x8x32xf32>
    %5 = vector.shape_cast %4 : vector<1x8x32xf32> to vector<8x32xf32>
    %c1_7 = arith.constant 1 : index
    %c0_8 = arith.constant 0 : index
    %c0_9 = arith.constant 0 : index
    %6 = vector.load %arg5[%c1_7, %c0_8, %c0_9] : memref<2x8x32xf32, #tpu.memory_space<vmem>>, vector<1x8x32xf32>
    %7 = vector.shape_cast %6 : vector<1x8x32xf32> to vector<8x32xf32>
    %8 = arith.truncf %5 : vector<8x32xf32> to vector<8x32xbf16>
    %c0_10 = arith.constant 0 : index
    %c0_11 = arith.constant 0 : index
    %9 = vector.load %arg1[%c0_10, %c0_11] : memref<8x72xf32, #tpu.memory_space<vmem>>, vector<8x72xf32>
    %10 = arith.truncf %9 : vector<8x72xf32> to vector<8x72xbf16>
    %c0_12 = arith.constant 0 : index
    %c0_13 = arith.constant 0 : index
    %11 = vector.load %arg6[%c0_12, %c0_13] : memref<32x128xbf16, #tpu.memory_space<vmem>>, vector<32x128xbf16>
    %cst = arith.constant dense<0.000000e+00> : vector<8x128xf32>
    %12 = tpu.matmul %8, %11, %cst {dimension_numbers = #tpu.dot_dimension_numbers<[1], [0], [0], [1], [0, 0, 1, 1], [], []>} : vector<8x32xbf16>, vector<32x128xbf16>, vector<8x128xf32> -> vector<8x128xf32>
    %c0_14 = arith.constant 0 : index
    %c0_15 = arith.constant 0 : index
    %13 = vector.load %arg7[%c0_14, %c0_15] : memref<72x128xbf16, #tpu.memory_space<vmem>>, vector<72x128xbf16>
    %cst_16 = arith.constant dense<0.000000e+00> : vector<8x128xf32>
    %14 = tpu.matmul %10, %13, %cst_16 {dimension_numbers = #tpu.dot_dimension_numbers<[1], [0], [0], [1], [0, 0, 1, 1], [], []>} : vector<8x72xbf16>, vector<72x128xbf16>, vector<8x128xf32> -> vector<8x128xf32>
    %15 = arith.addf %12, %14 : vector<8x128xf32>
    %16 = arith.truncf %1 : vector<8x32xf32> to vector<8x32xbf16>
    %c0_17 = arith.constant 0 : index
    %c0_18 = arith.constant 0 : index
    %17 = vector.load %arg8[%c0_17, %c0_18] : memref<32x128xbf16, #tpu.memory_space<vmem>>, vector<32x128xbf16>
    %cst_19 = arith.constant dense<0.000000e+00> : vector<8x128xf32>
    %18 = tpu.matmul %16, %17, %cst_19 {dimension_numbers = #tpu.dot_dimension_numbers<[1], [0], [0], [1], [0, 0, 1, 1], [], []>} : vector<8x32xbf16>, vector<32x128xbf16>, vector<8x128xf32> -> vector<8x128xf32>
    %19 = arith.addf %15, %18 : vector<8x128xf32>
    %c0_20 = arith.constant 0 : index
    %c0_21 = arith.constant 0 : index
    %20 = vector.load %arg9[%c0_20, %c0_21] : memref<1x128xf32, #tpu.memory_space<vmem>>, vector<1x128xf32>
    %21 = vector.broadcast %20 : vector<1x128xf32> to vector<8x128xf32>
    %22 = arith.addf %19, %21 : vector<8x128xf32>
    %23 = vector.extract_strided_slice %22 {offsets = [0, 0], sizes = [8, 32], strides = [1, 1]} : vector<8x128xf32> to vector<8x32xf32>
    %24 = arith.negf %23 : vector<8x32xf32>
    %25 = math.exp %24 : vector<8x32xf32>
    %cst_22 = arith.constant 1.000000e+00 : f32
    %26 = vector.broadcast %cst_22 : f32 to vector<8x32xf32>
    %27 = arith.addf %26, %25 : vector<8x32xf32>
    %28 = arith.divf %26, %27 : vector<8x32xf32>
    %29 = vector.extract_strided_slice %22 {offsets = [0, 32], sizes = [8, 32], strides = [1, 1]} : vector<8x128xf32> to vector<8x32xf32>
    %30 = arith.negf %29 : vector<8x32xf32>
    %31 = math.exp %30 : vector<8x32xf32>
    %cst_23 = arith.constant 1.000000e+00 : f32
    %32 = vector.broadcast %cst_23 : f32 to vector<8x32xf32>
    %33 = arith.addf %32, %31 : vector<8x32xf32>
    %34 = arith.divf %32, %33 : vector<8x32xf32>
    %35 = vector.extract_strided_slice %22 {offsets = [0, 64], sizes = [8, 32], strides = [1, 1]} : vector<8x128xf32> to vector<8x32xf32>
    %36 = math.tanh %35 : vector<8x32xf32>
    %37 = vector.extract_strided_slice %22 {offsets = [0, 96], sizes = [8, 32], strides = [1, 1]} : vector<8x128xf32> to vector<8x32xf32>
    %38 = arith.negf %37 : vector<8x32xf32>
    %39 = math.exp %38 : vector<8x32xf32>
    %cst_24 = arith.constant 1.000000e+00 : f32
    %40 = vector.broadcast %cst_24 : f32 to vector<8x32xf32>
    %41 = arith.addf %40, %39 : vector<8x32xf32>
    %42 = arith.divf %40, %41 : vector<8x32xf32>
    %43 = arith.mulf %34, %3 : vector<8x32xf32>
    %44 = arith.mulf %28, %36 : vector<8x32xf32>
    %45 = arith.addf %43, %44 : vector<8x32xf32>
    %46 = math.tanh %45 : vector<8x32xf32>
    %47 = arith.mulf %42, %46 : vector<8x32xf32>
    %48 = arith.truncf %47 : vector<8x32xf32> to vector<8x32xbf16>
    %c0_25 = arith.constant 0 : index
    %c0_26 = arith.constant 0 : index
    %49 = vector.load %arg14[%c0_25, %c0_26] : memref<32x32xbf16, #tpu.memory_space<vmem>>, vector<32x32xbf16>
    %cst_27 = arith.constant dense<0.000000e+00> : vector<8x32xf32>
    %50 = tpu.matmul %48, %49, %cst_27 {dimension_numbers = #tpu.dot_dimension_numbers<[1], [0], [0], [1], [0, 0, 1, 1], [], []>} : vector<8x32xbf16>, vector<32x32xbf16>, vector<8x32xf32> -> vector<8x32xf32>
    %c0_28 = arith.constant 0 : index
    %c0_29 = arith.constant 0 : index
    %51 = vector.load %arg15[%c0_28, %c0_29] : memref<1x32xf32, #tpu.memory_space<vmem>>, vector<1x32xf32>
    %52 = vector.broadcast %51 : vector<1x32xf32> to vector<8x32xf32>
    %53 = arith.addf %50, %52 : vector<8x32xf32>
    %c0_30 = arith.constant 0 : index
    %c0_31 = arith.constant 0 : index
    %c0_32 = arith.constant 0 : index
    %54 = vector.load %arg3[%c0_30, %c0_31, %c0_32] : memref<8x16x32xbf16, #tpu.memory_space<vmem>>, vector<8x16x32xbf16>
    %55 = arith.extf %54 : vector<8x16x32xbf16> to vector<8x16x32xf32>
    %56 = vector.shape_cast %53 : vector<8x32xf32> to vector<8x1x32xf32>
    %57 = vector.broadcast %56 : vector<8x1x32xf32> to vector<8x16x32xf32>
    %58 = arith.addf %55, %57 : vector<8x16x32xf32>
    %59 = math.tanh %58 : vector<8x16x32xf32>
    %c0_33 = arith.constant 0 : index
    %c0_34 = arith.constant 0 : index
    %c0_35 = arith.constant 0 : index
    %60 = vector.load %arg16[%c0_33, %c0_34, %c0_35] : memref<1x1x32xf32, #tpu.memory_space<vmem>>, vector<1x1x32xf32>
    %61 = vector.broadcast %60 : vector<1x1x32xf32> to vector<8x16x32xf32>
    %62 = arith.mulf %59, %61 : vector<8x16x32xf32>
    %cst_36 = arith.constant dense<0.000000e+00> : vector<8x16xf32>
    %63 = vector.multi_reduction <add>, %62, %cst_36 [2] : vector<8x16x32xf32> to vector<8x16xf32>
    %cst_37 = arith.constant dense<0xFF800000> : vector<8xf32>
    %64 = vector.multi_reduction <maximumf>, %63, %cst_37 [1] : vector<8x16xf32> to vector<8xf32>
    %65 = vector.shape_cast %64 : vector<8xf32> to vector<8x1xf32>
    %66 = vector.broadcast %65 : vector<8x1xf32> to vector<8x16xf32>
    %67 = arith.subf %63, %66 : vector<8x16xf32>
    %68 = math.exp %67 : vector<8x16xf32>
    %cst_38 = arith.constant dense<0.000000e+00> : vector<8xf32>
    %69 = vector.multi_reduction <add>, %68, %cst_38 [1] : vector<8x16xf32> to vector<8xf32>
    %70 = vector.shape_cast %69 : vector<8xf32> to vector<8x1xf32>
    %71 = tpu.reciprocal %70 {approx = true} : vector<8x1xf32> -> vector<8x1xf32>
    %72 = vector.broadcast %71 : vector<8x1xf32> to vector<8x16xf32>
    %73 = arith.mulf %68, %72 : vector<8x16xf32>
    %c0_39 = arith.constant 0 : index
    %c0_40 = arith.constant 0 : index
    %c0_41 = arith.constant 0 : index
    %74 = vector.load %arg2[%c0_39, %c0_40, %c0_41] : memref<8x16x32xbf16, #tpu.memory_space<vmem>>, vector<8x16x32xbf16>
    %75 = vector.shape_cast %73 : vector<8x16xf32> to vector<8x16x1xf32>
    %76 = arith.extf %74 : vector<8x16x32xbf16> to vector<8x16x32xf32>
    %77 = vector.broadcast %75 : vector<8x16x1xf32> to vector<8x16x32xf32>
    %78 = arith.mulf %76, %77 : vector<8x16x32xf32>
    %cst_42 = arith.constant dense<0.000000e+00> : vector<8x32xf32>
    %79 = vector.multi_reduction <add>, %78, %cst_42 [1] : vector<8x16x32xf32> to vector<8x32xf32>
    %80 = arith.truncf %79 : vector<8x32xf32> to vector<8x32xbf16>
    %c0_43 = arith.constant 0 : index
    %c0_44 = arith.constant 0 : index
    %81 = vector.load %arg10[%c0_43, %c0_44] : memref<32x128xbf16, #tpu.memory_space<vmem>>, vector<32x128xbf16>
    %cst_45 = arith.constant dense<0.000000e+00> : vector<8x128xf32>
    %82 = tpu.matmul %80, %81, %cst_45 {dimension_numbers = #tpu.dot_dimension_numbers<[1], [0], [0], [1], [0, 0, 1, 1], [], []>} : vector<8x32xbf16>, vector<32x128xbf16>, vector<8x128xf32> -> vector<8x128xf32>
    %83 = arith.truncf %47 : vector<8x32xf32> to vector<8x32xbf16>
    %c0_46 = arith.constant 0 : index
    %c0_47 = arith.constant 0 : index
    %84 = vector.load %arg11[%c0_46, %c0_47] : memref<32x128xbf16, #tpu.memory_space<vmem>>, vector<32x128xbf16>
    %cst_48 = arith.constant dense<0.000000e+00> : vector<8x128xf32>
    %85 = tpu.matmul %83, %84, %cst_48 {dimension_numbers = #tpu.dot_dimension_numbers<[1], [0], [0], [1], [0, 0, 1, 1], [], []>} : vector<8x32xbf16>, vector<32x128xbf16>, vector<8x128xf32> -> vector<8x128xf32>
    %86 = arith.addf %82, %85 : vector<8x128xf32>
    %c0_49 = arith.constant 0 : index
    %c0_50 = arith.constant 0 : index
    %87 = vector.load %arg12[%c0_49, %c0_50] : memref<32x128xbf16, #tpu.memory_space<vmem>>, vector<32x128xbf16>
    %cst_51 = arith.constant dense<0.000000e+00> : vector<8x128xf32>
    %88 = tpu.matmul %8, %87, %cst_51 {dimension_numbers = #tpu.dot_dimension_numbers<[1], [0], [0], [1], [0, 0, 1, 1], [], []>} : vector<8x32xbf16>, vector<32x128xbf16>, vector<8x128xf32> -> vector<8x128xf32>
    %89 = arith.addf %86, %88 : vector<8x128xf32>
    %c0_52 = arith.constant 0 : index
    %c0_53 = arith.constant 0 : index
    %90 = vector.load %arg13[%c0_52, %c0_53] : memref<1x128xf32, #tpu.memory_space<vmem>>, vector<1x128xf32>
    %91 = vector.broadcast %90 : vector<1x128xf32> to vector<8x128xf32>
    %92 = arith.addf %89, %91 : vector<8x128xf32>
    %93 = vector.extract_strided_slice %92 {offsets = [0, 0], sizes = [8, 32], strides = [1, 1]} : vector<8x128xf32> to vector<8x32xf32>
    %94 = arith.negf %93 : vector<8x32xf32>
    %95 = math.exp %94 : vector<8x32xf32>
    %cst_54 = arith.constant 1.000000e+00 : f32
    %96 = vector.broadcast %cst_54 : f32 to vector<8x32xf32>
    %97 = arith.addf %96, %95 : vector<8x32xf32>
    %98 = arith.divf %96, %97 : vector<8x32xf32>
    %99 = vector.extract_strided_slice %92 {offsets = [0, 32], sizes = [8, 32], strides = [1, 1]} : vector<8x128xf32> to vector<8x32xf32>
    %100 = arith.negf %99 : vector<8x32xf32>
    %101 = math.exp %100 : vector<8x32xf32>
    %cst_55 = arith.constant 1.000000e+00 : f32
    %102 = vector.broadcast %cst_55 : f32 to vector<8x32xf32>
    %103 = arith.addf %102, %101 : vector<8x32xf32>
    %104 = arith.divf %102, %103 : vector<8x32xf32>
    %105 = vector.extract_strided_slice %92 {offsets = [0, 64], sizes = [8, 32], strides = [1, 1]} : vector<8x128xf32> to vector<8x32xf32>
    %106 = math.tanh %105 : vector<8x32xf32>
    %107 = vector.extract_strided_slice %92 {offsets = [0, 96], sizes = [8, 32], strides = [1, 1]} : vector<8x128xf32> to vector<8x32xf32>
    %108 = arith.negf %107 : vector<8x32xf32>
    %109 = math.exp %108 : vector<8x32xf32>
    %cst_56 = arith.constant 1.000000e+00 : f32
    %110 = vector.broadcast %cst_56 : f32 to vector<8x32xf32>
    %111 = arith.addf %110, %109 : vector<8x32xf32>
    %112 = arith.divf %110, %111 : vector<8x32xf32>
    %113 = arith.mulf %104, %7 : vector<8x32xf32>
    %114 = arith.mulf %98, %106 : vector<8x32xf32>
    %115 = arith.addf %113, %114 : vector<8x32xf32>
    %116 = math.tanh %115 : vector<8x32xf32>
    %117 = arith.mulf %112, %116 : vector<8x32xf32>
    %c0_57 = arith.constant 0 : index
    %c0_58 = arith.constant 0 : index
    %c0_59 = arith.constant 0 : index
    %118 = vector.load %arg18[%c0_57, %c0_58, %c0_59] : memref<2x8x32xf32, #tpu.memory_space<vmem>>, vector<1x8x32xf32>
    %119 = vector.shape_cast %118 : vector<1x8x32xf32> to vector<8x32xf32>
    %120 = vector.shape_cast %47 : vector<8x32xf32> to vector<1x8x32xf32>
    tpu.vector_store %arg18[%c0_57, %c0_58, %c0_59], %120 {strides = array<i32>} : memref<2x8x32xf32, #tpu.memory_space<vmem>>, vector<1x8x32xf32>,
    %c1_60 = arith.constant 1 : index
    %c0_61 = arith.constant 0 : index
    %c0_62 = arith.constant 0 : index
    %121 = vector.load %arg18[%c1_60, %c0_61, %c0_62] : memref<2x8x32xf32, #tpu.memory_space<vmem>>, vector<1x8x32xf32>
    %122 = vector.shape_cast %121 : vector<1x8x32xf32> to vector<8x32xf32>
    %123 = vector.shape_cast %117 : vector<8x32xf32> to vector<1x8x32xf32>
    tpu.vector_store %arg18[%c1_60, %c0_61, %c0_62], %123 {strides = array<i32>} : memref<2x8x32xf32, #tpu.memory_space<vmem>>, vector<1x8x32xf32>,
    %c0_63 = arith.constant 0 : index
    %c0_64 = arith.constant 0 : index
    %c0_65 = arith.constant 0 : index
    %124 = vector.load %arg19[%c0_63, %c0_64, %c0_65] : memref<2x8x32xf32, #tpu.memory_space<vmem>>, vector<1x8x32xf32>
    %125 = vector.shape_cast %124 : vector<1x8x32xf32> to vector<8x32xf32>
    %126 = vector.shape_cast %45 : vector<8x32xf32> to vector<1x8x32xf32>
    tpu.vector_store %arg19[%c0_63, %c0_64, %c0_65], %126 {strides = array<i32>} : memref<2x8x32xf32, #tpu.memory_space<vmem>>, vector<1x8x32xf32>,
    %c1_66 = arith.constant 1 : index
    %c0_67 = arith.constant 0 : index
    %c0_68 = arith.constant 0 : index
    %127 = vector.load %arg19[%c1_66, %c0_67, %c0_68] : memref<2x8x32xf32, #tpu.memory_space<vmem>>, vector<1x8x32xf32>
    %128 = vector.shape_cast %127 : vector<1x8x32xf32> to vector<8x32xf32>
    %129 = vector.shape_cast %115 : vector<8x32xf32> to vector<1x8x32xf32>
    tpu.vector_store %arg19[%c1_66, %c0_67, %c0_68], %129 {strides = array<i32>} : memref<2x8x32xf32, #tpu.memory_space<vmem>>, vector<1x8x32xf32>,
    %cst_69 = arith.constant 0.000000e+00 : f32
    %130 = vector.broadcast %cst_69 : f32 to vector<8x32xf32>
    %131 = arith.maximumf %117, %130 : vector<8x32xf32>
    %c1_i32 = arith.constant 1 : i32
    %132 = tpu.dynamic_rotate %131 by %c1_i32 dim 0 : vector<8x32xf32>, i32 -> vector<8x32xf32>
    %c7_i32 = arith.constant 7 : i32
    %133 = tpu.dynamic_rotate %131 by %c7_i32 dim 0 : vector<8x32xf32>, i32 -> vector<8x32xf32>
    %134 = tpu.iota {dimensions = array<i32: 0>} : vector<8x1xi32>
    %c1_i32_70 = arith.constant 1 : i32
    %135 = vector.broadcast %c1_i32_70 : i32 to vector<8x1xi32>
    %136 = arith.andi %134, %135 : vector<8x1xi32>
    %c0_i32 = arith.constant 0 : i32
    %137 = vector.broadcast %c0_i32 : i32 to vector<8x1xi32>
    %138 = arith.cmpi eq, %136, %137 : vector<8x1xi32>
    %139 = vector.shape_cast %138 : vector<8x1xi1> to vector<8x1xi1>
    %140 = vector.broadcast %139 : vector<8x1xi1> to vector<8x32xi1>
    %141 = arith.select %140, %133, %132 : vector<8x32xi1>, vector<8x32xf32>
    %cst_71 = arith.constant 5.000000e-01 : f32
    %142 = vector.broadcast %cst_71 : f32 to vector<8x32xf32>
    %143 = arith.mulf %142, %141 : vector<8x32xf32>
    %144 = arith.addf %117, %143 : vector<8x32xf32>
    %c0_72 = arith.constant 0 : index
    %c0_73 = arith.constant 0 : index
    %145 = vector.load %arg17[%c0_72, %c0_73] : memref<8x32xf32, #tpu.memory_space<vmem>>, vector<8x32xf32>
    tpu.vector_store %arg17[%c0_72, %c0_73], %144 {strides = array<i32>} : memref<8x32xf32, #tpu.memory_space<vmem>>, vector<8x32xf32>,
    return
  }
  func.func @transform_0(%arg0: i32) -> (i32, i32) {
    %c0_i32 = arith.constant 0 : i32
    %c0_i32_0 = arith.constant 0 : i32
    return %arg0, %c0_i32 : i32, i32
  }
  func.func @transform_1(%arg0: i32) -> (i32, i32, i32) {
    %c0_i32 = arith.constant 0 : i32
    %c0_i32_0 = arith.constant 0 : i32
    %c0_i32_1 = arith.constant 0 : i32
    return %arg0, %c0_i32, %c0_i32_0 : i32, i32, i32
  }
  func.func @transform_2(%arg0: i32) -> (i32, i32, i32) {
    %c0_i32 = arith.constant 0 : i32
    %c0_i32_0 = arith.constant 0 : i32
    %c0_i32_1 = arith.constant 0 : i32
    return %arg0, %c0_i32, %c0_i32_0 : i32, i32, i32
  }
  func.func @transform_3(%arg0: i32) -> (i32, i32, i32) {
    %c0_i32 = arith.constant 0 : i32
    %c0_i32_0 = arith.constant 0 : i32
    %c0_i32_1 = arith.constant 0 : i32
    return %c0_i32, %arg0, %c0_i32_0 : i32, i32, i32
  }
  func.func @transform_4(%arg0: i32) -> (i32, i32, i32) {
    %c0_i32 = arith.constant 0 : i32
    %c0_i32_0 = arith.constant 0 : i32
    %c0_i32_1 = arith.constant 0 : i32
    return %c0_i32, %arg0, %c0_i32_0 : i32, i32, i32
  }
  func.func @transform_5(%arg0: i32) -> (i32, i32) {
    %c0_i32 = arith.constant 0 : i32
    %c0_i32_0 = arith.constant 0 : i32
    %c0_i32_1 = arith.constant 0 : i32
    return %c0_i32, %c0_i32_0 : i32, i32
  }
  func.func @transform_6(%arg0: i32) -> (i32, i32) {
    %c0_i32 = arith.constant 0 : i32
    %c0_i32_0 = arith.constant 0 : i32
    %c0_i32_1 = arith.constant 0 : i32
    return %c0_i32, %c0_i32_0 : i32, i32
  }
  func.func @transform_7(%arg0: i32) -> (i32, i32) {
    %c0_i32 = arith.constant 0 : i32
    %c0_i32_0 = arith.constant 0 : i32
    %c0_i32_1 = arith.constant 0 : i32
    return %c0_i32, %c0_i32_0 : i32, i32
  }
  func.func @transform_8(%arg0: i32) -> (i32, i32) {
    %c0_i32 = arith.constant 0 : i32
    %c0_i32_0 = arith.constant 0 : i32
    %c0_i32_1 = arith.constant 0 : i32
    return %c0_i32, %c0_i32_0 : i32, i32
  }
  func.func @transform_9(%arg0: i32) -> (i32, i32) {
    %c0_i32 = arith.constant 0 : i32
    %c0_i32_0 = arith.constant 0 : i32
    %c0_i32_1 = arith.constant 0 : i32
    return %c0_i32, %c0_i32_0 : i32, i32
  }
  func.func @transform_10(%arg0: i32) -> (i32, i32) {
    %c0_i32 = arith.constant 0 : i32
    %c0_i32_0 = arith.constant 0 : i32
    %c0_i32_1 = arith.constant 0 : i32
    return %c0_i32, %c0_i32_0 : i32, i32
  }
  func.func @transform_11(%arg0: i32) -> (i32, i32) {
    %c0_i32 = arith.constant 0 : i32
    %c0_i32_0 = arith.constant 0 : i32
    %c0_i32_1 = arith.constant 0 : i32
    return %c0_i32, %c0_i32_0 : i32, i32
  }
  func.func @transform_12(%arg0: i32) -> (i32, i32) {
    %c0_i32 = arith.constant 0 : i32
    %c0_i32_0 = arith.constant 0 : i32
    %c0_i32_1 = arith.constant 0 : i32
    return %c0_i32, %c0_i32_0 : i32, i32
  }
  func.func @transform_13(%arg0: i32) -> (i32, i32) {
    %c0_i32 = arith.constant 0 : i32
    %c0_i32_0 = arith.constant 0 : i32
    %c0_i32_1 = arith.constant 0 : i32
    return %c0_i32, %c0_i32_0 : i32, i32
  }
  func.func @transform_14(%arg0: i32) -> (i32, i32) {
    %c0_i32 = arith.constant 0 : i32
    %c0_i32_0 = arith.constant 0 : i32
    %c0_i32_1 = arith.constant 0 : i32
    return %c0_i32, %c0_i32_0 : i32, i32
  }
  func.func @transform_15(%arg0: i32) -> (i32, i32, i32) {
    %c0_i32 = arith.constant 0 : i32
    %c0_i32_0 = arith.constant 0 : i32
    %c0_i32_1 = arith.constant 0 : i32
    %c0_i32_2 = arith.constant 0 : i32
    return %c0_i32, %c0_i32_0, %c0_i32_1 : i32, i32, i32
  }
  func.func @transform_16(%arg0: i32) -> (i32, i32) {
    %c0_i32 = arith.constant 0 : i32
    %c0_i32_0 = arith.constant 0 : i32
    return %arg0, %c0_i32 : i32, i32
  }
  func.func @transform_17(%arg0: i32) -> (i32, i32, i32) {
    %c0_i32 = arith.constant 0 : i32
    %c0_i32_0 = arith.constant 0 : i32
    %c0_i32_1 = arith.constant 0 : i32
    return %c0_i32, %arg0, %c0_i32_0 : i32, i32, i32
  }
  func.func @transform_18(%arg0: i32) -> (i32, i32, i32) {
    %c0_i32 = arith.constant 0 : i32
    %c0_i32_0 = arith.constant 0 : i32
    %c0_i32_1 = arith.constant 0 : i32
    return %c0_i32, %arg0, %c0_i32_0 : i32, i32, i32
  }
}

module attributes {stable_mosaic.version = 11 : i64} {
  func.func @_topdown_kernel(%arg0: i32, %arg1: memref<8x72xf32, #tpu.memory_space<vmem>>, %arg2: memref<8x16x32xbf16, #tpu.memory_space<vmem>>, %arg3: memref<8x16x32xbf16, #tpu.memory_space<vmem>>, %arg4: memref<2x8x32xf32, #tpu.memory_space<vmem>>, %arg5: memref<2x8x32xf32, #tpu.memory_space<vmem>>, %arg6: memref<32x128xbf16, #tpu.memory_space<vmem>>, %arg7: memref<72x128xbf16, #tpu.memory_space<vmem>>, %arg8: memref<32x128xbf16, #tpu.memory_space<vmem>>, %arg9: memref<1x128xf32, #tpu.memory_space<vmem>>, %arg10: memref<32x128xbf16, #tpu.memory_space<vmem>>, %arg11: memref<32x128xbf16, #tpu.memory_space<vmem>>, %arg12: memref<32x128xbf16, #tpu.memory_space<vmem>>, %arg13: memref<1x128xf32, #tpu.memory_space<vmem>>, %arg14: memref<32x32xbf16, #tpu.memory_space<vmem>>, %arg15: memref<1x32xf32, #tpu.memory_space<vmem>>, %arg16: memref<1x1x32xf32, #tpu.memory_space<vmem>>, %arg17: memref<8x32xf32, #tpu.memory_space<vmem>>, %arg18: memref<2x8x32xf32, #tpu.memory_space<vmem>>, %arg19: memref<2x8x32xf32, #tpu.memory_space<vmem>>) attributes {dimension_semantics = [#tpu.dimension_semantics<parallel>], iteration_bounds = array<i64: 4>, scalar_prefetch = 0 : i64, scratch_operands = 0 : i64, tpu.core_type = #tpu.core_type<tc>, window_params = [{transform_indices = @transform_0, window_bounds = array<i64: 8, 72>}, {transform_indices = @transform_1, window_bounds = array<i64: 8, 16, 32>}, {transform_indices = @transform_2, window_bounds = array<i64: 8, 16, 32>}, {transform_indices = @transform_3, window_bounds = array<i64: 2, 8, 32>}, {transform_indices = @transform_4, window_bounds = array<i64: 2, 8, 32>}, {pipeline_mode = #tpu.pipeline_mode<synchronous>, transform_indices = @transform_5, window_bounds = array<i64: 32, 128>}, {pipeline_mode = #tpu.pipeline_mode<synchronous>, transform_indices = @transform_6, window_bounds = array<i64: 72, 128>}, {pipeline_mode = #tpu.pipeline_mode<synchronous>, transform_indices = @transform_7, window_bounds = array<i64: 32, 128>}, {pipeline_mode = #tpu.pipeline_mode<synchronous>, transform_indices = @transform_8, window_bounds = array<i64: 1, 128>}, {pipeline_mode = #tpu.pipeline_mode<synchronous>, transform_indices = @transform_9, window_bounds = array<i64: 32, 128>}, {pipeline_mode = #tpu.pipeline_mode<synchronous>, transform_indices = @transform_10, window_bounds = array<i64: 32, 128>}, {pipeline_mode = #tpu.pipeline_mode<synchronous>, transform_indices = @transform_11, window_bounds = array<i64: 32, 128>}, {pipeline_mode = #tpu.pipeline_mode<synchronous>, transform_indices = @transform_12, window_bounds = array<i64: 1, 128>}, {pipeline_mode = #tpu.pipeline_mode<synchronous>, transform_indices = @transform_13, window_bounds = array<i64: 32, 32>}, {pipeline_mode = #tpu.pipeline_mode<synchronous>, transform_indices = @transform_14, window_bounds = array<i64: 1, 32>}, {pipeline_mode = #tpu.pipeline_mode<synchronous>, transform_indices = @transform_15, window_bounds = array<i64: 1, 1, 32>}, {transform_indices = @transform_16, window_bounds = array<i64: 8, 32>}, {transform_indices = @transform_17, window_bounds = array<i64: 2, 8, 32>}, {transform_indices = @transform_18, window_bounds = array<i64: 2, 8, 32>}]} {
    %c0 = arith.constant 0 : index
    %c0_0 = arith.constant 0 : index
    %c0_1 = arith.constant 0 : index
    %0 = vector.load %arg4[%c0, %c0_0, %c0_1] : memref<2x8x32xf32, #tpu.memory_space<vmem>>, vector<1x8x32xf32>
    %1 = vector.shape_cast %0 : vector<1x8x32xf32> to vector<8x32xf32>
    %c0_2 = arith.constant 0 : index
    %c0_3 = arith.constant 0 : index
    %c0_4 = arith.constant 0 : index
    %2 = vector.load %arg5[%c0_2, %c0_3, %c0_4] : memref<2x8x32xf32, #tpu.memory_space<vmem>>, vector<1x8x32xf32>
    %3 = vector.shape_cast %2 : vector<1x8x32xf32> to vector<8x32xf32>
    %c1 = arith.constant 1 : index
    %c0_5 = arith.constant 0 : index
    %c0_6 = arith.constant 0 : index
    %4 = vector.load %arg4[%c1, %c0_5, %c0_6] : memref<2x8x32xf32, #tpu.memory_space<vmem>>, vector<1x8x32xf32>
    %5 = vector.shape_cast %4 : vector<1x8x32xf32> to vector<8x32xf32>
    %c1_7 = arith.constant 1 : index
    %c0_8 = arith.constant 0 : index
    %c0_9 = arith.constant 0 : index
    %6 = vector.load %arg5[%c1_7, %c0_8, %c0_9] : memref<2x8x32xf32, #tpu.memory_space<vmem>>, vector<1x8x32xf32>
    %7 = vector.shape_cast %6 : vector<1x8x32xf32> to vector<8x32xf32>
    %8 = arith.truncf %5 : vector<8x32xf32> to vector<8x32xbf16>
    %c0_10 = arith.constant 0 : index
    %c0_11 = arith.constant 0 : index
    %9 = vector.load %arg1[%c0_10, %c0_11] : memref<8x72xf32, #tpu.memory_space<vmem>>, vector<8x72xf32>
    %10 = arith.truncf %9 : vector<8x72xf32> to vector<8x72xbf16>
    %c0_12 = arith.constant 0 : index
    %c0_13 = arith.constant 0 : index
    %11 = vector.load %arg6[%c0_12, %c0_13] : memref<32x128xbf16, #tpu.memory_space<vmem>>, vector<32x128xbf16>
    %cst = arith.constant dense<0.000000e+00> : vector<8x128xf32>
    %12 = tpu.matmul %8, %11, %cst {dimension_numbers = #tpu.dot_dimension_numbers<[1], [0], [0], [1], [0, 0, 1, 1], [], []>} : vector<8x32xbf16>, vector<32x128xbf16>, vector<8x128xf32> -> vector<8x128xf32>
    %c0_14 = arith.constant 0 : index
    %c0_15 = arith.constant 0 : index
    %13 = vector.load %arg7[%c0_14, %c0_15] : memref<72x128xbf16, #tpu.memory_space<vmem>>, vector<72x128xbf16>
    %cst_16 = arith.constant dense<0.000000e+00> : vector<8x128xf32>
    %14 = tpu.matmul %10, %13, %cst_16 {dimension_numbers = #tpu.dot_dimension_numbers<[1], [0], [0], [1], [0, 0, 1, 1], [], []>} : vector<8x72xbf16>, vector<72x128xbf16>, vector<8x128xf32> -> vector<8x128xf32>
    %15 = arith.addf %12, %14 : vector<8x128xf32>
    %16 = arith.truncf %1 : vector<8x32xf32> to vector<8x32xbf16>
    %c0_17 = arith.constant 0 : index
    %c0_18 = arith.constant 0 : index
    %17 = vector.load %arg8[%c0_17, %c0_18] : memref<32x128xbf16, #tpu.memory_space<vmem>>, vector<32x128xbf16>
    %cst_19 = arith.constant dense<0.000000e+00> : vector<8x128xf32>
    %18 = tpu.matmul %16, %17, %cst_19 {dimension_numbers = #tpu.dot_dimension_numbers<[1], [0], [0], [1], [0, 0, 1, 1], [], []>} : vector<8x32xbf16>, vector<32x128xbf16>, vector<8x128xf32> -> vector<8x128xf32>
    %19 = arith.addf %15, %18 : vector<8x128xf32>
    %c0_20 = arith.constant 0 : index
    %c0_21 = arith.constant 0 : index
    %20 = vector.load %arg9[%c0_20, %c0_21] : memref<1x128xf32, #tpu.memory_space<vmem>>, vector<1x128xf32>
    %21 = vector.broadcast %20 : vector<1x128xf32> to vector<8x128xf32>
    %22 = arith.addf %19, %21 : vector<8x128xf32>
    %23 = vector.extract_strided_slice %22 {offsets = [0, 0], sizes = [8, 32], strides = [1, 1]} : vector<8x128xf32> to vector<8x32xf32>
    %24 = arith.negf %23 : vector<8x32xf32>
    %25 = math.exp %24 : vector<8x32xf32>
    %cst_22 = arith.constant 1.000000e+00 : f32
    %26 = vector.broadcast %cst_22 : f32 to vector<8x32xf32>
    %27 = arith.addf %26, %25 : vector<8x32xf32>
    %28 = arith.divf %26, %27 : vector<8x32xf32>
    %29 = vector.extract_strided_slice %22 {offsets = [0, 32], sizes = [8, 32], strides = [1, 1]} : vector<8x128xf32> to vector<8x32xf32>
    %30 = arith.negf %29 : vector<8x32xf32>
    %31 = math.exp %30 : vector<8x32xf32>
    %cst_23 = arith.constant 1.000000e+00 : f32
    %32 = vector.broadcast %cst_23 : f32 to vector<8x32xf32>
    %33 = arith.addf %32, %31 : vector<8x32xf32>
    %34 = arith.divf %32, %33 : vector<8x32xf32>
    %35 = vector.extract_strided_slice %22 {offsets = [0, 64], sizes = [8, 32], strides = [1, 1]} : vector<8x128xf32> to vector<8x32xf32>
    %36 = math.tanh %35 : vector<8x32xf32>
    %37 = vector.extract_strided_slice %22 {offsets = [0, 96], sizes = [8, 32], strides = [1, 1]} : vector<8x128xf32> to vector<8x32xf32>
    %38 = arith.negf %37 : vector<8x32xf32>
    %39 = math.exp %38 : vector<8x32xf32>
    %cst_24 = arith.constant 1.000000e+00 : f32
    %40 = vector.broadcast %cst_24 : f32 to vector<8x32xf32>
    %41 = arith.addf %40, %39 : vector<8x32xf32>
    %42 = arith.divf %40, %41 : vector<8x32xf32>
    %43 = arith.mulf %34, %3 : vector<8x32xf32>
    %44 = arith.mulf %28, %36 : vector<8x32xf32>
    %45 = arith.addf %43, %44 : vector<8x32xf32>
    %46 = math.tanh %45 : vector<8x32xf32>
    %47 = arith.mulf %42, %46 : vector<8x32xf32>
    %48 = arith.truncf %47 : vector<8x32xf32> to vector<8x32xbf16>
    %c0_25 = arith.constant 0 : index
    %c0_26 = arith.constant 0 : index
    %49 = vector.load %arg14[%c0_25, %c0_26] : memref<32x32xbf16, #tpu.memory_space<vmem>>, vector<32x32xbf16>
    %cst_27 = arith.constant dense<0.000000e+00> : vector<8x32xf32>
    %50 = tpu.matmul %48, %49, %cst_27 {dimension_numbers = #tpu.dot_dimension_numbers<[1], [0], [0], [1], [0, 0, 1, 1], [], []>} : vector<8x32xbf16>, vector<32x32xbf16>, vector<8x32xf32> -> vector<8x32xf32>
    %c0_28 = arith.constant 0 : index
    %c0_29 = arith.constant 0 : index
    %51 = vector.load %arg15[%c0_28, %c0_29] : memref<1x32xf32, #tpu.memory_space<vmem>>, vector<1x32xf32>
    %52 = vector.broadcast %51 : vector<1x32xf32> to vector<8x32xf32>
    %53 = arith.addf %50, %52 : vector<8x32xf32>
    %c0_30 = arith.constant 0 : index
    %c0_31 = arith.constant 0 : index
    %c0_32 = arith.constant 0 : index
    %54 = vector.load %arg3[%c0_30, %c0_31, %c0_32] : memref<8x16x32xbf16, #tpu.memory_space<vmem>>, vector<8x16x32xbf16>
    %55 = arith.extf %54 : vector<8x16x32xbf16> to vector<8x16x32xf32>
    %56 = vector.shape_cast %53 : vector<8x32xf32> to vector<8x1x32xf32>
    %57 = vector.broadcast %56 : vector<8x1x32xf32> to vector<8x16x32xf32>
    %58 = arith.addf %55, %57 : vector<8x16x32xf32>
    %59 = math.tanh %58 : vector<8x16x32xf32>
    %c0_33 = arith.constant 0 : index
    %c0_34 = arith.constant 0 : index
    %c0_35 = arith.constant 0 : index
    %60 = vector.load %arg16[%c0_33, %c0_34, %c0_35] : memref<1x1x32xf32, #tpu.memory_space<vmem>>, vector<1x1x32xf32>
    %61 = vector.broadcast %60 : vector<1x1x32xf32> to vector<8x16x32xf32>
    %62 = arith.mulf %59, %61 : vector<8x16x32xf32>
    %cst_36 = arith.constant dense<0.000000e+00> : vector<8x16xf32>
    %63 = vector.multi_reduction <add>, %62, %cst_36 [2] : vector<8x16x32xf32> to vector<8x16xf32>
    %cst_37 = arith.constant dense<0xFF800000> : vector<8xf32>
    %64 = vector.multi_reduction <maximumf>, %63, %cst_37 [1] : vector<8x16xf32> to vector<8xf32>
    %65 = vector.shape_cast %64 : vector<8xf32> to vector<8x1xf32>
    %66 = vector.broadcast %65 : vector<8x1xf32> to vector<8x16xf32>
    %67 = arith.subf %63, %66 : vector<8x16xf32>
    %68 = math.exp %67 : vector<8x16xf32>
    %cst_38 = arith.constant dense<0.000000e+00> : vector<8xf32>
    %69 = vector.multi_reduction <add>, %68, %cst_38 [1] : vector<8x16xf32> to vector<8xf32>
    %70 = vector.shape_cast %69 : vector<8xf32> to vector<8x1xf32>
    %71 = tpu.reciprocal %70 {approx = true} : vector<8x1xf32> -> vector<8x1xf32>
    %72 = vector.broadcast %71 : vector<8x1xf32> to vector<8x16xf32>
    %73 = arith.mulf %68, %72 : vector<8x16xf32>
    %c0_39 = arith.constant 0 : index
    %c0_40 = arith.constant 0 : index
    %c0_41 = arith.constant 0 : index
    %74 = vector.load %arg2[%c0_39, %c0_40, %c0_41] : memref<8x16x32xbf16, #tpu.memory_space<vmem>>, vector<8x16x32xbf16>
    %75 = vector.shape_cast %73 : vector<8x16xf32> to vector<8x16x1xf32>
    %76 = arith.extf %74 : vector<8x16x32xbf16> to vector<8x16x32xf32>
    %77 = vector.broadcast %75 : vector<8x16x1xf32> to vector<8x16x32xf32>
    %78 = arith.mulf %76, %77 : vector<8x16x32xf32>
    %cst_42 = arith.constant dense<0.000000e+00> : vector<8x32xf32>
    %79 = vector.multi_reduction <add>, %78, %cst_42 [1] : vector<8x16x32xf32> to vector<8x32xf32>
    %80 = arith.truncf %79 : vector<8x32xf32> to vector<8x32xbf16>
    %c0_43 = arith.constant 0 : index
    %c0_44 = arith.constant 0 : index
    %81 = vector.load %arg10[%c0_43, %c0_44] : memref<32x128xbf16, #tpu.memory_space<vmem>>, vector<32x128xbf16>
    %cst_45 = arith.constant dense<0.000000e+00> : vector<8x128xf32>
    %82 = tpu.matmul %80, %81, %cst_45 {dimension_numbers = #tpu.dot_dimension_numbers<[1], [0], [0], [1], [0, 0, 1, 1], [], []>} : vector<8x32xbf16>, vector<32x128xbf16>, vector<8x128xf32> -> vector<8x128xf32>
    %83 = arith.truncf %47 : vector<8x32xf32> to vector<8x32xbf16>
    %c0_46 = arith.constant 0 : index
    %c0_47 = arith.constant 0 : index
    %84 = vector.load %arg11[%c0_46, %c0_47] : memref<32x128xbf16, #tpu.memory_space<vmem>>, vector<32x128xbf16>
    %cst_48 = arith.constant dense<0.000000e+00> : vector<8x128xf32>
    %85 = tpu.matmul %83, %84, %cst_48 {dimension_numbers = #tpu.dot_dimension_numbers<[1], [0], [0], [1], [0, 0, 1, 1], [], []>} : vector<8x32xbf16>, vector<32x128xbf16>, vector<8x128xf32> -> vector<8x128xf32>
    %86 = arith.addf %82, %85 : vector<8x128xf32>
    %c0_49 = arith.constant 0 : index
    %c0_50 = arith.constant 0 : index
    %87 = vector.load %arg12[%c0_49, %c0_50] : memref<32x128xbf16, #tpu.memory_space<vmem>>, vector<32x128xbf16>
    %cst_51 = arith.constant dense<0.000000e+00> : vector<8x128xf32>
    %88 = tpu.matmul %8, %87, %cst_51 {dimension_numbers = #tpu.dot_dimension_numbers<[1], [0], [0], [1], [0, 0, 1, 1], [], []>} : vector<8x32xbf16>, vector<32x128xbf16>, vector<8x128xf32> -> vector<8x128xf32>
    %89 = arith.addf %86, %88 : vector<8x128xf32>
    %c0_52 = arith.constant 0 : index
    %c0_53 = arith.constant 0 : index
    %90 = vector.load %arg13[%c0_52, %c0_53] : memref<1x128xf32, #tpu.memory_space<vmem>>, vector<1x128xf32>
    %91 = vector.broadcast %90 : vector<1x128xf32> to vector<8x128xf32>
    %92 = arith.addf %89, %91 : vector<8x128xf32>
    %93 = vector.extract_strided_slice %92 {offsets = [0, 0], sizes = [8, 32], strides = [1, 1]} : vector<8x128xf32> to vector<8x32xf32>
    %94 = arith.negf %93 : vector<8x32xf32>
    %95 = math.exp %94 : vector<8x32xf32>
    %cst_54 = arith.constant 1.000000e+00 : f32
    %96 = vector.broadcast %cst_54 : f32 to vector<8x32xf32>
    %97 = arith.addf %96, %95 : vector<8x32xf32>
    %98 = arith.divf %96, %97 : vector<8x32xf32>
    %99 = vector.extract_strided_slice %92 {offsets = [0, 32], sizes = [8, 32], strides = [1, 1]} : vector<8x128xf32> to vector<8x32xf32>
    %100 = arith.negf %99 : vector<8x32xf32>
    %101 = math.exp %100 : vector<8x32xf32>
    %cst_55 = arith.constant 1.000000e+00 : f32
    %102 = vector.broadcast %cst_55 : f32 to vector<8x32xf32>
    %103 = arith.addf %102, %101 : vector<8x32xf32>
    %104 = arith.divf %102, %103 : vector<8x32xf32>
    %105 = vector.extract_strided_slice %92 {offsets = [0, 64], sizes = [8, 32], strides = [1, 1]} : vector<8x128xf32> to vector<8x32xf32>
    %106 = math.tanh %105 : vector<8x32xf32>
    %107 = vector.extract_strided_slice %92 {offsets = [0, 96], sizes = [8, 32], strides = [1, 1]} : vector<8x128xf32> to vector<8x32xf32>
    %108 = arith.negf %107 : vector<8x32xf32>
    %109 = math.exp %108 : vector<8x32xf32>
    %cst_56 = arith.constant 1.000000e+00 : f32
    %110 = vector.broadcast %cst_56 : f32 to vector<8x32xf32>
    %111 = arith.addf %110, %109 : vector<8x32xf32>
    %112 = arith.divf %110, %111 : vector<8x32xf32>
    %113 = arith.mulf %104, %7 : vector<8x32xf32>
    %114 = arith.mulf %98, %106 : vector<8x32xf32>
    %115 = arith.addf %113, %114 : vector<8x32xf32>
    %116 = math.tanh %115 : vector<8x32xf32>
    %117 = arith.mulf %112, %116 : vector<8x32xf32>
    %c0_57 = arith.constant 0 : index
    %c0_58 = arith.constant 0 : index
    %c0_59 = arith.constant 0 : index
    %118 = vector.load %arg18[%c0_57, %c0_58, %c0_59] : memref<2x8x32xf32, #tpu.memory_space<vmem>>, vector<1x8x32xf32>
    %119 = vector.shape_cast %118 : vector<1x8x32xf32> to vector<8x32xf32>
    %120 = vector.shape_cast %47 : vector<8x32xf32> to vector<1x8x32xf32>
    tpu.vector_store %arg18[%c0_57, %c0_58, %c0_59], %120 {strides = array<i32>} : memref<2x8x32xf32, #tpu.memory_space<vmem>>, vector<1x8x32xf32>,
    %c1_60 = arith.constant 1 : index
    %c0_61 = arith.constant 0 : index
    %c0_62 = arith.constant 0 : index
    %121 = vector.load %arg18[%c1_60, %c0_61, %c0_62] : memref<2x8x32xf32, #tpu.memory_space<vmem>>, vector<1x8x32xf32>
    %122 = vector.shape_cast %121 : vector<1x8x32xf32> to vector<8x32xf32>
    %123 = vector.shape_cast %117 : vector<8x32xf32> to vector<1x8x32xf32>
    tpu.vector_store %arg18[%c1_60, %c0_61, %c0_62], %123 {strides = array<i32>} : memref<2x8x32xf32, #tpu.memory_space<vmem>>, vector<1x8x32xf32>,
    %c0_63 = arith.constant 0 : index
    %c0_64 = arith.constant 0 : index
    %c0_65 = arith.constant 0 : index
    %124 = vector.load %arg19[%c0_63, %c0_64, %c0_65] : memref<2x8x32xf32, #tpu.memory_space<vmem>>, vector<1x8x32xf32>
    %125 = vector.shape_cast %124 : vector<1x8x32xf32> to vector<8x32xf32>
    %126 = vector.shape_cast %45 : vector<8x32xf32> to vector<1x8x32xf32>
    tpu.vector_store %arg19[%c0_63, %c0_64, %c0_65], %126 {strides = array<i32>} : memref<2x8x32xf32, #tpu.memory_space<vmem>>, vector<1x8x32xf32>,
    %c1_66 = arith.constant 1 : index
    %c0_67 = arith.constant 0 : index
    %c0_68 = arith.constant 0 : index
    %127 = vector.load %arg19[%c1_66, %c0_67, %c0_68] : memref<2x8x32xf32, #tpu.memory_space<vmem>>, vector<1x8x32xf32>
    %128 = vector.shape_cast %127 : vector<1x8x32xf32> to vector<8x32xf32>
    %129 = vector.shape_cast %115 : vector<8x32xf32> to vector<1x8x32xf32>
    tpu.vector_store %arg19[%c1_66, %c0_67, %c0_68], %129 {strides = array<i32>} : memref<2x8x32xf32, #tpu.memory_space<vmem>>, vector<1x8x32xf32>,
    %cst_69 = arith.constant 0.000000e+00 : f32
    %130 = vector.broadcast %cst_69 : f32 to vector<8x32xf32>
    %131 = arith.maximumf %117, %130 : vector<8x32xf32>
    %c1_i32 = arith.constant 1 : i32
    %132 = tpu.dynamic_rotate %131 by %c1_i32 dim 0 : vector<8x32xf32>, i32 -> vector<8x32xf32>
    %c7_i32 = arith.constant 7 : i32
    %133 = tpu.dynamic_rotate %131 by %c7_i32 dim 0 : vector<8x32xf32>, i32 -> vector<8x32xf32>
    %134 = tpu.iota {dimensions = array<i32: 0>} : vector<8x1xi32>
    %c1_i32_70 = arith.constant 1 : i32
    %135 = vector.broadcast %c1_i32_70 : i32 to vector<8x1xi32>
    %136 = arith.andi %134, %135 : vector<8x1xi32>
    %c0_i32 = arith.constant 0 : i32
    %137 = vector.broadcast %c0_i32 : i32 to vector<8x1xi32>
    %138 = arith.cmpi eq, %136, %137 : vector<8x1xi32>
    %139 = vector.shape_cast %138 : vector<8x1xi1> to vector<8x1xi1>
    %140 = vector.broadcast %139 : vector<8x1xi1> to vector<8x32xi1>
    %141 = arith.select %140, %133, %132 : vector<8x32xi1>, vector<8x32xf32>
    %cst_71 = arith.constant 5.000000e-01 : f32
    %142 = vector.broadcast %cst_71 : f32 to vector<8x32xf32>
    %143 = arith.mulf %142, %141 : vector<8x32xf32>
    %144 = arith.addf %117, %143 : vector<8x32xf32>
    %c0_72 = arith.constant 0 : index
    %c0_73 = arith.constant 0 : index
    %145 = vector.load %arg17[%c0_72, %c0_73] : memref<8x32xf32, #tpu.memory_space<vmem>>, vector<8x32xf32>
    tpu.vector_store %arg17[%c0_72, %c0_73], %144 {strides = array<i32>} : memref<8x32xf32, #tpu.memory_space<vmem>>, vector<8x32xf32>,
    return
  }
  func.func @transform_0(%arg0: i32) -> (i32, i32) {
    %c0_i32 = arith.constant 0 : i32
    %c0_i32_0 = arith.constant 0 : i32
    return %arg0, %c0_i32 : i32, i32
  }
  func.func @transform_1(%arg0: i32) -> (i32, i32, i32) {
    %c0_i32 = arith.constant 0 : i32
    %c0_i32_0 = arith.constant 0 : i32
    %c0_i32_1 = arith.constant 0 : i32
    return %arg0, %c0_i32, %c0_i32_0 : i32, i32, i32
  }
  func.func @transform_2(%arg0: i32) -> (i32, i32, i32) {
    %c0_i32 = arith.constant 0 : i32
    %c0_i32_0 = arith.constant 0 : i32
    %c0_i32_1 = arith.constant 0 : i32
    return %arg0, %c0_i32, %c0_i32_0 : i32, i32, i32
  }
  func.func @transform_3(%arg0: i32) -> (i32, i32, i32) {
    %c0_i32 = arith.constant 0 : i32
    %c0_i32_0 = arith.constant 0 : i32
    %c0_i32_1 = arith.constant 0 : i32
    return %c0_i32, %arg0, %c0_i32_0 : i32, i32, i32
  }
  func.func @transform_4(%arg0: i32) -> (i32, i32, i32) {
    %c0_i32 = arith.constant 0 : i32
    %c0_i32_0 = arith.constant 0 : i32
    %c0_i32_1 = arith.constant 0 : i32
    return %c0_i32, %arg0, %c0_i32_0 : i32, i32, i32
  }
  func.func @transform_5(%arg0: i32) -> (i32, i32) {
    %c0_i32 = arith.constant 0 : i32
    %c0_i32_0 = arith.constant 0 : i32
    %c0_i32_1 = arith.constant 0 : i32
    return %c0_i32, %c0_i32_0 : i32, i32
  }
  func.func @transform_6(%arg0: i32) -> (i32, i32) {
    %c0_i32 = arith.constant 0 : i32
    %c0_i32_0 = arith.constant 0 : i32
    %c0_i32_1 = arith.constant 0 : i32
    return %c0_i32, %c0_i32_0 : i32, i32
  }
  func.func @transform_7(%arg0: i32) -> (i32, i32) {
    %c0_i32 = arith.constant 0 : i32
    %c0_i32_0 = arith.constant 0 : i32
    %c0_i32_1 = arith.constant 0 : i32
    return %c0_i32, %c0_i32_0 : i32, i32
  }
  func.func @transform_8(%arg0: i32) -> (i32, i32) {
    %c0_i32 = arith.constant 0 : i32
    %c0_i32_0 = arith.constant 0 : i32
    %c0_i32_1 = arith.constant 0 : i32
    return %c0_i32, %c0_i32_0 : i32, i32
  }
  func.func @transform_9(%arg0: i32) -> (i32, i32) {
    %c0_i32 = arith.constant 0 : i32
    %c0_i32_0 = arith.constant 0 : i32
    %c0_i32_1 = arith.constant 0 : i32
    return %c0_i32, %c0_i32_0 : i32, i32
  }
  func.func @transform_10(%arg0: i32) -> (i32, i32) {
    %c0_i32 = arith.constant 0 : i32
    %c0_i32_0 = arith.constant 0 : i32
    %c0_i32_1 = arith.constant 0 : i32
    return %c0_i32, %c0_i32_0 : i32, i32
  }
  func.func @transform_11(%arg0: i32) -> (i32, i32) {
    %c0_i32 = arith.constant 0 : i32
    %c0_i32_0 = arith.constant 0 : i32
    %c0_i32_1 = arith.constant 0 : i32
    return %c0_i32, %c0_i32_0 : i32, i32
  }
  func.func @transform_12(%arg0: i32) -> (i32, i32) {
    %c0_i32 = arith.constant 0 : i32
    %c0_i32_0 = arith.constant 0 : i32
    %c0_i32_1 = arith.constant 0 : i32
    return %c0_i32, %c0_i32_0 : i32, i32
  }
  func.func @transform_13(%arg0: i32) -> (i32, i32) {
    %c0_i32 = arith.constant 0 : i32
    %c0_i32_0 = arith.constant 0 : i32
    %c0_i32_1 = arith.constant 0 : i32
    return %c0_i32, %c0_i32_0 : i32, i32
  }
  func.func @transform_14(%arg0: i32) -> (i32, i32) {
    %c0_i32 = arith.constant 0 : i32
    %c0_i32_0 = arith.constant 0 : i32
    %c0_i32_1 = arith.constant 0 : i32
    return %c0_i32, %c0_i32_0 : i32, i32
  }
  func.func @transform_15(%arg0: i32) -> (i32, i32, i32) {
    %c0_i32 = arith.constant 0 : i32
    %c0_i32_0 = arith.constant 0 : i32
    %c0_i32_1 = arith.constant 0 : i32
    %c0_i32_2 = arith.constant 0 : i32
    return %c0_i32, %c0_i32_0, %c0_i32_1 : i32, i32, i32
  }
  func.func @transform_16(%arg0: i32) -> (i32, i32) {
    %c0_i32 = arith.constant 0 : i32
    %c0_i32_0 = arith.constant 0 : i32
    return %arg0, %c0_i32 : i32, i32
  }
  func.func @transform_17(%arg0: i32) -> (i32, i32, i32) {
    %c0_i32 = arith.constant 0 : i32
    %c0_i32_0 = arith.constant 0 : i32
    %c0_i32_1 = arith.constant 0 : i32
    return %c0_i32, %arg0, %c0_i32_0 : i32, i32, i32
  }
  func.func @transform_18(%arg0: i32) -> (i32, i32, i32) {
    %c0_i32 = arith.constant 0 : i32
    %c0_i32_0 = arith.constant 0 : i32
    %c0_i32_1 = arith.constant 0 : i32
    return %c0_i32, %arg0, %c0_i32_0 : i32, i32, i32
  }
}

</mosaic_0001>

<bundles_post_ra>
// kernel: tpu_custom_call.1
= control target key start
LH: loop header
LB: loop body
LE: loop exit
PB: predicated region body
PF: predicated region fallthrough
CT: control target
= control target key end

     0   :  { %s4133_s0 = inlined_call_operand.hbm [shape: f32[32,72], index: 0, kind: input, shape index: {}]   ;;  %s4134_s1 = inlined_call_operand.hbm [shape: bf16[32,16,32], index: 1, kind: input, shape index: {}]   ;;  %s4135_s2 = inlined_call_operand.hbm [shape: bf16[32,16,32], index: 2, kind: input, shape index: {}]   ;;  %s4136_s3 = inlined_call_operand.hbm [shape: f32[2,32,32], index: 3, kind: input, shape index: {}]   ;;  %s4137_s4 = inlined_call_operand.hbm [shape: f32[2,32,32], index: 4, kind: input, shape index: {}]   ;;  %s4138_s5 = inlined_call_operand.hbm [shape: bf16[32,128], index: 5, kind: input, shape index: {}]   ;;  %s4139_s6 = inlined_call_operand.hbm [shape: bf16[72,128], index: 6, kind: input, shape index: {}]   ;;  %s4140_s7 = inlined_call_operand.hbm [shape: bf16[32,128], index: 7, kind: input, shape index: {}]   ;;  %s4141_s8 = inlined_call_operand.vmem [shape: f32[1,128], index: 8, kind: input, shape index: {}]   ;;  %s4142_s9 = inlined_call_operand.hbm [shape: bf16[32,128], index: 9, kind: input, shape index: {}]   ;;  %s4143_s10 = inlined_call_operand.hbm [shape: bf16[32,128], index: 10, kind: input, shape index: {}]   ;;  %s4144_s11 = inlined_call_operand.hbm [shape: bf16[32,128], index: 11, kind: input, shape index: {}]   ;;  %s4145_s12 = inlined_call_operand.vmem [shape: f32[1,128], index: 12, kind: input, shape index: {}]   ;;  %s4146_s13 = inlined_call_operand.hbm [shape: bf16[32,32], index: 13, kind: input, shape index: {}]   ;;  %s4147_s14 = inlined_call_operand.vmem [shape: f32[1,32], index: 14, kind: input, shape index: {}]   ;;  %s4148_s15 = inlined_call_operand.vmem [shape: f32[1,1,32], index: 15, kind: input, shape index: {}]   ;;  %s4149_s16 = inlined_call_operand.hbm [shape: f32[32,32], index: 16, kind: output, shape index: {0}]   ;;  %s4150_s17 = inlined_call_operand.hbm [shape: f32[2,32,32], index: 17, kind: output, shape index: {1}]   ;;  %s4151_s18 = inlined_call_operand.hbm [shape: f32[2,32,32], index: 18, kind: output, shape index: {2}]  }
   0x1   :  { %4185 = sst [smem:[#allocation47_spill]] %s4133_s0 }
   0x2   :  { %4186 = sst [smem:[#allocation48_spill]] %s4134_s1 }
   0x3   :  { %4187 = sst [smem:[#allocation49_spill]] %s4135_s2 }
   0x4   :  { %4188 = sst [smem:[#allocation50_spill]] %s4136_s3 }
   0x5   :  { %4189 = sst [smem:[#allocation51_spill]] %s4137_s4 }
   0x6   :  { %4190 = sst [smem:[#allocation52_spill]] %s4138_s5 }
   0x7   :  { %4191 = sst [smem:[#allocation53_spill]] %s4140_s7 }
   0x8   :  { %4192 = sst [smem:[#allocation54_spill]] %s4141_s8 }
   0x9   :  { %4193 = sst [smem:[#allocation55_spill]] %s4143_s10 }
   0xa   :  { %4194 = sst [smem:[#allocation56_spill]] %s4145_s12 }
   0xb   :  { %4195 = sst [smem:[#allocation57_spill]] %s4147_s14 }
   0xc   :  { %4196 = sst [smem:[#allocation58_spill]] %s4148_s15 }
   0xd   :  { %4197 = sst [smem:[#allocation59_spill]] %s4149_s16 }
   0xe   :  { %4198 = sst [smem:[#allocation60_spill]] %s4150_s17 }
   0xf   :  { %4199 = sst [smem:[#allocation61_spill]] %s4151_s18 }
  0x10   :  { %24 = vsyncpa [#allocation3], 0 }
  0x11   :  { %26 = vsyncpa [#allocation3 + $0x1], 0 }
  0x12   :  { %27 = vsyncpa [#allocation6], 0 }
  0x13   :  { %29 = vsyncpa [#allocation6 + $0x1], 0 }
  0x14   :  { %30 = vsyncpa [#allocation9], 0 }
  0x15   :  { %32 = vsyncpa [#allocation9 + $0x1], 0 }
  0x16   :  { %33 = vsyncpa [#allocation12], 0 }
  0x17   :  { %34 = vsyncpa [#allocation15], 0 }
  0x18   :  { %35 = vsyncpa [#allocation18], 0 }
  0x19   :  { %36 = vsyncpa [#allocation21], 0 }
  0x1a   :  { %37 = vsyncpa [#allocation4], 0 }
  0x1b   :  { %39 = vsyncpa [#allocation4 + $0x1], 0 }
  0x1c   :  { %40 = vsyncpa [#allocation24], 0 }
  0x1d   :  { %42 = vsyncpa [#allocation24 + $0x1], 0  ;;  %s3385_s27 = smov 0   ;;  %s3387_s28 = smov 0  }
  0x1e   :  { %s3389_s29 = smov 0   ;;  %s3391_s30 = smov 0  }
  0x1f LB: > { %4200 = sst [smem:[#allocation35_spill]] %s3257_s27  ;;  %s3409_s20 = sadd.s32 4294967295, %s3269_s30   ;;  %s3269_s30 = sphi %s3391_s30, %s4261_s30   ;;  %s3265_s29 = sphi %s3389_s29, %s4264_s29   ;;  %s3261_s28 = sphi %s3387_s28, %s4263_s28   ;;  %s3257_s27 = sphi %s3385_s27, %s4262_s27  }
  0x20   : > { %4201 = sst [smem:[#allocation36_spill]] %s3261_s28  ;;  %p2289_p0 = scmp.ge.s32.totalorder %s3269_s30, 1 }
  0x21   : > { %4202 = sst [smem:[#allocation37_spill]] %s3265_s29  ;;  %p4170_p1 = scmp.eq.s32.totalorder %s3409_s20, 0 }
  0x22   : > { %4203 = sst [smem:[#allocation38_spill]] %s3269_s30  ;;  %p492_p2 = scmp.lt.s32.totalorder %s3269_s30, 5 }
  0x23   : > { %s4204_s5 = sld [smem:[#allocation52_spill]]  ;;  %s3271_s22 = smov [#allocation11]  }
  0x24   : > { %4205 = sst [smem:[#allocation39_spill]] %s3409_s20  ;;  %p3414_p3 = pnand %p2289_p0, %p492_p2 }
  0x25   : > { %s505_s2 = sshll.u32 %s3271_s22, 4  ;;  %s4208_s7 = sld [smem:[#allocation53_spill]]  ;;  %s506_s2 = int_to_ptr.vmem [resolvable:$true] %s505_s2 }
  0x26   : > { %s4206_s21 = scalar_select %p3414_p3, 1, 0 }
  0x27   : > { %p2555_p4 = pneg %p3414_p3  ;;  %s4210_s10 = sld [smem:[#allocation55_spill]] }
  0x28   : > { %4207 = sst [smem:[#allocation40_spill]] %s4206_s21  ;;  %s4155_s24 = smov 64  }
  0x29   : > { %s503_s1 = sshll.u32 %s4204_s5, 4  ;;  %p3425_p5 = pnand %p2555_p4, %p4170_p1  ;;  %s504_s1 = int_to_ptr.hbm [resolvable:$true] %s503_s1 }
  0x2a   : > { %s3272_s5 = smov [#allocation14]   ;;  %s55_s19 = sadd.s32 1, %s3265_s29 }
  0x2b   : > { %s531_s25 = sshll.u32 %s4208_s7, 4  ;;  %s533_s23 = sshll.u32 %s3272_s5, 4  ;;  %s532_s25 = int_to_ptr.hbm [resolvable:$true] %s531_s25  ;;  %s534_s23 = int_to_ptr.vmem [resolvable:$true] %s533_s23 }
  0x2c   : > { %s4157_s7 = smov 4   ;;  %s3275_s5 = smov [#allocation17]  }
  0x2d   : > { %s562_s22 = sshll.u32 %s4210_s10, 4  ;;  %s564_s0 = sshll.u32 %s3275_s5, 4  ;;  %s563_s22 = int_to_ptr.hbm [resolvable:$true] %s562_s22  ;;  %s565_s0 = int_to_ptr.vmem [resolvable:$true] %s564_s0 }
  0x2e   : > { %2558 = dma.hbm_to_vmem [thread:$0]  (!%p3425_p5), %s504_s1, 256, %s506_s2, [#allocation12], %s4155_s24, %s4155_s24, %s4157_s7  }
  0x2f   : > { %2564 = dma.hbm_to_vmem [thread:$0]  (!%p3425_p5), %s532_s25, 256, %s534_s23, [#allocation15], %s4155_s24, %s4155_s24, %s4157_s7  }
  0x30   : > { %2570 = dma.hbm_to_vmem [thread:$0]  (!%p3425_p5), %s563_s22, 256, %s565_s0, [#allocation18], %s4155_s24, %s4155_s24, %s4157_s7  }
  0x31   : > { %s4163_s1 = sadd.s32 4294967294, %s3269_s30   ;;  %s3449_s2 = sadd.s32 1, %s3269_s30  }
  0x32   : > { %4211 = sst [smem:[#allocation41_spill]] %s3449_s2  ;;  %s52_s10 = ssub.s32 %s3269_s30, %s3449_s2 }
  0x33   : > { %p62_p6 = scmp.ne.s32.totalorder %s3265_s29, %s3261_s28  ;;  %p53_p7 = scmp.eq.s32.totalorder %s52_s10, 0 }
  0x34   : > { %p63_p8 = scmp.eq.s32.totalorder %s3269_s30, 0  ;;  %p68_p9 = scmp.ne.s32.totalorder %s3261_s28, %s3257_s27 }
  0x35   : > { %p427_p10 = scmp.eq.s32.totalorder %s3409_s20, 3  ;;  %p433_p0 = scmp.eq.s32.totalorder %s4163_s1, 3 }
  0x36   : > { %s3461_s25 = scalar_select %p53_p7, %s3265_s29, %s55_s19  }
  0x37   : > { %p64_p11 = por %p63_p8, %p62_p6  ;;  %p3465_p12 = por %p4170_p1, %p68_p9 }
  0x38   : > { %4212 = sst [smem:[#allocation42_spill]] %s3461_s25  ;;  %p3469_p13 = por %p427_p10, %p62_p6 }
  0x39   : > { %s4213_s22 = scalar_select %p3465_p12, 1, 0 }
  0x3a   : > { %s4215_s23 = scalar_select %p3469_p13, 1, 0 }
  0x3b   : > { %4214 = sst [smem:[#allocation43_spill]] %s4213_s22  ;;  %p2610_p2 = scmp.lt.s32.totalorder %s3269_s30, 4 }
  0x3c   : > { %4216 = sst [smem:[#allocation44_spill]] %s4215_s23  ;;  %s3477_s10 = sand.u32 1, %s3265_s29  }
  0x3d   : > { %p3479_p4 = por %p433_p0, %p68_p9  ;;  %s4171_s0 = sand.u32 1, %s3269_s30  }
  0x3e   : > { %p3484_p7 = pnand %p2610_p2, %p64_p11  ;;  %s2300_s24 = sshll.u32 %s3477_s10, 6 }
  0x3f   : > { %s4217_s5 = scalar_select %p3479_p4, 1, 0 }
  0x40   : > { %s2414_s7 = sshll.u32 %s3269_s30, 6  ;;  %s4220_s27 = sld [smem:[#allocation48_spill]] }
  0x41   : > { %4218 = sst [smem:[#allocation45_spill]] %s4217_s5  ;;  %s638_s18 = scalar_lea.vmem [#allocation5], %s2300_s24 }
  0x42   : > { %s647_s29 = sshll.u32 %s638_s18, 4  ;;  %s3495_s23 = scalar_lea.sflag [#allocation6], %s4171_s0  ;;  %s648_s29 = int_to_ptr.vmem [resolvable:$true] %s647_s29 }
  0x43   : > { %p3499_p8 = pneg %p3484_p7 }
  0x46   : > { %s4221_s16 = smov %s4220_s27  ;;  %s644_s1 = scalar_lea.hbm %s4220_s27, %s2414_s7 }
  0x47   : > { %s645_s17 = sshll.u32 %s644_s1, 4  ;;  %s2856_s1 = scalar_lea.hbm %s4221_s16, 256  ;;  %s646_s17 = int_to_ptr.hbm [resolvable:$true] %s645_s17 }
  0x48   : > { %s2849_s5 = sshra.s32 %s646_s17, 4  ;;  %s2850_s5 = int_to_ptr.hbm [resolvable:$true] %s2849_s5 }
  0x49   : > { %s2851_s12 = scalar_lea.hbm %s2850_s5, 64  ;;  %p2857_p11 = scmp.lt.s32.totalorder %s2850_s5, %s4221_s16 }
  0x4a   : > { %p2852_p6 = scmp.ne.s32.totalorder %s2850_s5, %s2851_s12  ;;  %p2858_p0 = scmp.lt.s32.totalorder %s2856_s1, %s2851_s12 }
  0x4c   : > { %p2854_p9 = pnand %p3499_p8, %p2852_p6  ;;  %p2859_p2 = por %p2858_p0, %p2857_p11 }
  0x4e   : > { %p2855_p10 = pneg %p2854_p9 }
  0x50   : > { %p2860_p1 = pnand %p2859_p2, %p2855_p10 }
  0x52   : > { %2863 = shalt.err (!%p2860_p1)
}
  0x53   : > { %s4223_s0 = smov 4   ;;  %s4224_s14 = smov 64  }
  0x54   : > { %2583 = dma.hbm_to_vmem [thread:$0]  (!%p3484_p7), %s646_s17, 1024, %s648_s29, %s3495_s23, %s4224_s14, %s4224_s14, %s4223_s0  }
  0x55   : > { %s4225_s8 = sld [smem:[#allocation49_spill]]  ;;  %s661_s12 = scalar_lea.vmem [#allocation7], %s2300_s24 }
  0x56   : > { %s670_s5 = sshll.u32 %s661_s12, 4  ;;  %s3526_s2 = sshll.u32 %s3269_s30, 3  ;;  %s3523_s5 = int_to_ptr.vmem [resolvable:$true] %s670_s5 }
  0x57   : > { %4226 = sst [smem:[#allocation46_spill]] %s3523_s5  ;;  %s2308_s25 = sshll.u32 %s3477_s10, 4 }
  0x58   : > { %s4227_s3 = sld [smem:[#allocation50_spill]]  ;;  %s684_s28 = scalar_lea.vmem [#allocation8], %s2308_s25 }
  0x59   : > { %s691_s18 = sshll.u32 %s684_s28, 4  ;;  %s692_s18 = int_to_ptr.vmem [resolvable:$true] %s691_s18 }
  0x5b   : > { %s3520_s20 = scalar_lea.hbm %s4225_s8, %s2414_s7  ;;  %s4228_s7 = sand.u32 1, %s3269_s30  }
  0x5c   : > { %s3535_s24 = scalar_lea.sflag [#allocation9], %s4228_s7 }
  0x5e   : > { %s688_s17 = scalar_lea.hbm %s4227_s3, %s3526_s2  ;;  %s2886_s16 = scalar_lea.hbm %s4227_s3, 64 }
  0x5f   : > { %s689_s29 = sshll.u32 %s688_s17, 4  ;;  %s690_s29 = int_to_ptr.hbm [resolvable:$true] %s689_s29 }
  0x60   : > { %s2879_s27 = sshra.s32 %s690_s29, 4  ;;  %s2880_s27 = int_to_ptr.hbm [resolvable:$true] %s2879_s27 }
  0x61   : > { %s2881_s12 = scalar_lea.hbm %s2880_s27, 16  ;;  %p2887_p10 = scmp.lt.s32.totalorder %s2880_s27, %s4227_s3 }
  0x62   : > { %p2882_p1 = scmp.ne.s32.totalorder %s2880_s27, %s2881_s12  ;;  %p2888_p11 = scmp.lt.s32.totalorder %s2886_s16, %s2881_s12 }
  0x64   : > { %p2884_p6 = pnand %p2882_p1, %p3499_p8  ;;  %p2889_p0 = por %p2888_p11, %p2887_p10 }
  0x66   : > { %p2885_p9 = pneg %p2884_p6 }
  0x68   : > { %p2890_p2 = pnand %p2889_p0, %p2885_p9 }
  0x6a   : > { %2893 = shalt.err (!%p2890_p2)
}
  0x6b   : > { %s4182_s28 = smov 512   ;;  %s4183_s7 = smov 128  }
  0x6c   : > { %s4184_s30 = smov 8   ;;  %s4229_s21 = sshll.u32 %s3520_s20, 4  ;;  %s3553_s21 = int_to_ptr.hbm [resolvable:$true] %s4229_s21 }
  0x6d   : > { %2589 = dma.hbm_to_vmem [thread:$0]  (!%p3484_p7), %s690_s29, 256, %s692_s18, %s3535_s24, %s4182_s28, %s4183_s7, %s4184_s30  }
  0x6e   : > { %s517_s12 = sshll.u32 %s4139_s6, 4  ;;  %s3558_s16 = scalar_lea.vmem [#allocation10], %s2308_s25  ;;  %s518_s12 = int_to_ptr.hbm [resolvable:$true] %s517_s12 }
  0x6f   : > { %s712_s22 = sshll.u32 %s3558_s16, 4  ;;  %s548_s4 = sshll.u32 %s4142_s9, 4  ;;  %s549_s4 = int_to_ptr.hbm [resolvable:$true] %s548_s4  ;;  %s713_s22 = int_to_ptr.vmem [resolvable:$true] %s712_s22 }
  0x70   : > { %s3279_s5 = smov [#allocation13]   ;;  %s3280_s20 = smov [#allocation16]  }
  0x71   : > { %s519_s29 = sshll.u32 %s3279_s5, 4  ;;  %s550_s25 = sshll.u32 %s3280_s20, 4  ;;  %s520_s29 = int_to_ptr.vmem [resolvable:$true] %s519_s29  ;;  %s551_s25 = int_to_ptr.vmem [resolvable:$true] %s550_s25 }
  0x72   : > { %2561 = dma.hbm_to_vmem [thread:$0]  (!%p3425_p5), %s518_s12, 576, %s520_s29, [#allocation12], %s4224_s14, %s4224_s14, %s4223_s0  }
  0x73   : > { %s576_s3 = sshll.u32 %s4144_s11, 4  ;;  %s593_s12 = sshll.u32 %s4146_s13, 4  ;;  %s577_s3 = int_to_ptr.hbm [resolvable:$true] %s576_s3  ;;  %s594_s12 = int_to_ptr.hbm [resolvable:$true] %s593_s12 }
  0x74   : > { %2567 = dma.hbm_to_vmem [thread:$0]  (!%p3425_p5), %s549_s4, 256, %s551_s25, [#allocation15], %s4224_s14, %s4224_s14, %s4223_s0  }
  0x75   : > { %s3281_s17 = smov [#allocation19]   ;;  %s3282_s20 = smov [#allocation20]  }
  0x76   : > { %s578_s29 = sshll.u32 %s3281_s17, 4  ;;  %s595_s18 = sshll.u32 %s3282_s20, 4  ;;  %s579_s29 = int_to_ptr.vmem [resolvable:$true] %s578_s29  ;;  %s596_s18 = int_to_ptr.vmem [resolvable:$true] %s595_s18 }
  0x77   : > { %2573 = dma.hbm_to_vmem [thread:$0]  (!%p3425_p5), %s577_s3, 256, %s579_s29, [#allocation18], %s4224_s14, %s4224_s14, %s4223_s0  }
  0x78   : > { %s2298_s1 = sshll.u32 %s3477_s10, 3  ;;  %s4230_s5 = sld [smem:[#allocation47_spill]] }
  0x79   : > { %2576 = dma.hbm_to_vmem [thread:$0]  (!%p3425_p5), %s594_s12, 256, %s596_s18, [#allocation21], %s4224_s14, %s4224_s14, %s4223_s0  }
  0x7a   : > { %s619_s28 = scalar_lea.vmem [#allocation2], %s2298_s1  ;;  %s616_s3 = scalar_lea.sflag [#allocation3], %s3477_s10 }
  0x7b   : > { %s627_s7 = sshll.u32 %s619_s28, 4  ;;  %s628_s7 = int_to_ptr.vmem [resolvable:$true] %s627_s7 }
  0x7e   : > { %s623_s27 = scalar_lea.hbm %s4230_s5, %s3526_s2  ;;  %s3036_s12 = scalar_lea.hbm %s4230_s5, 32 }
  0x7f   : > { %s625_s17 = sshll.u32 %s623_s27, 4  ;;  %s626_s17 = int_to_ptr.hbm [resolvable:$true] %s625_s17 }
  0x80   : > { %s3029_s29 = sshra.s32 %s626_s17, 4  ;;  %s3030_s29 = int_to_ptr.hbm [resolvable:$true] %s3029_s29 }
  0x81   : > { %s3031_s20 = scalar_lea.hbm %s3030_s29, 8  ;;  %p3037_p5 = scmp.lt.s32.totalorder %s3030_s29, %s4230_s5 }
  0x82   : > { %p3032_p1 = scmp.ne.s32.totalorder %s3030_s29, %s3031_s20  ;;  %p3038_p10 = scmp.lt.s32.totalorder %s3036_s12, %s3031_s20 }
  0x84   : > { %p3034_p6 = pnand %p3032_p1, %p3499_p8  ;;  %p3039_p11 = por %p3038_p10, %p3037_p5 }
  0x86   : > { %p3035_p9 = pneg %p3034_p6 }
  0x88   : > { %p3040_p0 = pnand %p3039_p11, %p3035_p9 }
  0x8a   : > { %3043 = shalt.err (!%p3040_p0)
}
  0x8b   : > { %2580 = dma.hbm_to_vmem [thread:$0]  (!%p3484_p7), %s626_s17, 128, %s628_s7, %s616_s3  }
  0x8c   : > { %s3059_s10 = sshra.s32 %s3553_s21, 4  ;;  %s3066_s25 = scalar_lea.hbm %s4225_s8, 256  ;;  %s3060_s10 = int_to_ptr.hbm [resolvable:$true] %s3059_s10 }
  0x8d   : > { %s3061_s28 = scalar_lea.hbm %s3060_s10, 64  ;;  %p3067_p9 = scmp.lt.s32.totalorder %s3060_s10, %s4225_s8 }
  0x8e   : > { %p3062_p2 = scmp.ne.s32.totalorder %s3060_s10, %s3061_s28  ;;  %p3068_p5 = scmp.lt.s32.totalorder %s3066_s25, %s3061_s28 }
  0x90   : > { %p3064_p1 = pnand %p3062_p2, %p3499_p8  ;;  %p3069_p10 = por %p3068_p5, %p3067_p9 }
  0x92   : > { %p3065_p6 = pneg %p3064_p1 }
  0x94   : > { %p3070_p11 = pnand %p3069_p10, %p3065_p6 }
  0x96   : > { %3073 = shalt.err (!%p3070_p11)
}
  0x97   : > { %s4231_s7 = sld [smem:[#allocation46_spill]] }
  0x98   : > { %s4232_s20 = sld [smem:[#allocation51_spill]] }
  0x9d   : > { %2586 = dma.hbm_to_vmem [thread:$0]  (!%p3484_p7), %s3553_s21, 1024, %s4231_s7, %s3495_s23, %s4224_s14, %s4224_s14, %s4223_s0  }
  0x9e   : > { %s709_s26 = scalar_lea.hbm %s4232_s20, %s3526_s2  ;;  %s3096_s30 = scalar_lea.hbm %s4232_s20, 64 }
  0x9f   : > { %s710_s12 = sshll.u32 %s709_s26, 4  ;;  %s711_s12 = int_to_ptr.hbm [resolvable:$true] %s710_s12 }
  0xa0   : > { %s3089_s18 = sshra.s32 %s711_s12, 4  ;;  %s3090_s18 = int_to_ptr.hbm [resolvable:$true] %s3089_s18 }
  0xa1   : > { %s3091_s4 = scalar_lea.hbm %s3090_s18, 16  ;;  %p3097_p6 = scmp.lt.s32.totalorder %s3090_s18, %s4232_s20 }
  0xa2   : > { %p3092_p0 = scmp.ne.s32.totalorder %s3090_s18, %s3091_s4  ;;  %p3098_p9 = scmp.lt.s32.totalorder %s3096_s30, %s3091_s4 }
  0xa4   : > { %p3094_p2 = pnand %p3092_p0, %p3499_p8  ;;  %p3099_p5 = por %p3098_p9, %p3097_p6 }
  0xa6   : > { %p3095_p1 = pneg %p3094_p2 }
  0xa8   : > { %p3100_p10 = pnand %p3099_p5, %p3095_p1 }
  0xaa   : > { %3103 = shalt.err (!%p3100_p10)
}
  0xab   : > { %s4233_s0 = smov 8   ;;  %s4234_s2 = smov 128  }
  0xac   : > { %s4235_s21 = smov 512   ;;  %724 = sbr.rel (%p3414_p3) target bundleno = 2559 (0x9ff), region = 84 }
  0xad   : > { %2592 = dma.hbm_to_vmem [thread:$0]  (!%p3484_p7), %s711_s12, 256, %s713_s22, %s3535_s24, %s4235_s21, %s4234_s2, %s4233_s0  }
  0xae   : > { %s4237_s16 = sld [smem:[#allocation36_spill]] (!%p3414_p3) }
  0xb4   : > { %s3646_s25 = sand.u32 1, %s4237_s16  }
  0xb5   : > { %s2313_s27 = sshll.u32 %s3646_s25, 3  ;;  %s727_s29 = scalar_lea.sflag [#allocation3], %s3646_s25 }
  0xb6   : > { %s3652_s7 = scalar_lea.vmem [#allocation2], %s2313_s27 }
  0xb7   : > { %3220 = dma.done.wait (%p3465_p12), %s727_s29, 128  }
  0xb8   : > { %3222 = vsyncadd (%p3465_p12), %s727_s29, 4294967168  ;;  %s4239_s19 = sld [smem:[#allocation39_spill]]  ;;  %s2314_s22 = sshll.u32 %s3646_s25, 6 }
  0xb9   : > { %s3663_s3 = scalar_lea.vmem [#allocation5], %s2314_s22 }
  0xbe   : > { %s3659_s24 = sand.u32 1, %s4239_s19  }
  0xbf   : > { %s737_s17 = scalar_lea.sflag [#allocation6], %s3659_s24 }
  0xc0   : > { %3224 = dma.done.wait (%p3465_p12), %s737_s17, 2048  }
  0xc1   : > { %3226 = vsyncadd (%p3465_p12), %s737_s17, 4294965248  ;;  %s3670_s26 = sshll.u32 %s3646_s25, 4  ;;  %s3672_s12 = scalar_lea.vmem [#allocation7], %s2314_s22 }
  0xc2   : > { %s757_s18 = scalar_lea.sflag [#allocation9], %s3659_s24  ;;  %s760_s4 = scalar_lea.vmem [#allocation8], %s3670_s26 }
  0xc3   : > { %3228 = dma.done.wait (%p3465_p12), %s757_s18, 512  }
  0xc4   : > { %3230 = vsyncadd (%p3465_p12), %s757_s18, 4294966784  ;;  %s770_s10 = scalar_lea.vmem [#allocation10], %s3670_s26  ;;  %p4240_p3 = scmp.eq.s32.totalorder %s4239_s19, 0 }
  0xc6   : > { %3232 = dma.done.wait (%p4240_p3), [#allocation12], 832   ;;  %p4241_p7 = pmov %p4240_p3 }
  0xc7   : > { %p4242_p8 = pmov %p4240_p3 }
  0xc8   : > { %3234 = vsyncadd (%p4241_p7), [#allocation12], 4294966464 }
  0xc9   : > { %3236 = dma.done.wait (%p4242_p8), [#allocation15], 512   ;;  %p4243_p11 = pmov %p4240_p3 }
  0xca   : > { %p4244_p0 = pmov %p4240_p3 }
  0xcb   : > { %3238 = vsyncadd (%p4243_p11), [#allocation15], 4294966784 }
  0xcc   : > { %3240 = dma.done.wait (%p4244_p0), [#allocation18], 512   ;;  %p4245_p2 = pmov %p4244_p0 }
  0xcd   : > { %p4246_p12 = pmov %p4244_p0 }
  0xce   : > { %3242 = vsyncadd (%p4245_p2), [#allocation18], 4294966784 }
  0xcf   : > { %3244 = dma.done.wait (%p4246_p12), [#allocation21], 256   ;;  %p4247_p1 = pmov %p4244_p0 }
  0xd0   : > { %v913_v0 = vld [vmem:[#allocation13 + $0x20] sm:$0xf]  ;;  %v2424_v1 = vld [vmem:[#allocation14 + $0x8] sm:$0xff]  ;;  %v2418_v3 = vld [vmem:[#allocation11 + $0x8] sm:$0xff]  ;;  %vm945_vm0 = vcmask 1043456   ;;  %vm974_vm1 = vcmask 261120  }
  0xd1   : > { %3246 = vsyncadd (%p4247_p1), [#allocation21], 4294967040  ;;  %v931_v2 = vunpack.c.l.b16 %v913_v0  ;;  %1017 = vmatpush.bf16.msra.mxu2 %v2424_v1  ;;  %v2423_v4 = vld [vmem:[#allocation14] sm:$0xff]  ;;  %984 = vmatpush.bf16.msra.mxu1 %v2418_v3  ;;  %v2417_v7 = vld [vmem:[#allocation11] sm:$0xff]  ;;  %vm941_vm2 = vcmask 588800   ;;  %s4248_s14 = sld [smem:[#allocation54_spill]] }
  0xd2   : > { %v892_v5 = vld [vmem:[%s760_s4] sm:$0xff]  ;;  %v2328_v8 = vld [vmem:[%s760_s4 + $0x8] sm:$0xff]  ;;  %s3283_s23 = smov 64   ;;  %s3284_s0 = smov 32   ;;  %vm1288_vm7 = vcmask 130112   ;;  %vm1311_vm8 = vcmask 1041409  }
  0xd3   : > { %v936_v6 = vpack.c.b16 %v931_v2, %v931_v2  ;;  %v991_v10 = vpack.c.bf16 %v892_v5, %v892_v5  ;;  %v2422_v11 = vld [vmem:[#allocation13 + $0x18] sm:$0xff]  ;;  %v3697_v12 = vpack.c.bf16 %v2328_v8, %v2328_v8  ;;  %v2421_v13 = vld [vmem:[#allocation13 + $0x10] sm:$0xff]  ;;  %v2420_v14 = vld [vmem:[#allocation13 + $0x8] sm:$0xff]  ;;  %s4249_s15 = sld [smem:[#allocation57_spill]]  ;;  %vm1313_vm9 = vcmask 1042434   ;;  %s4045_s18 = scalar_lea.vmem [#allocation25], %s3670_s26 }
  0xd4   : > { %v2419_v15 = vld [vmem:[#allocation13] sm:$0xff]  ;;  %v2426_v50 = vld [vmem:[#allocation20 + $0x8] sm:$0xff]  ;;  %v2497_v61 = vld [vmem:[%s3672_s12 + $0x8] sm:$0xff]   ;;  %s4250_s29 = sld [smem:[#allocation58_spill]]  ;;  %vm1315_vm10 = vcmask 1043459   ;;  %vm1317_vm11 = vcmask 1044484  }
  0xd5   : > { %v947_v9 = vsel %vm945_vm0, %v936_v6, 0  ;;  %1018 = vmatpush.bf16.msra.mxu2 %v2423_v4  ;;  %985 = vmatpush.bf16.msra.mxu1 %v2417_v7  ;;  %v899_v16 = vld [vmem:[%s3652_s7] sm:$0xff]  ;;  %v893_v29 = vld [vmem:[%s770_s10] sm:$0xff]  ;;  %v2439_v5 = vunpack.c.l.bf16 %v2497_v61  ;;  %vm1319_vm12 = vcmask 1045509   ;;  %vm1321_vm13 = vcmask 1046534   ;;  %s4251_s17 = sld [smem:[#allocation56_spill]] }
  0xd6   : > { %952 = vmatpush.bf16.msra.mxu0 %v947_v9  ;;  %v900_v17 = vpack.c.bf16 %v899_v16, %v899_v16  ;;  %v2430_v51 = vld [vmem:[#allocation17 + $0x8] sm:$0xff]  ;;  %1104 = vmatpush.bf16.msra.mxu3 %v2426_v50  ;;  %v2425_v52 = vld [vmem:[#allocation20] sm:$0xff]  ;;  %vm1323_vm14 = vcmask 1047559   ;;  %vm1326_vm15 = vcmask 130048   ;;  %s1950_s21 = scalar_lea.sflag [#allocation24], %s3659_s24 }
  0xd7   : > { %v2673_v24 = vld [vmem:[%s4248_s14] ss:$0 sm:$0xff]  ;;  %v2429_v53 = vld [vmem:[#allocation17] sm:$0xff]  ;;  %v2434_v60 = vld [vmem:[%s3672_s12] sm:$0xff]   ;;  %s4253_s14 = sld [smem:[#allocation60_spill]] }
  0xd8   : > { %2364 = vmatmul.msk.bf16.vlgmr.msra.gmra.mxu2 %vm974_vm1, %v991_v10  ;;  %2355 = vmatmul.msk.bf16.vlgmr.msra.gmra.mxu1 %vm974_vm1, %v3697_v12  ;;  %v2498_v62 = vld [vmem:[%s3672_s12 + $0x10] sm:$0xff]   ;;  %v2436_v1 = vunpack.c.h.bf16 %v2434_v60  ;;  %v2435_v2 = vunpack.c.l.bf16 %v2434_v60  ;;  %v3733_v3 = vld [vmem:[%s3672_s12 + $0x18] sm:$0xff]  }
  0xd9   : > { %1762 = vmatpush.bf16.msrb.mxu1 %v2430_v51  ;;  %v2674_v59 = vld [vmem:[%s4249_s15] ss:$0 sm:$0xff]  ;;  %v2444_v6 = vunpack.c.h.bf16 %v2498_v62 }
  0xda   : > { %953 = vmatpush.bf16.msra.mxu0 %v2422_v11  ;;  %1105 = vmatpush.bf16.msra.mxu3 %v2425_v52  ;;  %v2440_v11 = vunpack.c.h.bf16 %v2497_v61 }
  0xdd   : > { %1763 = vmatpush.bf16.msrb.mxu1 %v2429_v53 }
  0xde   : > { %954 = vmatpush.bf16.msra.mxu0 %v2421_v13  ;;  %v2447_v13 = vunpack.c.l.bf16 %v3733_v3 }
  0xe2   : > { %955 = vmatpush.bf16.msra.mxu0 %v2420_v14 }
  0xe6   : > { %956 = vmatpush.bf16.msra.mxu0 %v2419_v15 }
  0xe9   : > { %2346 = vmatmul.msk.bf16.vlgmr.msra.gmra.mxu0 %vm941_vm2, %v900_v17 }
 0x155   : > { %v987_v18 = vpop.f32.mrf.mxu1 }
 0x15b   : > { %v1020_v19 = vpop.f32.mrf.mxu2 }
 0x15d   : > { %v989_v20 = vpop.f32.mrf.mxu1 }
 0x163   : > { %v1022_v21 = vpop.f32.mrf.mxu2 }
 0x166   : > { %v958_v22 = vpop.f32.mrf.mxu0 }
 0x167   : > { %v988_v23 = vadd.f32 %v987_v18, %v958_v22 }
 0x169   : > { %v1024_v25 = vadd.f32 %v1020_v19, %v988_v23 }
 0x16b   : > { %v1029_v26 = vadd.f32 %v2673_v24, %v1024_v25  ;;  %v2500_v24 = vld [vmem:[%s3672_s12 + $0x20] sm:$0xff]  }
 0x16d   : > { %2677 = vtanh.f32 %v1029_v26  ;;  %v2365_v30 = vmul.f32 -1.442695, %v1029_v26  ;;  %v3745_v26 = vld [vmem:[%s4250_s29] ss:$0 sm:$0xff] }
 0x16e   : > { %v960_v27 = vpop.f32.mrf.mxu0 }
 0x16f   : > { %2679 = vpow2.f32 %v2365_v30  ;;  %v2451_v27 = vunpack.c.l.bf16 %v2500_v24 }
 0x173   : > { %v2678_v28 = vpop.eup %2677 }
 0x174   : > { %1056 = vrot.lane.b32.xlu0 %v2678_v28, %s3283_s23 }
 0x175   : > { %v2680_v31 = vpop.eup %2679 }
 0x176   : > { %v1033_v32 = vadd.f32 1.0, %v2680_v31  ;;  %v2452_v31 = vunpack.c.h.bf16 %v2500_v24 }
 0x178   : > { %2681 = vrcp.f32 %v1033_v32  ;;  %v1045_v38 = vand.u32 2147483648, %v1033_v32  ;;  %vm1039_vm4 = vweird.f32 %v1033_v32  ;;  %v1043_v39 = vand.u32 2147483647, %v1033_v32 }
 0x17a   : > { %v1046_v41 = vor.u32 1.1754944e-38, %v1045_v38  ;;  %vm1044_vm6 = vcmp.eq.f32.partialorder %v1043_v39, 8.507059e+37 }
 0x17c   : > { %1051 = vrot.lane.b32.xlu0 %v893_v29, %s3284_s0  ;;  %v2443_v29 = vunpack.c.l.bf16 %v2498_v62 }
 0x17e   : > { %v2682_v33 = vpop.eup %2681 }
 0x17f   : > { %v1035_v34 = vmul.f32 %v2682_v33, %v1033_v32  ;;  %vm1040_vm3 = vweird.f32 %v2682_v33 }
 0x180   : > { %vm1041_vm5 = vmor %vm1039_vm4, %vm1040_vm3 }
 0x181   : > { %v1036_v35 = vsub.f32 1.0, %v1035_v34 }
 0x183   : > { %v1037_v36 = vmul.f32 %v2682_v33, %v1036_v35 }
 0x185   : > { %v1038_v37 = vadd.f32 %v2682_v33, %v1037_v36 }
 0x187   : > { %v1042_v40 = vsel %vm1041_vm5, %v2682_v33, %v1038_v37 }
 0x188   : > { %v1047_v43 = vsel %vm1044_vm6, %v1046_v41, %v1042_v40  ;;  %v2501_v41 = vld [vmem:[%s3672_s12 + $0x28] sm:$0xff]  }
 0x189   : > { %v2456_v51 = vunpack.c.h.bf16 %v2501_v41 }
 0x1e6   : > { %v1057_v42 = vpop.permute.xlu0 %1056 }
 0x1e7   : > { %v1059_v44 = vmul.f32 %v1057_v42, %v1047_v43 }
 0x1e9   : > { %1061 = vrot.lane.b32.xlu1 %v1059_v44, %s3284_s0 }
 0x1ee   : > { %v1052_v45 = vpop.permute.xlu0 %1051 }
 0x1ef   : > { %v1054_v46 = vmul.f32 %v1052_v45, %v1047_v43 }
 0x25b   : > { %v1062_v47 = vpop.permute.xlu1 %1061 }
 0x25c   : > { %v3711_v48 = vadd.f32 %v1062_v47, %v1054_v46 }
 0x25e   : > { %2683 = vtanh.f32 %v3711_v48 }
 0x264   : > { %v2684_v49 = vpop.eup %2683 }
 0x265   : > { %1067 = vrot.lane.b32.xlu1 %v2684_v49, %s3283_s23  ;;  %v2502_v49 = vld [vmem:[%s3672_s12 + $0x30] sm:$0xff]  }
 0x2d7   : > { %v1068_v54 = vpop.permute.xlu1 %1067 }
 0x2d8   : > { %v3715_v55 = vmul.f32 %v1068_v54, %v1047_v43  ;;  %v2448_v54 = vunpack.c.h.bf16 %v3733_v3 }
 0x2da   : > { %v1071_v56 = vpack.c.bf16 %v3715_v55, %v3715_v55 }
 0x2dc   : > { %1081 = vrot.lane.b32.xlu2 %v1071_v56, %s3284_s0 }
 0x336   : > { %v1082_v57 = vpop.permute.xlu2 %1081 }
 0x337   : > { %2374 = vmatmul.msk.bf16.vlgmr.msra.gmra.mxu3 %vm974_vm1, %v1082_v57  ;;  %2383 = vmatmul.msk.bf16.vlgmr.msrb.gmra.mxu1 %vm974_vm1, %v1082_v57  ;;  %v2459_v57 = vunpack.c.l.bf16 %v2502_v49 }
 0x3b4   : > { %v3722_v58 = vpop.f32.mrf.mxu1 }
 0x3ba   : > { %v1107_v63 = vpop.f32.mrf.mxu3 }
 0x3bb   : > { %v3730_v0 = vadd.f32 %v2674_v59, %v1107_v63 }
 0x3bc   : > { %v1767_v4 = vpop.f32.mrf.mxu1 }
 0x3bd   : > { %v1151_v7 = vperm.slane %v3730_v0, 0  ;;  %v1144_v8 = vrot.slane %v3730_v0, 1  ;;  %v1145_v9 = vrot.slane %v3730_v0, 2  ;;  %v1146_v10 = vrot.slane %v3730_v0, 3 }
 0x3be   : > { %v1147_v21 = vrot.slane %v3730_v0, 4  ;;  %v1148_v37 = vrot.slane %v3730_v0, 5  ;;  %v1149_v45 = vrot.slane %v3730_v0, 6  ;;  %v1150_v62 = vrot.slane %v3730_v0, 7 }
 0x3bf   : > { %v1168_v14 = vadd.f32 %v2436_v1, %v1151_v7  ;;  %v1167_v15 = vadd.f32 %v2435_v2, %v1151_v7  ;;  %v1152_v16 = vperm.slane %v1144_v8, 0  ;;  %v1153_v17 = vperm.slane %v1145_v9, 0  ;;  %v2503_v2 = vld [vmem:[%s3672_s12 + $0x38] sm:$0xff]   ;;  %s881_s12 = scalar_lea.vmem [#allocation23], %s3670_s26 }
 0x3c0   : > { %v1154_v18 = vperm.slane %v1146_v10, 0  ;;  %v1155_v28 = vperm.slane %v1147_v21, 0  ;;  %v1156_v52 = vperm.slane %v1148_v37, 0  ;;  %v1157_v59 = vperm.slane %v1149_v45, 0  ;;  %s1980_s26 = sshll.u32 %s881_s12, 4  ;;  %s1981_s26 = int_to_ptr.vmem [resolvable:$true] %s1980_s26 }
 0x3c1   : > { %2685 = vtanh.f32 %v1168_v14  ;;  %v1169_v19 = vadd.f32 %v2439_v5, %v1152_v16  ;;  %v1172_v20 = vadd.f32 %v2444_v6, %v1153_v17  ;;  %v1170_v23 = vadd.f32 %v2440_v11, %v1152_v16 }
 0x3c2   : > { %v1109_v22 = vpop.f32.mrf.mxu3  ;;  %2687 = vtanh.f32 %v1167_v15  ;;  %v1173_v25 = vadd.f32 %v2447_v13, %v1154_v18  ;;  %v1175_v36 = vadd.f32 %v2451_v27, %v1155_v28  ;;  %v1171_v40 = vadd.f32 %v2443_v29, %v1153_v17 }
 0x3c3   : > { %2689 = vtanh.f32 %v1169_v19  ;;  %v1176_v44 = vadd.f32 %v2452_v31, %v1155_v28  ;;  %v1178_v61 = vadd.f32 %v2456_v51, %v1156_v52  ;;  %v1174_v1 = vadd.f32 %v2448_v54, %v1154_v18 }
 0x3c4   : > { %2691 = vtanh.f32 %v1172_v20  ;;  %v1179_v6 = vadd.f32 %v2459_v57, %v1157_v59  ;;  %v2463_v9 = vunpack.c.l.bf16 %v2503_v2  ;;  %v1158_v10 = vperm.slane %v1150_v62, 0 }
 0x3c5   : > { %2693 = vtanh.f32 %v1170_v23  ;;  %v2455_v11 = vunpack.c.l.bf16 %v2501_v41  ;;  %v2464_v14 = vunpack.c.h.bf16 %v2503_v2  ;;  %v2460_v27 = vunpack.c.h.bf16 %v2502_v49 }
 0x3c6   : > { %2695 = vtanh.f32 %v1173_v25  ;;  %v1181_v16 = vadd.f32 %v2463_v9, %v1158_v10 }
 0x3c7   : > { %v2686_v30 = vpop.eup %2685  ;;  %2697 = vtanh.f32 %v1175_v36  ;;  %v1177_v18 = vadd.f32 %v2455_v11, %v1156_v52  ;;  %v1182_v21 = vadd.f32 %v2464_v14, %v1158_v10  ;;  %v1180_v31 = vadd.f32 %v2460_v27, %v1157_v59 }
 0x3c8   : > { %v2688_v32 = vpop.eup %2687  ;;  %v1204_v33 = vmul.f32 %v2686_v30, %v3745_v26  ;;  %2699 = vtanh.f32 %v1171_v40 }
 0x3c9   : > { %v2690_v34 = vpop.eup %2689  ;;  %v1203_v35 = vmul.f32 %v2688_v32, %v3745_v26  ;;  %2701 = vtanh.f32 %v1176_v44 }
 0x3ca   : > { %v1222_v38 = vsel %vm974_vm1, %v1204_v33, 0.0  ;;  %v1205_v39 = vmul.f32 %v2690_v34, %v3745_v26  ;;  %v2692_v42 = vpop.eup %2691  ;;  %2703 = vtanh.f32 %v1178_v61 }
 0x3cb   : > { %1223 = vadd.xlane.f32.xlu0 %v1222_v38  ;;  %v1219_v43 = vsel %vm974_vm1, %v1203_v35, 0.0  ;;  %v2694_v46 = vpop.eup %2693  ;;  %v1208_v53 = vmul.f32 %v2692_v42, %v3745_v26  ;;  %2705 = vtanh.f32 %v1174_v1 }
 0x3cc   : > { %1220 = vadd.xlane.f32.xlu2 %v1219_v43  ;;  %v1225_v47 = vsel %vm974_vm1, %v1205_v39, 0.0  ;;  %v2696_v50 = vpop.eup %2695  ;;  %v1206_v56 = vmul.f32 %v2694_v46, %v3745_v26  ;;  %2707 = vtanh.f32 %v1179_v6 }
 0x3cd   : > { %1226 = vadd.xlane.f32.xlu1 %v1225_v47  ;;  %v1209_v60 = vmul.f32 %v2696_v50, %v3745_v26  ;;  %v1234_v63 = vsel %vm974_vm1, %v1208_v53, 0.0  ;;  %v2698_v4 = vpop.eup %2697  ;;  %2709 = vtanh.f32 %v1181_v16 }
 0x3ce   : > { %v1228_v5 = vsel %vm974_vm1, %v1206_v56, 0.0  ;;  %v2700_v3 = vpop.eup %2699  ;;  %v1211_v0 = vmul.f32 %v2698_v4, %v3745_v26  ;;  %2711 = vtanh.f32 %v1177_v18  ;;  %v1283_v56 = vlaneseq }
 0x3cf   : > { %v1237_v7 = vsel %vm974_vm1, %v1209_v60, 0.0  ;;  %v2702_v8 = vpop.eup %2701  ;;  %v1207_v13 = vmul.f32 %v2700_v3, %v3745_v26  ;;  %2713 = vtanh.f32 %v1182_v21 }
 0x3d0   : > { %v1212_v15 = vmul.f32 %v2702_v8, %v3745_v26  ;;  %v1243_v17 = vsel %vm974_vm1, %v1211_v0, 0.0  ;;  %v2704_v19 = vpop.eup %2703  ;;  %2715 = vtanh.f32 %v1180_v31  ;;  %v3805_v57 = vand.u32 127, %v1283_v56 }
 0x3d1   : > { %v1231_v20 = vsel %vm974_vm1, %v1207_v13, 0.0  ;;  %v2706_v22 = vpop.eup %2705  ;;  %v1214_v25 = vmul.f32 %v2704_v19, %v3745_v26 }
 0x3d2   : > { %v1246_v23 = vsel %vm974_vm1, %v1212_v15, 0.0  ;;  %v2708_v24 = vpop.eup %2707  ;;  %v1210_v28 = vmul.f32 %v2706_v22, %v3745_v26  ;;  %v3812_v61 = vadd.s32 4294967288, %v3805_v57 }
 0x3d3   : > { %1235 = vadd.xlane.f32.xlu0 %v1234_v63  ;;  %v1215_v29 = vmul.f32 %v2708_v24, %v3745_v26  ;;  %v1252_v30 = vsel %vm974_vm1, %v1214_v25, 0.0  ;;  %v2710_v32 = vpop.eup %2709 }
 0x3d4   : > { %1229 = vadd.xlane.f32.xlu2 %v1228_v5  ;;  %v1240_v33 = vsel %vm974_vm1, %v1210_v28, 0.0  ;;  %v2712_v34 = vpop.eup %2711  ;;  %v1217_v37 = vmul.f32 %v2710_v32, %v3745_v26 }
 0x3d5   : > { %1238 = vadd.xlane.f32.xlu1 %v1237_v7  ;;  %v1255_v35 = vsel %vm974_vm1, %v1215_v29, 0.0  ;;  %v2714_v36 = vpop.eup %2713  ;;  %v1213_v38 = vmul.f32 %v2712_v34, %v3745_v26 }
 0x3d6   : > { %v1218_v39 = vmul.f32 %v2714_v36, %v3745_v26  ;;  %v1261_v40 = vsel %vm974_vm1, %v1217_v37, 0.0  ;;  %v2716_v42 = vpop.eup %2715  ;;  %v3285_v37 = vmov 0  }
 0x3d7   : > { %v1249_v41 = vsel %vm974_vm1, %v1213_v38, 0.0  ;;  %v1216_v44 = vmul.f32 %v2716_v42, %v3745_v26  ;;  %2672 = vset.pattern.permute.xlu2 %v3285_v37  ;;  %2671 = vset.pattern.permute.xlu1 %v3285_v37 }
 0x3d8   : > { %v1264_v43 = vsel %vm974_vm1, %v1218_v39, 0.0  ;;  %2670 = vset.pattern.permute.xlu0 %v3285_v37 }
 0x3d9   : > { %v1258_v45 = vsel %vm974_vm1, %v1216_v44, 0.0 }
 0x3db   : > { %1244 = vadd.xlane.f32.xlu0 %v1243_v17 }
 0x3dc   : > { %1232 = vadd.xlane.f32.xlu2 %v1231_v20 }
 0x3dd   : > { %1247 = vadd.xlane.f32.xlu1 %v1246_v23 }
 0x3e3   : > { %1253 = vadd.xlane.f32.xlu0 %v1252_v30 }
 0x3e4   : > { %1241 = vadd.xlane.f32.xlu2 %v1240_v33 }
 0x3e5   : > { %1256 = vadd.xlane.f32.xlu1 %v1255_v35 }
 0x3eb   : > { %1262 = vadd.xlane.f32.xlu0 %v1261_v40 }
 0x3ec   : > { %1250 = vadd.xlane.f32.xlu2 %v1249_v41 }
 0x3ed   : > { %1265 = vadd.xlane.f32.xlu1 %v1264_v43 }
 0x3f4   : > { %1259 = vadd.xlane.f32.xlu2 %v1258_v45 }
 0x43e   : > { %v3786_v46 = vpop.xlane.xlu0 %1223 }
 0x43f   : > { %v3788_v47 = vpop.xlane.xlu2 %1220  ;;  %v1287_v2 = vperm.slane %v3786_v46, %v3812_v61 }
 0x440   : > { %v3790_v49 = vpop.xlane.xlu1 %1226  ;;  %v1285_v4 = vperm.slane %v3788_v47, %v3805_v57 }
 0x441   : > { %v1290_v5 = vperm.slane %v3790_v49, %v3805_v57 }
 0x442   : > { %v1289_v0 = vsel %vm1288_vm7, %v1287_v2, %v1285_v4 }
 0x446   : > { %v3794_v51 = vpop.xlane.xlu0 %1235 }
 0x447   : > { %v3792_v50 = vpop.xlane.xlu2 %1229  ;;  %v1294_v7 = vperm.slane %v3794_v51, %v3812_v61 }
 0x448   : > { %v3796_v52 = vpop.xlane.xlu1 %1238  ;;  %v1291_v63 = vperm.slane %v3792_v50, %v3812_v61 }
 0x449   : > { %v1296_v9 = vperm.slane %v3796_v52, %v3805_v57 }
 0x44a   : > { %v1292_v8 = vsel %vm1288_vm7, %v1291_v63, %v1290_v5 }
 0x44b   : > { %v1312_v14 = vsel %vm1311_vm8, %v1292_v8, %v1289_v0 }
 0x44e   : > { %v3802_v26 = vpop.xlane.xlu0 %1244 }
 0x44f   : > { %v3798_v53 = vpop.xlane.xlu2 %1232  ;;  %v1299_v19 = vperm.slane %v3802_v26, %v3805_v57 }
 0x450   : > { %v3800_v54 = vpop.xlane.xlu1 %1247  ;;  %v1293_v1 = vperm.slane %v3798_v53, %v3805_v57 }
 0x451   : > { %v1300_v15 = vperm.slane %v3800_v54, %v3812_v61 }
 0x452   : > { %v1295_v10 = vsel %vm1288_vm7, %v1294_v7, %v1293_v1 }
 0x453   : > { %v1314_v17 = vsel %vm1313_vm9, %v1295_v10, %v1312_v14  ;;  %v1301_v25 = vsel %vm1288_vm7, %v1300_v15, %v1299_v19 }
 0x456   : > { %v3814_v62 = vpop.xlane.xlu0 %1253 }
 0x457   : > { %v3807_v59 = vpop.xlane.xlu2 %1241  ;;  %v1303_v18 = vperm.slane %v3814_v62, %v3812_v61 }
 0x458   : > { %v3809_v60 = vpop.xlane.xlu1 %1256  ;;  %v1297_v6 = vperm.slane %v3807_v59, %v3812_v61 }
 0x459   : > { %v1305_v27 = vperm.slane %v3809_v60, %v3805_v57 }
 0x45a   : > { %v1298_v11 = vsel %vm1288_vm7, %v1297_v6, %v1296_v9 }
 0x45b   : > { %v1316_v20 = vsel %vm1315_vm10, %v1298_v11, %v1314_v17 }
 0x45c   : > { %v1318_v30 = vsel %vm1317_vm11, %v1301_v25, %v1316_v20 }
 0x45e   : > { %v3851_v21 = vpop.xlane.xlu0 %1262 }
 0x45f   : > { %v3828_v3 = vpop.xlane.xlu2 %1250  ;;  %v1308_v29 = vperm.slane %v3851_v21, %v3805_v57 }
 0x460   : > { %v1302_v13 = vperm.slane %v3828_v3, %v3805_v57  ;;  %v3843_v16 = vpop.xlane.xlu1 %1265 }
 0x461   : > { %v1309_v23 = vperm.slane %v3843_v16, %v3812_v61 }
 0x462   : > { %v1304_v22 = vsel %vm1288_vm7, %v1303_v18, %v1302_v13 }
 0x463   : > { %v1320_v32 = vsel %vm1319_vm12, %v1304_v22, %v1318_v30  ;;  %v1310_v33 = vsel %vm1288_vm7, %v1309_v23, %v1308_v29 }
 0x467   : > { %v3856_v24 = vpop.xlane.xlu2 %1259 }
 0x468   : > { %v1306_v28 = vperm.slane %v3856_v24, %v3812_v61 }
 0x46a   : > { %v1307_v31 = vsel %vm1288_vm7, %v1306_v28, %v1305_v27 }
 0x46b   : > { %v1322_v34 = vsel %vm1321_vm13, %v1307_v31, %v1320_v32 }
 0x46c   : > { %v1324_v35 = vsel %vm1323_vm14, %v1310_v33, %v1322_v34 }
 0x46d   : > { %v1327_v36 = vsel %vm1326_vm15, %v1324_v35, -inf }
 0x46e   : > { %1328 = vmax.xlane.f32.xlu2 %v1327_v36 }
 0x4e1   : > { %v3872_v38 = vpop.xlane.xlu2 %1328 }
 0x4e2   : > { %v1332_v39 = vperm.slane %v3872_v38, 1  ;;  %v1331_v40 = vperm.slane %v3872_v38, 0  ;;  %v1333_v44 = vperm.slane %v3872_v38, 2  ;;  %v1334_v45 = vperm.slane %v3872_v38, 3 }
 0x4e3   : > { %v1336_v8 = vperm.slane %v3872_v38, 5  ;;  %v1335_v11 = vperm.slane %v3872_v38, 4  ;;  %v1337_v17 = vperm.slane %v3872_v38, 6  ;;  %v1338_v29 = vperm.slane %v3872_v38, 7 }
 0x4e4   : > { %v1349_v41 = vsub.f32 %v3790_v49, %v1332_v39  ;;  %v1348_v42 = vsub.f32 %v3786_v46, %v1331_v40  ;;  %v1347_v43 = vsub.f32 %v3788_v47, %v1331_v40  ;;  %v1351_v4 = vsub.f32 %v3798_v53, %v1333_v44 }
 0x4e5   : > { %v1350_v5 = vsub.f32 %v3792_v50, %v1332_v39  ;;  %v1354_v49 = vsub.f32 %v3807_v59, %v1334_v45  ;;  %v1353_v50 = vsub.f32 %v3796_v52, %v1334_v45  ;;  %v1352_v53 = vsub.f32 %v3794_v51, %v1333_v44 }
 0x4e6   : > { %v1367_v63 = vmul.f32 1.442695, %v1349_v41  ;;  %v1365_v1 = vmul.f32 1.442695, %v1348_v42  ;;  %v1363_v2 = vmul.f32 1.442695, %v1347_v43  ;;  %v1357_v59 = vsub.f32 %v3828_v3, %v1336_v8 }
 0x4e7   : > { %v1371_v6 = vmul.f32 1.442695, %v1351_v4  ;;  %v1369_v46 = vmul.f32 1.442695, %v1350_v5  ;;  %v1377_v47 = vmul.f32 1.442695, %v1354_v49  ;;  %v1356_v51 = vsub.f32 %v3800_v54, %v1335_v11 }
 0x4e8   : > { %2717 = vpow2.f32 %v1367_v63  ;;  %v1375_v0 = vmul.f32 1.442695, %v1353_v50  ;;  %v1373_v13 = vmul.f32 1.442695, %v1352_v53  ;;  %v1383_v15 = vmul.f32 1.442695, %v1357_v59 }
 0x4e9   : > { %2719 = vpow2.f32 %v1365_v1  ;;  %v1355_v3 = vsub.f32 %v3802_v26, %v1335_v11  ;;  %v1360_v19 = vsub.f32 %v3856_v24, %v1337_v17  ;;  %v1381_v20 = vmul.f32 1.442695, %v1356_v51 }
 0x4ea   : > { %2721 = vpow2.f32 %v1363_v2  ;;  %v1359_v54 = vsub.f32 %v3809_v60, %v1337_v17  ;;  %v1358_v26 = vsub.f32 %v3814_v62, %v1336_v8  ;;  %v1362_v60 = vsub.f32 %v3843_v16, %v1338_v29 }
 0x4eb   : > { %2723 = vpow2.f32 %v1371_v6  ;;  %v1379_v22 = vmul.f32 1.442695, %v1355_v3  ;;  %v1389_v25 = vmul.f32 1.442695, %v1360_v19  ;;  %v1361_v62 = vsub.f32 %v3851_v21, %v1338_v29 }
 0x4ec   : > { %2725 = vpow2.f32 %v1369_v46  ;;  %v1387_v24 = vmul.f32 1.442695, %v1359_v54  ;;  %v1385_v30 = vmul.f32 1.442695, %v1358_v26  ;;  %v1393_v34 = vmul.f32 1.442695, %v1362_v60 }
 0x4ed   : > { %2727 = vpow2.f32 %v1377_v47  ;;  %v1391_v35 = vmul.f32 1.442695, %v1361_v62 }
 0x4ee   : > { %v3884_v7 = vpop.eup %2717  ;;  %2729 = vpow2.f32 %v1375_v0 }
 0x4ef   : > { %v3887_v9 = vpop.eup %2719  ;;  %1418 = vperm.xlu2 %2672, %v3884_v7   ;;  %2731 = vpow2.f32 %v1373_v13 }
 0x4f0   : > { %v3890_v10 = vpop.eup %2721  ;;  %1415 = vperm.xlu1 %2671, %v3887_v9   ;;  %2733 = vpow2.f32 %v1383_v15 }
 0x4f1   : > { %1412 = vperm.xlu0 %2670, %v3890_v10   ;;  %v3898_v14 = vpop.eup %2723  ;;  %2735 = vpow2.f32 %v1381_v20 }
 0x4f2   : > { %v3901_v18 = vpop.eup %2725  ;;  %2737 = vpow2.f32 %v1379_v22 }
 0x4f3   : > { %v3904_v52 = vpop.eup %2727  ;;  %2739 = vpow2.f32 %v1389_v25 }
 0x4f4   : > { %v3911_v23 = vpop.eup %2729  ;;  %2741 = vpow2.f32 %v1387_v24 }
 0x4f5   : > { %v3913_v27 = vpop.eup %2731  ;;  %2743 = vpow2.f32 %v1385_v30 }
 0x4f6   : > { %v3916_v28 = vpop.eup %2733  ;;  %2745 = vpow2.f32 %v1393_v34 }
 0x4f7   : > { %1424 = vperm.xlu2 %2672, %v3898_v14   ;;  %v3923_v31 = vpop.eup %2735  ;;  %2747 = vpow2.f32 %v1391_v35 }
 0x4f8   : > { %1421 = vperm.xlu1 %2671, %v3901_v18   ;;  %v3925_v32 = vpop.eup %2737 }
 0x4f9   : > { %1433 = vperm.xlu0 %2670, %v3904_v52   ;;  %v3928_v33 = vpop.eup %2739 }
 0x4fa   : > { %v3934_v36 = vpop.eup %2741 }
 0x4fb   : > { %v3936_v37 = vpop.eup %2743 }
 0x4fc   : > { %v3940_v38 = vpop.eup %2745 }
 0x4fd   : > { %v3942_v16 = vpop.eup %2747 }
 0x4ff   : > { %1430 = vperm.xlu2 %2672, %v3911_v23  }
 0x500   : > { %1427 = vperm.xlu1 %2671, %v3913_v27  }
 0x501   : > { %1442 = vperm.xlu0 %2670, %v3916_v28  }
 0x507   : > { %1439 = vperm.xlu2 %2672, %v3923_v31  }
 0x508   : > { %1436 = vperm.xlu1 %2671, %v3925_v32  }
 0x509   : > { %1451 = vperm.xlu0 %2670, %v3928_v33  }
 0x50f   : > { %1448 = vperm.xlu2 %2672, %v3934_v36  }
 0x510   : > { %1445 = vperm.xlu1 %2671, %v3936_v37  }
 0x517   : > { %1457 = vperm.xlu2 %2672, %v3940_v38  }
 0x518   : > { %1454 = vperm.xlu1 %2671, %v3942_v16  }
 0x549   : > { %v1419_v21 = vpop.permute.xlu2 %1418 }
 0x54a   : > { %v1462_v6 = vperm.slane %v1419_v21, %v3805_v57 }
 0x551   : > { %v1425_v39 = vpop.permute.xlu2 %1424 }
 0x552   : > { %v1465_v8 = vperm.slane %v1425_v39, %v3805_v57 }
 0x559   : > { %v1431_v42 = vpop.permute.xlu2 %1430 }
 0x55a   : > { %v1468_v3 = vperm.slane %v1431_v42, %v3805_v57 }
 0x561   : > { %v1440_v63 = vpop.permute.xlu2 %1439 }
 0x562   : > { %v1416_v40 = vpop.permute.xlu1 %1415  ;;  %v1472_v17 = vperm.slane %v1440_v63, %v3812_v61 }
 0x563   : > { %v1413_v41 = vpop.permute.xlu0 %1412  ;;  %v1460_v46 = vperm.slane %v1416_v40, %v3812_v61 }
 0x564   : > { %v1459_v47 = vperm.slane %v1413_v41, %v3805_v57 }
 0x566   : > { %v1461_v11 = vsel %vm1288_vm7, %v1460_v46, %v1459_v47 }
 0x569   : > { %v1449_v5 = vpop.permute.xlu2 %1448 }
 0x56a   : > { %v1422_v43 = vpop.permute.xlu1 %1421  ;;  %v1477_v62 = vperm.slane %v1449_v5, %v3805_v57 }
 0x56b   : > { %v1434_v44 = vpop.permute.xlu0 %1433  ;;  %v1463_v4 = vperm.slane %v1422_v43, %v3812_v61 }
 0x56c   : > { %v1469_v13 = vperm.slane %v1434_v44, %v3812_v61 }
 0x56d   : > { %v1464_v50 = vsel %vm1288_vm7, %v1463_v4, %v1462_v6 }
 0x56e   : > { %v1483_v51 = vsel %vm1311_vm8, %v1464_v50, %v1461_v11  ;;  %v1470_v54 = vsel %vm1288_vm7, %v1469_v13, %v1468_v3 }
 0x571   : > { %v1458_v24 = vpop.permute.xlu2 %1457 }
 0x572   : > { %v1428_v45 = vpop.permute.xlu1 %1427  ;;  %v1481_v21 = vperm.slane %v1458_v24, %v3812_v61 }
 0x573   : > { %v1443_v2 = vpop.permute.xlu0 %1442  ;;  %v1466_v49 = vperm.slane %v1428_v45, %v3812_v61 }
 0x574   : > { %v1474_v20 = vperm.slane %v1443_v2, %v3805_v57 }
 0x575   : > { %v1467_v53 = vsel %vm1288_vm7, %v1466_v49, %v1465_v8 }
 0x576   : > { %v1484_v19 = vsel %vm1313_vm9, %v1467_v53, %v1483_v51 }
 0x577   : > { %v1485_v29 = vsel %vm1315_vm10, %v1470_v54, %v1484_v19  ;;  %v2506_v19 = vld [vmem:[%s3663_s3 + $0x18] sm:$0xff]  }
 0x578   : > { %v2479_v54 = vunpack.c.l.bf16 %v2506_v19 }
 0x57a   : > { %v1437_v1 = vpop.permute.xlu1 %1436 }
 0x57b   : > { %v1471_v59 = vperm.slane %v1437_v1, %v3805_v57  ;;  %v1452_v22 = vpop.permute.xlu0 %1451 }
 0x57c   : > { %v1478_v30 = vperm.slane %v1452_v22, %v3812_v61 }
 0x57d   : > { %v1473_v25 = vsel %vm1288_vm7, %v1472_v17, %v1471_v59  ;;  %v2504_v17 = vld [vmem:[%s3663_s3 + $0x8] sm:$0xff]  }
 0x57e   : > { %v1486_v60 = vsel %vm1317_vm11, %v1473_v25, %v1485_v29  ;;  %v1479_v40 = vsel %vm1288_vm7, %v1478_v30, %v1477_v62  ;;  %v2471_v3 = vunpack.c.l.bf16 %v2504_v17  ;;  %v2472_v22 = vunpack.c.h.bf16 %v2504_v17 }
 0x57f   : > { %v2480_v29 = vunpack.c.h.bf16 %v2506_v19 }
 0x582   : > { %v1446_v0 = vpop.permute.xlu1 %1445 }
 0x583   : > { %v1475_v15 = vperm.slane %v1446_v0, %v3812_v61 }
 0x585   : > { %v1476_v26 = vsel %vm1288_vm7, %v1475_v15, %v1474_v20 }
 0x586   : > { %v1487_v35 = vsel %vm1319_vm12, %v1476_v26, %v1486_v60 }
 0x587   : > { %v1488_v42 = vsel %vm1321_vm13, %v1479_v40, %v1487_v35 }
 0x58a   : > { %v1455_v34 = vpop.permute.xlu1 %1454 }
 0x58b   : > { %v1480_v39 = vperm.slane %v1455_v34, %v3805_v57 }
 0x58d   : > { %v1482_v41 = vsel %vm1288_vm7, %v1481_v21, %v1480_v39 }
 0x58e   : > { %v1489_v43 = vsel %vm1323_vm14, %v1482_v41, %v1488_v42  ;;  %v2508_v42 = vld [vmem:[%s3663_s3 + $0x28] sm:$0xff]  }
 0x58f   : > { %v1491_v44 = vsel %vm1326_vm15, %v1489_v43, 0.0 }
 0x590   : > { %1492 = vadd.xlane.f32.xlu0 %v1491_v44 }
 0x603   : > { %v1493_v45 = vpop.xlane.xlu0 %1492 }
 0x604   : > { %2749 = vrcp.f32 %v1493_v45 }
 0x60a   : > { %v2750_v63 = vpop.eup %2749 }
 0x60b   : > { %v1501_v1 = vperm.slane %v2750_v63, 5  ;;  %v1496_v2 = vperm.slane %v2750_v63, 0  ;;  %v1497_v5 = vperm.slane %v2750_v63, 1  ;;  %v1498_v46 = vperm.slane %v2750_v63, 2 }
 0x60c   : > { %v1500_v50 = vperm.slane %v2750_v63, 4  ;;  %v1502_v53 = vperm.slane %v2750_v63, 6 }
 0x60d   : > { %v1523_v61 = vmul.f32 %v3936_v37, %v1501_v1  ;;  %v1513_v57 = vmul.f32 %v3887_v9, %v1496_v2  ;;  %v1512_v4 = vmul.f32 %v3890_v10, %v1496_v2  ;;  %v1515_v49 = vmul.f32 %v3901_v18, %v1497_v5 }
 0x60e   : > { %v1514_v6 = vmul.f32 %v3884_v7, %v1497_v5  ;;  %v1517_v47 = vmul.f32 %v3913_v27, %v1498_v46  ;;  %v1516_v8 = vmul.f32 %v3898_v14, %v1498_v46  ;;  %v1499_v9 = vperm.slane %v2750_v63, 3 }
 0x60f   : > { %1617 = vperm.xlu0 %2670, %v1523_v61   ;;  %1567 = vperm.xlu2 %2672, %v1513_v57   ;;  %v1521_v18 = vmul.f32 %v3923_v31, %v1500_v50  ;;  %v1520_v7 = vmul.f32 %v3925_v32, %v1500_v50  ;;  %v1524_v27 = vmul.f32 %v3934_v36, %v1502_v53  ;;  %v2487_v50 = vunpack.c.l.bf16 %v2508_v42 }
 0x610   : > { %1562 = vperm.xlu1 %2671, %v1512_v4   ;;  %v1519_v10 = vmul.f32 %v3904_v52, %v1499_v9  ;;  %v1518_v37 = vmul.f32 %v3911_v23, %v1499_v9  ;;  %v1522_v14 = vmul.f32 %v3916_v28, %v1501_v1  ;;  %v1503_v52 = vperm.slane %v2750_v63, 7 }
 0x611   : > { %v1525_v59 = vmul.f32 %v3928_v33, %v1502_v53  ;;  %v2466_v33 = vld [vmem:[%s3663_s3] sm:$0xff]   ;;  %v2488_v4 = vunpack.c.h.bf16 %v2508_v42 }
 0x612   : > { %v1526_v23 = vmul.f32 %v3942_v16, %v1503_v52  ;;  %v1527_v31 = vmul.f32 %v3940_v38, %v1503_v52  ;;  %v2505_v16 = vld [vmem:[%s3663_s3 + $0x10] sm:$0xff]   ;;  %v2467_v25 = vunpack.c.l.bf16 %v2466_v33  ;;  %v2507_v38 = vld [vmem:[%s3663_s3 + $0x20] sm:$0xff]   ;;  %v2468_v24 = vunpack.c.h.bf16 %v2466_v33 }
 0x613   : > { %v2475_v20 = vunpack.c.l.bf16 %v2505_v16  ;;  %v2476_v26 = vunpack.c.h.bf16 %v2505_v16  ;;  %v2483_v60 = vunpack.c.l.bf16 %v2507_v38  ;;  %v2484_v62 = vunpack.c.h.bf16 %v2507_v38  ;;  %v2432_v33 = vld [vmem:[#allocation19 + $0x8] sm:$0xff] }
 0x614   : > { %1843 = vmatpush.bf16.msrb.mxu3 %v2432_v33 }
 0x617   : > { %1577 = vperm.xlu2 %2672, %v1515_v49  }
 0x618   : > { %1572 = vperm.xlu1 %2671, %v1514_v6  }
 0x61f   : > { %1587 = vperm.xlu2 %2672, %v1517_v47  }
 0x620   : > { %1582 = vperm.xlu1 %2671, %v1516_v8  }
 0x627   : > { %1597 = vperm.xlu2 %2672, %v1519_v10  }
 0x628   : > { %1592 = vperm.xlu1 %2671, %v1518_v37  }
 0x62f   : > { %1607 = vperm.xlu2 %2672, %v1521_v18  }
 0x630   : > { %1602 = vperm.xlu1 %2671, %v1520_v7  }
 0x637   : > { %1622 = vperm.xlu2 %2672, %v1524_v27  }
 0x638   : > { %1612 = vperm.xlu1 %2671, %v1522_v14  }
 0x63f   : > { %1632 = vperm.xlu2 %2672, %v1526_v23   ;;  %v2509_v23 = vld [vmem:[%s3663_s3 + $0x30] sm:$0xff]  }
 0x640   : > { %1627 = vperm.xlu1 %2671, %v1525_v59  }
 0x648   : > { %1637 = vperm.xlu1 %2671, %v1527_v31  }
 0x669   : > { %v1568_v32 = vpop.permute.xlu2 %1567 }
 0x66a   : > { %v1641_v44 = vmul.f32 %v2468_v24, %v1568_v32 }
 0x66c   : > { %v1657_v9 = vsel %vm974_vm1, %v1641_v44, 0.0 }
 0x671   : > { %v1578_v28 = vpop.permute.xlu2 %1577 }
 0x672   : > { %v1643_v35 = vmul.f32 %v2472_v22, %v1578_v28 }
 0x674   : > { %v1666_v57 = vsel %vm974_vm1, %v1643_v35, 0.0 }
 0x679   : > { %v1588_v11 = vpop.permute.xlu2 %1587 }
 0x67a   : > { %v1645_v41 = vmul.f32 %v2476_v26, %v1588_v11  ;;  %v2427_v26 = vld [vmem:[#allocation16] sm:$0xff] }
 0x67c   : > { %v1675_v6 = vsel %vm974_vm1, %v1645_v41, 0.0 }
 0x681   : > { %v1598_v15 = vpop.permute.xlu2 %1597  ;;  %v1618_v46 = vpop.permute.xlu0 %1617 }
 0x682   : > { %v1563_v36 = vpop.permute.xlu1 %1562  ;;  %v1647_v45 = vmul.f32 %v2480_v29, %v1598_v15  ;;  %v1651_v27 = vmul.f32 %v2488_v4, %v1618_v46 }
 0x683   : > { %v1640_v21 = vmul.f32 %v2467_v25, %v1563_v36 }
 0x684   : > { %v1684_v10 = vsel %vm974_vm1, %v1647_v45, 0.0  ;;  %v1702_v11 = vsel %vm974_vm1, %v1651_v27, 0.0 }
 0x685   : > { %v1656_v5 = vsel %vm974_vm1, %v1640_v21, 0.0 }
 0x686   : > { %v1658_v18 = vadd.f32 %v1657_v9, %v1656_v5 }
 0x688   : > { %v1659_v36 = vrot.slane %v1658_v18, 4 }
 0x689   : > { %v1608_v39 = vpop.permute.xlu2 %1607 }
 0x68a   : > { %v1573_v0 = vpop.permute.xlu1 %1572  ;;  %v1649_v2 = vmul.f32 %v2484_v62, %v1608_v39  ;;  %v1660_v22 = vadd.f32 %v1659_v36, %v1658_v18  ;;  %v2329_v39 = vld [vmem:[%s770_s10 + $0x8] sm:$0xff]  ;;  %s4053_s10 = sshll.u32 %s4239_s19, 3  ;;  %s3139_s19 = scalar_lea.hbm %s4253_s14, 64 }
 0x68b   : > { %v1642_v30 = vmul.f32 %v2471_v3, %v1573_v0  ;;  %v2428_v3 = vld [vmem:[#allocation16 + $0x8] sm:$0xff]  ;;  %1877 = vrot.lane.b32.xlu2 %v2329_v39, %s3284_s0 }
 0x68c   : > { %v1693_v7 = vsel %vm974_vm1, %v1649_v2, 0.0  ;;  %1814 = vmatpush.bf16.msrb.mxu2 %v2428_v3 }
 0x68d   : > { %v1665_v63 = vsel %vm974_vm1, %v1642_v30, 0.0 }
 0x68e   : > { %v1667_v47 = vadd.f32 %v1666_v57, %v1665_v63 }
 0x690   : > { %v1668_v52 = vrot.slane %v1667_v47, 4  ;;  %1815 = vmatpush.bf16.msrb.mxu2 %v2427_v26 }
 0x691   : > { %v1623_v28 = vpop.permute.xlu2 %1622 }
 0x692   : > { %v1583_v13 = vpop.permute.xlu1 %1582 }
 0x693   : > { %v1644_v34 = vmul.f32 %v2475_v20, %v1583_v13  ;;  %v2491_v13 = vunpack.c.l.bf16 %v2509_v23  ;;  %v2492_v20 = vunpack.c.h.bf16 %v2509_v23 }
 0x695   : > { %v1674_v61 = vsel %vm974_vm1, %v1644_v34, 0.0  ;;  %v1652_v24 = vmul.f32 %v2491_v13, %v1623_v28 }
 0x696   : > { %v1676_v37 = vadd.f32 %v1675_v6, %v1674_v61 }
 0x697   : > { %v1710_v42 = vsel %vm974_vm1, %v1652_v24, 0.0 }
 0x698   : > { %v1677_v31 = vrot.slane %v1676_v37, 4 }
 0x69a   : > { %v1593_v51 = vpop.permute.xlu1 %1592  ;;  %v1678_v19 = vadd.f32 %v1677_v31, %v1676_v37 }
 0x69b   : > { %v1646_v40 = vmul.f32 %v2479_v54, %v1593_v51  ;;  %v1669_v51 = vadd.f32 %v1668_v52, %v1667_v47  ;;  %v2431_v54 = vld [vmem:[#allocation19] sm:$0xff] }
 0x69c   : > { %v1679_v35 = vrot.slane %v1678_v19, 2  ;;  %1844 = vmatpush.bf16.msrb.mxu3 %v2431_v54 }
 0x69d   : > { %v1683_v49 = vsel %vm974_vm1, %v1646_v40, 0.0  ;;  %v1670_v30 = vrot.slane %v1669_v51, 2  ;;  %v1661_v40 = vrot.slane %v1660_v22, 2 }
 0x69e   : > { %v1685_v53 = vadd.f32 %v1684_v10, %v1683_v49  ;;  %v1680_v57 = vadd.f32 %v1679_v35, %v1678_v19 }
 0x69f   : > { %v1671_v63 = vadd.f32 %v1670_v30, %v1669_v51  ;;  %2401 = vmatmul.msk.bf16.vlgmr.msrb.gmra.mxu3 %vm974_vm1, %v3697_v12  ;;  %v1662_v5 = vadd.f32 %v1661_v40, %v1660_v22 }
 0x6a0   : > { %v1686_v0 = vrot.slane %v1685_v53, 4 }
 0x6a2   : > { %v1603_v43 = vpop.permute.xlu1 %1602  ;;  %v1687_v25 = vadd.f32 %v1686_v0, %v1685_v53 }
 0x6a3   : > { %v1648_v1 = vmul.f32 %v2483_v60, %v1603_v43  ;;  %v2510_v60 = vld [vmem:[%s3663_s3 + $0x38] sm:$0xff]   ;;  %s3286_s3 = smov 96  }
 0x6a4   : > { %v1688_v41 = vrot.slane %v1687_v25, 2  ;;  %v2495_v43 = vunpack.c.l.bf16 %v2510_v60  ;;  %v2496_v4 = vunpack.c.h.bf16 %v2510_v60 }
 0x6a5   : > { %v1692_v8 = vsel %vm974_vm1, %v1648_v1, 0.0  ;;  %v1633_v1 = vpop.permute.xlu2 %1632 }
 0x6a6   : > { %v1694_v14 = vadd.f32 %v1693_v7, %v1692_v8  ;;  %v1689_v49 = vadd.f32 %v1688_v41, %v1687_v25  ;;  %v1654_v46 = vmul.f32 %v2495_v43, %v1633_v1  ;;  %v1672_v8 = vrot.slane %v1671_v63, 1 }
 0x6a7   : > { %v1663_v7 = vrot.slane %v1662_v5, 1 }
 0x6a8   : > { %v1695_v15 = vrot.slane %v1694_v14, 4  ;;  %v1690_v53 = vrot.slane %v1689_v49, 1  ;;  %v1673_v12 = vadd.f32 %v1672_v8, %v1671_v63 }
 0x6a9   : > { %v1664_v28 = vadd.f32 %v1663_v7, %v1662_v5 }
 0x6aa   : > { %v1613_v59 = vpop.permute.xlu1 %1612  ;;  %v1696_v29 = vadd.f32 %v1695_v15, %v1694_v14  ;;  %v1719_v14 = vsel %vm974_vm1, %v1654_v46, 0.0  ;;  %v1691_v0 = vadd.f32 %v1690_v53, %v1689_v49 }
 0x6ab   : > { %v1650_v32 = vmul.f32 %v2487_v50, %v1613_v59  ;;  %v1681_v50 = vrot.slane %v1680_v57, 1  ;;  %v1728_v19 = vpack.c.bf16 %v1664_v28, %v1664_v28 }
 0x6ac   : > { %v1697_v44 = vrot.slane %v1696_v29, 2 }
 0x6ad   : > { %v1701_v17 = vsel %vm974_vm1, %v1650_v32, 0.0  ;;  %v1682_v36 = vadd.f32 %v1681_v50, %v1680_v57  ;;  %v1777_v30 = vunpack.c.l.b16 %v1728_v19 }
 0x6ae   : > { %v1703_v16 = vadd.f32 %v1702_v11, %v1701_v17  ;;  %v1698_v47 = vadd.f32 %v1697_v44, %v1696_v29  ;;  %v1729_v17 = vpack.c.bf16 %v1673_v12, %v1673_v12 }
 0x6af   : > { %v1730_v3 = vpack.c.bf16 %v1682_v36, %v1682_v36 }
 0x6b0   : > { %v1704_v38 = vrot.slane %v1703_v16, 4  ;;  %v1699_v52 = vrot.slane %v1698_v47, 1 }
 0x6b1   : > { %v1779_v24 = vunpack.c.l.b16 %v1730_v3 }
 0x6b2   : > { %v1705_v62 = vadd.f32 %v1704_v38, %v1703_v16  ;;  %v1628_v34 = vpop.permute.xlu1 %1627  ;;  %v1700_v15 = vadd.f32 %v1699_v52, %v1698_v47  ;;  %v1778_v38 = vunpack.c.l.b16 %v1729_v17 }
 0x6b3   : > { %v1653_v21 = vmul.f32 %v2492_v20, %v1628_v34  ;;  %v1731_v20 = vpack.c.bf16 %v1691_v0, %v1691_v0 }
 0x6b4   : > { %v1706_v2 = vrot.slane %v1705_v62, 2  ;;  %v1732_v25 = vpack.c.bf16 %v1700_v15, %v1700_v15  ;;  %v1785_v35 = vsel %vm1311_vm8, %v1778_v38, %v1777_v30 }
 0x6b5   : > { %v1711_v45 = vsel %vm974_vm1, %v1653_v21, 0.0  ;;  %v1780_v60 = vunpack.c.l.b16 %v1731_v20  ;;  %v1786_v40 = vsel %vm1313_vm9, %v1779_v24, %v1785_v35 }
 0x6b6   : > { %v1712_v61 = vadd.f32 %v1711_v45, %v1710_v42  ;;  %v1707_v9 = vadd.f32 %v1706_v2, %v1705_v62  ;;  %v1781_v34 = vunpack.c.l.b16 %v1732_v25 }
 0x6b7   : > { %v1787_v42 = vsel %vm1315_vm10, %v1780_v60, %v1786_v40 }
 0x6b8   : > { %v1713_v6 = vrot.slane %v1712_v61, 4  ;;  %v1708_v59 = vrot.slane %v1707_v9, 1  ;;  %v1788_v44 = vsel %vm1317_vm11, %v1781_v34, %v1787_v42 }
 0x6ba   : > { %v1714_v10 = vadd.f32 %v1713_v6, %v1712_v61  ;;  %v1638_v37 = vpop.permute.xlu1 %1637  ;;  %v1709_v51 = vadd.f32 %v1708_v59, %v1707_v9  ;;  %v2676_v6 = vld [vmem:[%s4251_s17] ss:$0 sm:$0xff] }
 0x6bb   : > { %v1655_v18 = vmul.f32 %v2496_v4, %v1638_v37 }
 0x6bc   : > { %v1715_v27 = vrot.slane %v1714_v10, 2  ;;  %v1733_v54 = vpack.c.bf16 %v1709_v51, %v1709_v51 }
 0x6bd   : > { %v1720_v23 = vsel %vm974_vm1, %v1655_v18, 0.0 }
 0x6be   : > { %v1716_v31 = vadd.f32 %v1715_v27, %v1714_v10  ;;  %v1721_v32 = vadd.f32 %v1720_v23, %v1719_v14  ;;  %v1782_v21 = vunpack.c.l.b16 %v1733_v54 }
 0x6c0   : > { %v1717_v11 = vrot.slane %v1716_v31, 1  ;;  %v1722_v13 = vrot.slane %v1721_v32, 4  ;;  %v1789_v63 = vsel %vm1319_vm12, %v1782_v21, %v1788_v44 }
 0x6c2   : > { %v1723_v16 = vadd.f32 %v1722_v13, %v1721_v32  ;;  %v1718_v33 = vadd.f32 %v1717_v11, %v1716_v31 }
 0x6c4   : > { %v1724_v22 = vrot.slane %v1723_v16, 2  ;;  %v1734_v29 = vpack.c.bf16 %v1718_v33, %v1718_v33 }
 0x6c6   : > { %v1725_v26 = vadd.f32 %v1724_v22, %v1723_v16  ;;  %v1783_v41 = vunpack.c.l.b16 %v1734_v29 }
 0x6c8   : > { %v1726_v62 = vrot.slane %v1725_v26, 1  ;;  %v1790_v1 = vsel %vm1321_vm13, %v1783_v41, %v1789_v63 }
 0x6ca   : > { %v1727_v39 = vadd.f32 %v1726_v62, %v1725_v26 }
 0x6cc   : > { %v1735_v43 = vpack.c.bf16 %v1727_v39, %v1727_v39 }
 0x6ce   : > { %v1784_v45 = vunpack.c.l.b16 %v1735_v43 }
 0x6d0   : > { %v1791_v2 = vsel %vm1323_vm14, %v1784_v45, %v1790_v1 }
 0x6d1   : > { %v1792_v61 = vpack.c.b16 %v1791_v2, %v1791_v2 }
 0x6d3   : > { %2392 = vmatmul.msk.bf16.vlgmr.msrb.gmra.mxu2 %vm974_vm1, %v1792_v61 }
 0x6e5   : > { %v1878_v36 = vpop.permute.xlu2 %1877 }
 0x722   : > { %v1846_v57 = vpop.f32.mrf.mxu3 }
 0x72a   : > { %v1848_v4 = vpop.f32.mrf.mxu3 }
 0x756   : > { %v1817_v5 = vpop.f32.mrf.mxu2 }
 0x757   : > { %v1818_v49 = vadd.f32 %v1817_v5, %v3722_v58 }
 0x759   : > { %v1850_v46 = vadd.f32 %v1846_v57, %v1818_v49 }
 0x75b   : > { %v1855_v47 = vadd.f32 %v2676_v6, %v1850_v46 }
 0x75d   : > { %2751 = vtanh.f32 %v1855_v47  ;;  %v2402_v10 = vmul.f32 -1.442695, %v1855_v47 }
 0x75e   : > { %v1819_v8 = vpop.f32.mrf.mxu2 }
 0x75f   : > { %2753 = vpow2.f32 %v2402_v10 }
 0x763   : > { %v2752_v9 = vpop.eup %2751 }
 0x764   : > { %1882 = vrot.lane.b32.xlu0 %v2752_v9, %s3283_s23 }
 0x765   : > { %v2754_v37 = vpop.eup %2753 }
 0x766   : > { %v1859_v50 = vadd.f32 1.0, %v2754_v37 }
 0x768   : > { %2755 = vrcp.f32 %v1859_v50  ;;  %v1871_v14 = vand.u32 2147483648, %v1859_v50  ;;  %vm1865_vm2 = vweird.f32 %v1859_v50  ;;  %v1869_v52 = vand.u32 2147483647, %v1859_v50 }
 0x76a   : > { %v1872_v12 = vor.u32 1.1754944e-38, %v1871_v14  ;;  %vm1870_vm4 = vcmp.eq.f32.partialorder %v1869_v52, 8.507059e+37 }
 0x76e   : > { %v2756_v18 = vpop.eup %2755 }
 0x76f   : > { %v1861_v7 = vmul.f32 %v2756_v18, %v1859_v50  ;;  %vm1866_vm0 = vweird.f32 %v2756_v18 }
 0x770   : > { %vm1867_vm3 = vmor %vm1865_vm2, %vm1866_vm0 }
 0x771   : > { %v1862_v53 = vsub.f32 1.0, %v1861_v7 }
 0x773   : > { %v1863_v58 = vmul.f32 %v2756_v18, %v1862_v53 }
 0x775   : > { %v1864_v27 = vadd.f32 %v2756_v18, %v1863_v58 }
 0x777   : > { %v1868_v23 = vsel %vm1867_vm3, %v2756_v18, %v1864_v27 }
 0x778   : > { %v1873_v59 = vsel %vm1870_vm4, %v1872_v12, %v1868_v23 }
 0x779   : > { %v1880_v28 = vmul.f32 %v1878_v36, %v1873_v59 }
 0x7d6   : > { %v1883_v31 = vpop.permute.xlu0 %1882 }
 0x7d7   : > { %v1885_v32 = vmul.f32 %v1883_v31, %v1873_v59 }
 0x7d9   : > { %1887 = vrot.lane.b32.xlu1 %v1885_v32, %s3284_s0 }
 0x84b   : > { %v1888_v0 = vpop.permute.xlu1 %1887 }
 0x84c   : > { %v1890_v11 = vadd.f32 %v1888_v0, %v1880_v28 }
 0x84e   : > { %2757 = vtanh.f32 %v1890_v11 }
 0x854   : > { %v2758_v13 = vpop.eup %2757 }
 0x855   : > { %1893 = vrot.lane.b32.xlu0 %v2758_v13, %s3283_s23  ;;  %s1979_s23 = scalar_lea.hbm %s4253_s14, %s4053_s10 }
 0x856   : > { %s1982_s2 = sshll.u32 %s1979_s23, 4  ;;  %s1983_s2 = int_to_ptr.hbm [resolvable:$true] %s1982_s2 }
 0x857   : > { %s3133_s15 = sshra.s32 %s1983_s2, 4  ;;  %s3134_s15 = int_to_ptr.hbm [resolvable:$true] %s3133_s15 }
 0x858   : > { %s3135_s16 = scalar_lea.hbm %s3134_s15, 16  ;;  %p3140_p10 = scmp.lt.s32.totalorder %s3134_s15, %s4253_s14 }
 0x859   : > { %p3136_p6 = scmp.ne.s32.totalorder %s3134_s15, %s3135_s16  ;;  %p3141_p3 = scmp.lt.s32.totalorder %s3139_s19, %s3135_s16 }
 0x85b   : > { %p3137_p9 = pnand %p3136_p6, %p3469_p13  ;;  %p3142_p7 = por %p3141_p3, %p3140_p10 }
 0x85d   : > { %1898 = vrot.lane.b32.xlu0 %v3715_v55, %s3284_s0  ;;  %v1927_v55 = vshrl.u32 %v1283_v56, 7  ;;  %p3138_p5 = pneg %p3137_p9 }
 0x85f   : > { %v1928_v33 = vand.u32 1, %v1927_v55  ;;  %p3143_p8 = pnand %p3142_p7, %p3138_p5 }
 0x861   : > { %vm1929_vm5 = vcmp.eq.s32.totalorder %v1928_v33, 0 }
 0x865   : > { %1914 = vrot.lane.b32.xlu0 %v1890_v11, %s3286_s3 }
 0x8c7   : > { %v1894_v15 = vpop.permute.xlu0 %1893 }
 0x8c8   : > { %v1896_v17 = vmul.f32 %v1894_v15, %v1873_v59 }
 0x8ca   : > { %v1919_v51 = vmax.f32 %v1896_v17, 0.0 }
 0x8cc   : > { %1921 = vrot.lane.b32.xlu2 %v1919_v51, %s3284_s0 }
 0x8cf   : > { %v1899_v16 = vpop.permute.xlu0 %1898 }
 0x8d0   : > { %1901 = vst.msk [vmem:[%s881_s12] sm:$0xff] %vm974_vm1, %v1899_v16 }
 0x8d4   : > { %1903 = vrot.lane.b32.xlu2 %v1896_v17, %s3284_s0 }
 0x8d7   : > { %v1915_v3 = vpop.permute.xlu0 %1914 }
 0x8d8   : > { %2404 = vst.msk [vmem:[%s4045_s18 + $0x8] sm:$0xff] %vm974_vm1, %v1915_v3 }
 0x926   : > { %v1922_v19 = vpop.permute.xlu2 %1921 }
 0x927   : > { %v1924_v20 = vrot.slane %v1922_v19, 7  ;;  %v1925_v22 = vrot.slane %v1922_v19, 1 }
 0x929   : > { %v1932_v25 = vsel %vm1929_vm5, %v1925_v22, %v1924_v20 }
 0x92a   : > { %v1933_v38 = vmul.f32 0.5, %v1932_v25 }
 0x92c   : > { %1935 = vrot.lane.b32.xlu1 %v1933_v38, %s3286_s3 }
 0x92e   : > { %v1904_v54 = vpop.permute.xlu2 %1903 }
 0x92f   : > { %2403 = vst.msk [vmem:[%s881_s12 + $0x8] sm:$0xff] %vm974_vm1, %v1904_v54 }
 0x934   : > { %1909 = vrot.lane.b32.xlu1 %v3711_v48, %s3286_s3 }
 0x935   : > { %3146 = shalt.err (!%p3143_p8)
}
 0x936   : > { %s3287_s17 = smov 128   ;;  %s3288_s3 = smov 512  }
 0x937   : > { %s3289_s12 = smov 8   ;;  %s4254_s23 = sld [smem:[#allocation61_spill]] }
 0x938   : > { %2550 = dma.vmem_to_hbm [thread:$0]  (%p3469_p13), %s1981_s26, 256, %s1983_s2, %s1950_s21, %s3287_s17, %s3288_s3, %s3289_s12  }
 0x939   : > { %s1996_s16 = sshll.u32 %s4045_s18, 4  ;;  %s1997_s16 = int_to_ptr.vmem [resolvable:$true] %s1996_s16 }
 0x93d   : > { %s1995_s15 = scalar_lea.hbm %s4254_s23, %s4053_s10  ;;  %s3167_s7 = scalar_lea.hbm %s4254_s23, 64 }
 0x93e   : > { %s1998_s1 = sshll.u32 %s1995_s15, 4  ;;  %s1999_s1 = int_to_ptr.hbm [resolvable:$true] %s1998_s1 }
 0x93f   : > { %s3161_s29 = sshra.s32 %s1999_s1, 4  ;;  %s3162_s29 = int_to_ptr.hbm [resolvable:$true] %s3161_s29 }
 0x940   : > { %s3163_s19 = scalar_lea.hbm %s3162_s29, 16  ;;  %p3168_p12 = scmp.lt.s32.totalorder %s3162_s29, %s4254_s23 }
 0x941   : > { %p3164_p11 = scmp.ne.s32.totalorder %s3162_s29, %s3163_s19  ;;  %p3169_p1 = scmp.lt.s32.totalorder %s3167_s7, %s3163_s19 }
 0x943   : > { %p3165_p0 = pnand %p3164_p11, %p3469_p13  ;;  %p3170_p6 = por %p3169_p1, %p3168_p12 }
 0x945   : > { %p3166_p2 = pneg %p3165_p0 }
 0x947   : > { %p3171_p9 = pnand %p3170_p6, %p3166_p2 }
 0x99e   : > { %v1936_v48 = vpop.permute.xlu1 %1935 }
 0x99f   : > { %v1938_v56 = vadd.f32 %v1936_v48, %v1896_v17 }
 0x9a1   : > { %1940 = vrot.lane.b32.xlu2 %v1938_v56, %s3284_s0 }
 0x9a6   : > { %v1910_v26 = vpop.permute.xlu1 %1909 }
 0x9a7   : > { %1912 = vst.msk [vmem:[%s4045_s18] sm:$0xff] %vm974_vm1, %v1910_v26 }
 0x9a8   : > { %3174 = shalt.err (!%p3171_p9)
}
 0x9a9   : > { %2551 = dma.vmem_to_hbm [thread:$0]  (%p3469_p13), %s1997_s16, 256, %s1999_s1, %s1950_s21, %s3287_s17, %s3288_s3, %s3289_s12  }
 0x9aa   : > { %s4255_s30 = sld [smem:[#allocation59_spill]]  ;;  %s874_s29 = scalar_lea.vmem [#allocation22], %s2313_s27 }
 0x9ab   : > { %s1967_s19 = sshll.u32 %s874_s29, 4  ;;  %s1945_s7 = scalar_lea.sflag [#allocation4], %s3646_s25  ;;  %s1968_s19 = int_to_ptr.vmem [resolvable:$true] %s1967_s19 }
 0x9b0   : > { %s4256_s15 = smov %s4255_s30  ;;  %s1965_s26 = scalar_lea.hbm %s4255_s30, %s4053_s10 }
 0x9b1   : > { %s1969_s2 = sshll.u32 %s1965_s26, 4  ;;  %s3195_s10 = scalar_lea.hbm %s4256_s15, 32  ;;  %s1970_s2 = int_to_ptr.hbm [resolvable:$true] %s1969_s2 }
 0x9b2   : > { %s3189_s24 = sshra.s32 %s1970_s2, 4  ;;  %s3190_s24 = int_to_ptr.hbm [resolvable:$true] %s3189_s24 }
 0x9b3   : > { %s3191_s22 = scalar_lea.hbm %s3190_s24, 8  ;;  %p3196_p7 = scmp.lt.s32.totalorder %s3190_s24, %s4256_s15 }
 0x9b4   : > { %p3192_p5 = scmp.ne.s32.totalorder %s3190_s24, %s3191_s22  ;;  %p3197_p8 = scmp.lt.s32.totalorder %s3195_s10, %s3191_s22 }
 0x9b6   : > { %p3193_p10 = pnand %p3192_p5, %p3469_p13  ;;  %p3198_p11 = por %p3197_p8, %p3196_p7 }
 0x9b8   : > { %p3194_p3 = pneg %p3193_p10 }
 0x9ba   : > { %p3199_p0 = pnand %p3198_p11, %p3194_p3 }
 0x9fb   : > { %v1941_v24 = vpop.permute.xlu2 %1940 }
 0x9fc   : > { %1943 = vst.msk [vmem:[%s874_s29] sm:$0xff] %vm974_vm1, %v1941_v24 }
 0x9fd   : > { %3202 = shalt.err (!%p3199_p0)
}
 0x9fe   : > { %2549 = dma.vmem_to_hbm [thread:$0]  (%p3469_p13), %s1968_s19, 128, %s1970_s2, %s1945_s7  }
 0x9ff PF: > { %s4257_s25 = sld [smem:[#allocation38_spill]] }
 0xa00   : > { %s4258_s12 = sld [smem:[#allocation35_spill]] }
 0xa05   : > { %p2618_p2 = scmp.ge.s32.totalorder %s4257_s25, 2 }
 0xa06   : > { %s2013_s1 = sand.u32 1, %s4258_s12  }
 0xa07   : > { %p2594_p12 = pnand %p2618_p2, %p3479_p4  ;;  %s2014_s0 = scalar_lea.sflag [#allocation4], %s2013_s1 }
 0xa09   : > { %p2595_p1 = pneg %p2594_p12 }
 0xa0b   : > { %3248 = dma.done.wait (%p2595_p1), %s2014_s0, 128  }
 0xa0c   : > { %3250 = vsyncadd (%p2595_p1), %s2014_s0, 4294967168  ;;  %s4260_s18 = sadd.s32 4294967294, %s4257_s25  }
 0xa0d   : > { %s2023_s28 = sand.u32 1, %s4260_s18  }
 0xa0e   : > { %s2024_s30 = scalar_lea.sflag [#allocation24], %s2023_s28 }
 0xa0f   : > { %3252 = dma.done.wait (%p2595_p1), %s2024_s30, 512  }
 0xa10   : > { %3254 = vsyncadd (%p2595_p1), %s2024_s30, 4294966784  ;;  %s4261_s30 = sld [smem:[#allocation41_spill]] }
 0xa11   : > { %s4262_s27 = sld [smem:[#allocation36_spill]] }
 0xa12   : > { %s4263_s28 = sld [smem:[#allocation37_spill]] }
 0xa13   : > { %s4264_s29 = sld [smem:[#allocation42_spill]] }
 0xa16   : > { %p45_p13 = scmp.ge.s32.totalorder %s4261_s30, 6  }
 0xa18   :  { %47 = sbr.rel (!%p45_p13) target bundleno = 31 (0x1f), region = 241 }
 0xa1d   :  { %2040 = vsyncpa [#allocation3], 1 }
 0xa1e   :  { %2042 = vsyncpa [#allocation3 + $0x1], 1 }
 0xa1f   :  { %2043 = vsyncpa [#allocation6], 1 }
 0xa20   :  { %2045 = vsyncpa [#allocation6 + $0x1], 1 }
 0xa21   :  { %2046 = vsyncpa [#allocation9], 1 }
 0xa22   :  { %2048 = vsyncpa [#allocation9 + $0x1], 1 }
 0xa23   :  { %2049 = vsyncpa [#allocation12], 1 }
 0xa24   :  { %2050 = vsyncpa [#allocation15], 1 }
 0xa25   :  { %2051 = vsyncpa [#allocation18], 1 }
 0xa26   :  { %2052 = vsyncpa [#allocation21], 1 }
 0xa27   :  { %2053 = vsyncpa [#allocation4], 1 }
 0xa28   :  { %2055 = vsyncpa [#allocation4 + $0x1], 1 }
 0xa29   :  { %2056 = vsyncpa [#allocation24], 1 }
 0xa2a   :  { %2058 = vsyncpa [#allocation24 + $0x1], 1 }

// kernel: tpu_custom_call.1
= control target key start
LH: loop header
LB: loop body
LE: loop exit
PB: predicated region body
PF: predicated region fallthrough
CT: control target
= control target key end

     0   :  { %s4133_s0 = inlined_call_operand.hbm [shape: f32[32,72], index: 0, kind: input, shape index: {}]   ;;  %s4134_s1 = inlined_call_operand.hbm [shape: bf16[32,16,32], index: 1, kind: input, shape index: {}]   ;;  %s4135_s2 = inlined_call_operand.hbm [shape: bf16[32,16,32], index: 2, kind: input, shape index: {}]   ;;  %s4136_s3 = inlined_call_operand.hbm [shape: f32[2,32,32], index: 3, kind: input, shape index: {}]   ;;  %s4137_s4 = inlined_call_operand.hbm [shape: f32[2,32,32], index: 4, kind: input, shape index: {}]   ;;  %s4138_s5 = inlined_call_operand.hbm [shape: bf16[32,128], index: 5, kind: input, shape index: {}]   ;;  %s4139_s6 = inlined_call_operand.hbm [shape: bf16[72,128], index: 6, kind: input, shape index: {}]   ;;  %s4140_s7 = inlined_call_operand.hbm [shape: bf16[32,128], index: 7, kind: input, shape index: {}]   ;;  %s4141_s8 = inlined_call_operand.vmem [shape: f32[1,128], index: 8, kind: input, shape index: {}]   ;;  %s4142_s9 = inlined_call_operand.hbm [shape: bf16[32,128], index: 9, kind: input, shape index: {}]   ;;  %s4143_s10 = inlined_call_operand.hbm [shape: bf16[32,128], index: 10, kind: input, shape index: {}]   ;;  %s4144_s11 = inlined_call_operand.hbm [shape: bf16[32,128], index: 11, kind: input, shape index: {}]   ;;  %s4145_s12 = inlined_call_operand.vmem [shape: f32[1,128], index: 12, kind: input, shape index: {}]   ;;  %s4146_s13 = inlined_call_operand.hbm [shape: bf16[32,32], index: 13, kind: input, shape index: {}]   ;;  %s4147_s14 = inlined_call_operand.vmem [shape: f32[1,32], index: 14, kind: input, shape index: {}]   ;;  %s4148_s15 = inlined_call_operand.vmem [shape: f32[1,1,32], index: 15, kind: input, shape index: {}]   ;;  %s4149_s16 = inlined_call_operand.hbm [shape: f32[32,32], index: 16, kind: output, shape index: {0}]   ;;  %s4150_s17 = inlined_call_operand.hbm [shape: f32[2,32,32], index: 17, kind: output, shape index: {1}]   ;;  %s4151_s18 = inlined_call_operand.hbm [shape: f32[2,32,32], index: 18, kind: output, shape index: {2}]  }
   0x1   :  { %4185 = sst [smem:[#allocation47_spill]] %s4133_s0 }
   0x2   :  { %4186 = sst [smem:[#allocation48_spill]] %s4134_s1 }
   0x3   :  { %4187 = sst [smem:[#allocation49_spill]] %s4135_s2 }
   0x4   :  { %4188 = sst [smem:[#allocation50_spill]] %s4136_s3 }
   0x5   :  { %4189 = sst [smem:[#allocation51_spill]] %s4137_s4 }
   0x6   :  { %4190 = sst [smem:[#allocation52_spill]] %s4138_s5 }
   0x7   :  { %4191 = sst [smem:[#allocation53_spill]] %s4140_s7 }
   0x8   :  { %4192 = sst [smem:[#allocation54_spill]] %s4141_s8 }
   0x9   :  { %4193 = sst [smem:[#allocation55_spill]] %s4143_s10 }
   0xa   :  { %4194 = sst [smem:[#allocation56_spill]] %s4145_s12 }
   0xb   :  { %4195 = sst [smem:[#allocation57_spill]] %s4147_s14 }
   0xc   :  { %4196 = sst [smem:[#allocation58_spill]] %s4148_s15 }
   0xd   :  { %4197 = sst [smem:[#allocation59_spill]] %s4149_s16 }
   0xe   :  { %4198 = sst [smem:[#allocation60_spill]] %s4150_s17 }
   0xf   :  { %4199 = sst [smem:[#allocation61_spill]] %s4151_s18 }
  0x10   :  { %24 = vsyncpa [#allocation3], 0 }
  0x11   :  { %26 = vsyncpa [#allocation3 + $0x1], 0 }
  0x12   :  { %27 = vsyncpa [#allocation6], 0 }
  0x13   :  { %29 = vsyncpa [#allocation6 + $0x1], 0 }
  0x14   :  { %30 = vsyncpa [#allocation9], 0 }
  0x15   :  { %32 = vsyncpa [#allocation9 + $0x1], 0 }
  0x16   :  { %33 = vsyncpa [#allocation12], 0 }
  0x17   :  { %34 = vsyncpa [#allocation15], 0 }
  0x18   :  { %35 = vsyncpa [#allocation18], 0 }
  0x19   :  { %36 = vsyncpa [#allocation21], 0 }
  0x1a   :  { %37 = vsyncpa [#allocation4], 0 }
  0x1b   :  { %39 = vsyncpa [#allocation4 + $0x1], 0 }
  0x1c   :  { %40 = vsyncpa [#allocation24], 0 }
  0x1d   :  { %42 = vsyncpa [#allocation24 + $0x1], 0  ;;  %s3385_s27 = smov 0   ;;  %s3387_s28 = smov 0  }
  0x1e   :  { %s3389_s29 = smov 0   ;;  %s3391_s30 = smov 0  }
  0x1f LB: > { %4200 = sst [smem:[#allocation35_spill]] %s3257_s27  ;;  %s3409_s20 = sadd.s32 4294967295, %s3269_s30   ;;  %s3269_s30 = sphi %s3391_s30, %s4261_s30   ;;  %s3265_s29 = sphi %s3389_s29, %s4264_s29   ;;  %s3261_s28 = sphi %s3387_s28, %s4263_s28   ;;  %s3257_s27 = sphi %s3385_s27, %s4262_s27  }
  0x20   : > { %4201 = sst [smem:[#allocation36_spill]] %s3261_s28  ;;  %p2289_p0 = scmp.ge.s32.totalorder %s3269_s30, 1 }
  0x21   : > { %4202 = sst [smem:[#allocation37_spill]] %s3265_s29  ;;  %p4170_p1 = scmp.eq.s32.totalorder %s3409_s20, 0 }
  0x22   : > { %4203 = sst [smem:[#allocation38_spill]] %s3269_s30  ;;  %p492_p2 = scmp.lt.s32.totalorder %s3269_s30, 5 }
  0x23   : > { %s4204_s5 = sld [smem:[#allocation52_spill]]  ;;  %s3271_s22 = smov [#allocation11]  }
  0x24   : > { %4205 = sst [smem:[#allocation39_spill]] %s3409_s20  ;;  %p3414_p3 = pnand %p2289_p0, %p492_p2 }
  0x25   : > { %s505_s2 = sshll.u32 %s3271_s22, 4  ;;  %s4208_s7 = sld [smem:[#allocation53_spill]]  ;;  %s506_s2 = int_to_ptr.vmem [resolvable:$true] %s505_s2 }
  0x26   : > { %s4206_s21 = scalar_select %p3414_p3, 1, 0 }
  0x27   : > { %p2555_p4 = pneg %p3414_p3  ;;  %s4210_s10 = sld [smem:[#allocation55_spill]] }
  0x28   : > { %4207 = sst [smem:[#allocation40_spill]] %s4206_s21  ;;  %s4155_s24 = smov 64  }
  0x29   : > { %s503_s1 = sshll.u32 %s4204_s5, 4  ;;  %p3425_p5 = pnand %p2555_p4, %p4170_p1  ;;  %s504_s1 = int_to_ptr.hbm [resolvable:$true] %s503_s1 }
  0x2a   : > { %s3272_s5 = smov [#allocation14]   ;;  %s55_s19 = sadd.s32 1, %s3265_s29 }
  0x2b   : > { %s531_s25 = sshll.u32 %s4208_s7, 4  ;;  %s533_s23 = sshll.u32 %s3272_s5, 4  ;;  %s532_s25 = int_to_ptr.hbm [resolvable:$true] %s531_s25  ;;  %s534_s23 = int_to_ptr.vmem [resolvable:$true] %s533_s23 }
  0x2c   : > { %s4157_s7 = smov 4   ;;  %s3275_s5 = smov [#allocation17]  }
  0x2d   : > { %s562_s22 = sshll.u32 %s4210_s10, 4  ;;  %s564_s0 = sshll.u32 %s3275_s5, 4  ;;  %s563_s22 = int_to_ptr.hbm [resolvable:$true] %s562_s22  ;;  %s565_s0 = int_to_ptr.vmem [resolvable:$true] %s564_s0 }
  0x2e   : > { %2558 = dma.hbm_to_vmem [thread:$0]  (!%p3425_p5), %s504_s1, 256, %s506_s2, [#allocation12], %s4155_s24, %s4155_s24, %s4157_s7  }
  0x2f   : > { %2564 = dma.hbm_to_vmem [thread:$0]  (!%p3425_p5), %s532_s25, 256, %s534_s23, [#allocation15], %s4155_s24, %s4155_s24, %s4157_s7  }
  0x30   : > { %2570 = dma.hbm_to_vmem [thread:$0]  (!%p3425_p5), %s563_s22, 256, %s565_s0, [#allocation18], %s4155_s24, %s4155_s24, %s4157_s7  }
  0x31   : > { %s4163_s1 = sadd.s32 4294967294, %s3269_s30   ;;  %s3449_s2 = sadd.s32 1, %s3269_s30  }
  0x32   : > { %4211 = sst [smem:[#allocation41_spill]] %s3449_s2  ;;  %s52_s10 = ssub.s32 %s3269_s30, %s3449_s2 }
  0x33   : > { %p62_p6 = scmp.ne.s32.totalorder %s3265_s29, %s3261_s28  ;;  %p53_p7 = scmp.eq.s32.totalorder %s52_s10, 0 }
  0x34   : > { %p63_p8 = scmp.eq.s32.totalorder %s3269_s30, 0  ;;  %p68_p9 = scmp.ne.s32.totalorder %s3261_s28, %s3257_s27 }
  0x35   : > { %p427_p10 = scmp.eq.s32.totalorder %s3409_s20, 3  ;;  %p433_p0 = scmp.eq.s32.totalorder %s4163_s1, 3 }
  0x36   : > { %s3461_s25 = scalar_select %p53_p7, %s3265_s29, %s55_s19  }
  0x37   : > { %p64_p11 = por %p63_p8, %p62_p6  ;;  %p3465_p12 = por %p4170_p1, %p68_p9 }
  0x38   : > { %4212 = sst [smem:[#allocation42_spill]] %s3461_s25  ;;  %p3469_p13 = por %p427_p10, %p62_p6 }
  0x39   : > { %s4213_s22 = scalar_select %p3465_p12, 1, 0 }
  0x3a   : > { %s4215_s23 = scalar_select %p3469_p13, 1, 0 }
  0x3b   : > { %4214 = sst [smem:[#allocation43_spill]] %s4213_s22  ;;  %p2610_p2 = scmp.lt.s32.totalorder %s3269_s30, 4 }
  0x3c   : > { %4216 = sst [smem:[#allocation44_spill]] %s4215_s23  ;;  %s3477_s10 = sand.u32 1, %s3265_s29  }
  0x3d   : > { %p3479_p4 = por %p433_p0, %p68_p9  ;;  %s4171_s0 = sand.u32 1, %s3269_s30  }
  0x3e   : > { %p3484_p7 = pnand %p2610_p2, %p64_p11  ;;  %s2300_s24 = sshll.u32 %s3477_s10, 6 }
  0x3f   : > { %s4217_s5 = scalar_select %p3479_p4, 1, 0 }
  0x40   : > { %s2414_s7 = sshll.u32 %s3269_s30, 6  ;;  %s4220_s27 = sld [smem:[#allocation48_spill]] }
  0x41   : > { %4218 = sst [smem:[#allocation45_spill]] %s4217_s5  ;;  %s638_s18 = scalar_lea.vmem [#allocation5], %s2300_s24 }
  0x42   : > { %s647_s29 = sshll.u32 %s638_s18, 4  ;;  %s3495_s23 = scalar_lea.sflag [#allocation6], %s4171_s0  ;;  %s648_s29 = int_to_ptr.vmem [resolvable:$true] %s647_s29 }
  0x43   : > { %p3499_p8 = pneg %p3484_p7 }
  0x46   : > { %s4221_s16 = smov %s4220_s27  ;;  %s644_s1 = scalar_lea.hbm %s4220_s27, %s2414_s7 }
  0x47   : > { %s645_s17 = sshll.u32 %s644_s1, 4  ;;  %s2856_s1 = scalar_lea.hbm %s4221_s16, 256  ;;  %s646_s17 = int_to_ptr.hbm [resolvable:$true] %s645_s17 }
  0x48   : > { %s2849_s5 = sshra.s32 %s646_s17, 4  ;;  %s2850_s5 = int_to_ptr.hbm [resolvable:$true] %s2849_s5 }
  0x49   : > { %s2851_s12 = scalar_lea.hbm %s2850_s5, 64  ;;  %p2857_p11 = scmp.lt.s32.totalorder %s2850_s5, %s4221_s16 }
  0x4a   : > { %p2852_p6 = scmp.ne.s32.totalorder %s2850_s5, %s2851_s12  ;;  %p2858_p0 = scmp.lt.s32.totalorder %s2856_s1, %s2851_s12 }
  0x4c   : > { %p2854_p9 = pnand %p3499_p8, %p2852_p6  ;;  %p2859_p2 = por %p2858_p0, %p2857_p11 }
  0x4e   : > { %p2855_p10 = pneg %p2854_p9 }
  0x50   : > { %p2860_p1 = pnand %p2859_p2, %p2855_p10 }
  0x52   : > { %2863 = shalt.err (!%p2860_p1)
}
  0x53   : > { %s4223_s0 = smov 4   ;;  %s4224_s14 = smov 64  }
  0x54   : > { %2583 = dma.hbm_to_vmem [thread:$0]  (!%p3484_p7), %s646_s17, 1024, %s648_s29, %s3495_s23, %s4224_s14, %s4224_s14, %s4223_s0  }
  0x55   : > { %s4225_s8 = sld [smem:[#allocation49_spill]]  ;;  %s661_s12 = scalar_lea.vmem [#allocation7], %s2300_s24 }
  0x56   : > { %s670_s5 = sshll.u32 %s661_s12, 4  ;;  %s3526_s2 = sshll.u32 %s3269_s30, 3  ;;  %s3523_s5 = int_to_ptr.vmem [resolvable:$true] %s670_s5 }
  0x57   : > { %4226 = sst [smem:[#allocation46_spill]] %s3523_s5  ;;  %s2308_s25 = sshll.u32 %s3477_s10, 4 }
  0x58   : > { %s4227_s3 = sld [smem:[#allocation50_spill]]  ;;  %s684_s28 = scalar_lea.vmem [#allocation8], %s2308_s25 }
  0x59   : > { %s691_s18 = sshll.u32 %s684_s28, 4  ;;  %s692_s18 = int_to_ptr.vmem [resolvable:$true] %s691_s18 }
  0x5b   : > { %s3520_s20 = scalar_lea.hbm %s4225_s8, %s2414_s7  ;;  %s4228_s7 = sand.u32 1, %s3269_s30  }
  0x5c   : > { %s3535_s24 = scalar_lea.sflag [#allocation9], %s4228_s7 }
  0x5e   : > { %s688_s17 = scalar_lea.hbm %s4227_s3, %s3526_s2  ;;  %s2886_s16 = scalar_lea.hbm %s4227_s3, 64 }
  0x5f   : > { %s689_s29 = sshll.u32 %s688_s17, 4  ;;  %s690_s29 = int_to_ptr.hbm [resolvable:$true] %s689_s29 }
  0x60   : > { %s2879_s27 = sshra.s32 %s690_s29, 4  ;;  %s2880_s27 = int_to_ptr.hbm [resolvable:$true] %s2879_s27 }
  0x61   : > { %s2881_s12 = scalar_lea.hbm %s2880_s27, 16  ;;  %p2887_p10 = scmp.lt.s32.totalorder %s2880_s27, %s4227_s3 }
  0x62   : > { %p2882_p1 = scmp.ne.s32.totalorder %s2880_s27, %s2881_s12  ;;  %p2888_p11 = scmp.lt.s32.totalorder %s2886_s16, %s2881_s12 }
  0x64   : > { %p2884_p6 = pnand %p2882_p1, %p3499_p8  ;;  %p2889_p0 = por %p2888_p11, %p2887_p10 }
  0x66   : > { %p2885_p9 = pneg %p2884_p6 }
  0x68   : > { %p2890_p2 = pnand %p2889_p0, %p2885_p9 }
  0x6a   : > { %2893 = shalt.err (!%p2890_p2)
}
  0x6b   : > { %s4182_s28 = smov 512   ;;  %s4183_s7 = smov 128  }
  0x6c   : > { %s4184_s30 = smov 8   ;;  %s4229_s21 = sshll.u32 %s3520_s20, 4  ;;  %s3553_s21 = int_to_ptr.hbm [resolvable:$true] %s4229_s21 }
  0x6d   : > { %2589 = dma.hbm_to_vmem [thread:$0]  (!%p3484_p7), %s690_s29, 256, %s692_s18, %s3535_s24, %s4182_s28, %s4183_s7, %s4184_s30  }
  0x6e   : > { %s517_s12 = sshll.u32 %s4139_s6, 4  ;;  %s3558_s16 = scalar_lea.vmem [#allocation10], %s2308_s25  ;;  %s518_s12 = int_to_ptr.hbm [resolvable:$true] %s517_s12 }
  0x6f   : > { %s712_s22 = sshll.u32 %s3558_s16, 4  ;;  %s548_s4 = sshll.u32 %s4142_s9, 4  ;;  %s549_s4 = int_to_ptr.hbm [resolvable:$true] %s548_s4  ;;  %s713_s22 = int_to_ptr.vmem [resolvable:$true] %s712_s22 }
  0x70   : > { %s3279_s5 = smov [#allocation13]   ;;  %s3280_s20 = smov [#allocation16]  }
  0x71   : > { %s519_s29 = sshll.u32 %s3279_s5, 4  ;;  %s550_s25 = sshll.u32 %s3280_s20, 4  ;;  %s520_s29 = int_to_ptr.vmem [resolvable:$true] %s519_s29  ;;  %s551_s25 = int_to_ptr.vmem [resolvable:$true] %s550_s25 }
  0x72   : > { %2561 = dma.hbm_to_vmem [thread:$0]  (!%p3425_p5), %s518_s12, 576, %s520_s29, [#allocation12], %s4224_s14, %s4224_s14, %s4223_s0  }
  0x73   : > { %s576_s3 = sshll.u32 %s4144_s11, 4  ;;  %s593_s12 = sshll.u32 %s4146_s13, 4  ;;  %s577_s3 = int_to_ptr.hbm [resolvable:$true] %s576_s3  ;;  %s594_s12 = int_to_ptr.hbm [resolvable:$true] %s593_s12 }
  0x74   : > { %2567 = dma.hbm_to_vmem [thread:$0]  (!%p3425_p5), %s549_s4, 256, %s551_s25, [#allocation15], %s4224_s14, %s4224_s14, %s4223_s0  }
  0x75   : > { %s3281_s17 = smov [#allocation19]   ;;  %s3282_s20 = smov [#allocation20]  }
  0x76   : > { %s578_s29 = sshll.u32 %s3281_s17, 4  ;;  %s595_s18 = sshll.u32 %s3282_s20, 4  ;;  %s579_s29 = int_to_ptr.vmem [resolvable:$true] %s578_s29  ;;  %s596_s18 = int_to_ptr.vmem [resolvable:$true] %s595_s18 }
  0x77   : > { %2573 = dma.hbm_to_vmem [thread:$0]  (!%p3425_p5), %s577_s3, 256, %s579_s29, [#allocation18], %s4224_s14, %s4224_s14, %s4223_s0  }
  0x78   : > { %s2298_s1 = sshll.u32 %s3477_s10, 3  ;;  %s4230_s5 = sld [smem:[#allocation47_spill]] }
  0x79   : > { %2576 = dma.hbm_to_vmem [thread:$0]  (!%p3425_p5), %s594_s12, 256, %s596_s18, [#allocation21], %s4224_s14, %s4224_s14, %s4223_s0  }
  0x7a   : > { %s619_s28 = scalar_lea.vmem [#allocation2], %s2298_s1  ;;  %s616_s3 = scalar_lea.sflag [#allocation3], %s3477_s10 }
  0x7b   : > { %s627_s7 = sshll.u32 %s619_s28, 4  ;;  %s628_s7 = int_to_ptr.vmem [resolvable:$true] %s627_s7 }
  0x7e   : > { %s623_s27 = scalar_lea.hbm %s4230_s5, %s3526_s2  ;;  %s3036_s12 = scalar_lea.hbm %s4230_s5, 32 }
  0x7f   : > { %s625_s17 = sshll.u32 %s623_s27, 4  ;;  %s626_s17 = int_to_ptr.hbm [resolvable:$true] %s625_s17 }
  0x80   : > { %s3029_s29 = sshra.s32 %s626_s17, 4  ;;  %s3030_s29 = int_to_ptr.hbm [resolvable:$true] %s3029_s29 }
  0x81   : > { %s3031_s20 = scalar_lea.hbm %s3030_s29, 8  ;;  %p3037_p5 = scmp.lt.s32.totalorder %s3030_s29, %s4230_s5 }
  0x82   : > { %p3032_p1 = scmp.ne.s32.totalorder %s3030_s29, %s3031_s20  ;;  %p3038_p10 = scmp.lt.s32.totalorder %s3036_s12, %s3031_s20 }
  0x84   : > { %p3034_p6 = pnand %p3032_p1, %p3499_p8  ;;  %p3039_p11 = por %p3038_p10, %p3037_p5 }
  0x86   : > { %p3035_p9 = pneg %p3034_p6 }
  0x88   : > { %p3040_p0 = pnand %p3039_p11, %p3035_p9 }
  0x8a   : > { %3043 = shalt.err (!%p3040_p0)
}
  0x8b   : > { %2580 = dma.hbm_to_vmem [thread:$0]  (!%p3484_p7), %s626_s17, 128, %s628_s7, %s616_s3  }
  0x8c   : > { %s3059_s10 = sshra.s32 %s3553_s21, 4  ;;  %s3066_s25 = scalar_lea.hbm %s4225_s8, 256  ;;  %s3060_s10 = int_to_ptr.hbm [resolvable:$true] %s3059_s10 }
  0x8d   : > { %s3061_s28 = scalar_lea.hbm %s3060_s10, 64  ;;  %p3067_p9 = scmp.lt.s32.totalorder %s3060_s10, %s4225_s8 }
  0x8e   : > { %p3062_p2 = scmp.ne.s32.totalorder %s3060_s10, %s3061_s28  ;;  %p3068_p5 = scmp.lt.s32.totalorder %s3066_s25, %s3061_s28 }
  0x90   : > { %p3064_p1 = pnand %p3062_p2, %p3499_p8  ;;  %p3069_p10 = por %p3068_p5, %p3067_p9 }
  0x92   : > { %p3065_p6 = pneg %p3064_p1 }
  0x94   : > { %p3070_p11 = pnand %p3069_p10, %p3065_p6 }
  0x96   : > { %3073 = shalt.err (!%p3070_p11)
}
  0x97   : > { %s4231_s7 = sld [smem:[#allocation46_spill]] }
  0x98   : > { %s4232_s20 = sld [smem:[#allocation51_spill]] }
  0x9d   : > { %2586 = dma.hbm_to_vmem [thread:$0]  (!%p3484_p7), %s3553_s21, 1024, %s4231_s7, %s3495_s23, %s4224_s14, %s4224_s14, %s4223_s0  }
  0x9e   : > { %s709_s26 = scalar_lea.hbm %s4232_s20, %s3526_s2  ;;  %s3096_s30 = scalar_lea.hbm %s4232_s20, 64 }
  0x9f   : > { %s710_s12 = sshll.u32 %s709_s26, 4  ;;  %s711_s12 = int_to_ptr.hbm [resolvable:$true] %s710_s12 }
  0xa0   : > { %s3089_s18 = sshra.s32 %s711_s12, 4  ;;  %s3090_s18 = int_to_ptr.hbm [resolvable:$true] %s3089_s18 }
  0xa1   : > { %s3091_s4 = scalar_lea.hbm %s3090_s18, 16  ;;  %p3097_p6 = scmp.lt.s32.totalorder %s3090_s18, %s4232_s20 }
  0xa2   : > { %p3092_p0 = scmp.ne.s32.totalorder %s3090_s18, %s3091_s4  ;;  %p3098_p9 = scmp.lt.s32.totalorder %s3096_s30, %s3091_s4 }
  0xa4   : > { %p3094_p2 = pnand %p3092_p0, %p3499_p8  ;;  %p3099_p5 = por %p3098_p9, %p3097_p6 }
  0xa6   : > { %p3095_p1 = pneg %p3094_p2 }
  0xa8   : > { %p3100_p10 = pnand %p3099_p5, %p3095_p1 }
  0xaa   : > { %3103 = shalt.err (!%p3100_p10)
}
  0xab   : > { %s4233_s0 = smov 8   ;;  %s4234_s2 = smov 128  }
  0xac   : > { %s4235_s21 = smov 512   ;;  %724 = sbr.rel (%p3414_p3) target bundleno = 2559 (0x9ff), region = 84 }
  0xad   : > { %2592 = dma.hbm_to_vmem [thread:$0]  (!%p3484_p7), %s711_s12, 256, %s713_s22, %s3535_s24, %s4235_s21, %s4234_s2, %s4233_s0  }
  0xae   : > { %s4237_s16 = sld [smem:[#allocation36_spill]] (!%p3414_p3) }
  0xb4   : > { %s3646_s25 = sand.u32 1, %s4237_s16  }
  0xb5   : > { %s2313_s27 = sshll.u32 %s3646_s25, 3  ;;  %s727_s29 = scalar_lea.sflag [#allocation3], %s3646_s25 }
  0xb6   : > { %s3652_s7 = scalar_lea.vmem [#allocation2], %s2313_s27 }
  0xb7   : > { %3220 = dma.done.wait (%p3465_p12), %s727_s29, 128  }
  0xb8   : > { %3222 = vsyncadd (%p3465_p12), %s727_s29, 4294967168  ;;  %s4239_s19 = sld [smem:[#allocation39_spill]]  ;;  %s2314_s22 = sshll.u32 %s3646_s25, 6 }
  0xb9   : > { %s3663_s3 = scalar_lea.vmem [#allocation5], %s2314_s22 }
  0xbe   : > { %s3659_s24 = sand.u32 1, %s4239_s19  }
  0xbf   : > { %s737_s17 = scalar_lea.sflag [#allocation6], %s3659_s24 }
  0xc0   : > { %3224 = dma.done.wait (%p3465_p12), %s737_s17, 2048  }
  0xc1   : > { %3226 = vsyncadd (%p3465_p12), %s737_s17, 4294965248  ;;  %s3670_s26 = sshll.u32 %s3646_s25, 4  ;;  %s3672_s12 = scalar_lea.vmem [#allocation7], %s2314_s22 }
  0xc2   : > { %s757_s18 = scalar_lea.sflag [#allocation9], %s3659_s24  ;;  %s760_s4 = scalar_lea.vmem [#allocation8], %s3670_s26 }
  0xc3   : > { %3228 = dma.done.wait (%p3465_p12), %s757_s18, 512  }
  0xc4   : > { %3230 = vsyncadd (%p3465_p12), %s757_s18, 4294966784  ;;  %s770_s10 = scalar_lea.vmem [#allocation10], %s3670_s26  ;;  %p4240_p3 = scmp.eq.s32.totalorder %s4239_s19, 0 }
  0xc6   : > { %3232 = dma.done.wait (%p4240_p3), [#allocation12], 832   ;;  %p4241_p7 = pmov %p4240_p3 }
  0xc7   : > { %p4242_p8 = pmov %p4240_p3 }
  0xc8   : > { %3234 = vsyncadd (%p4241_p7), [#allocation12], 4294966464 }
  0xc9   : > { %3236 = dma.done.wait (%p4242_p8), [#allocation15], 512   ;;  %p4243_p11 = pmov %p4240_p3 }
  0xca   : > { %p4244_p0 = pmov %p4240_p3 }
  0xcb   : > { %3238 = vsyncadd (%p4243_p11), [#allocation15], 4294966784 }
  0xcc   : > { %3240 = dma.done.wait (%p4244_p0), [#allocation18], 512   ;;  %p4245_p2 = pmov %p4244_p0 }
  0xcd   : > { %p4246_p12 = pmov %p4244_p0 }
  0xce   : > { %3242 = vsyncadd (%p4245_p2), [#allocation18], 4294966784 }
  0xcf   : > { %3244 = dma.done.wait (%p4246_p12), [#allocation21], 256   ;;  %p4247_p1 = pmov %p4244_p0 }
  0xd0   : > { %v913_v0 = vld [vmem:[#allocation13 + $0x20] sm:$0xf]  ;;  %v2424_v1 = vld [vmem:[#allocation14 + $0x8] sm:$0xff]  ;;  %v2418_v3 = vld [vmem:[#allocation11 + $0x8] sm:$0xff]  ;;  %vm945_vm0 = vcmask 1043456   ;;  %vm974_vm1 = vcmask 261120  }
  0xd1   : > { %3246 = vsyncadd (%p4247_p1), [#allocation21], 4294967040  ;;  %v931_v2 = vunpack.c.l.b16 %v913_v0  ;;  %1017 = vmatpush.bf16.msra.mxu2 %v2424_v1  ;;  %v2423_v4 = vld [vmem:[#allocation14] sm:$0xff]  ;;  %984 = vmatpush.bf16.msra.mxu1 %v2418_v3  ;;  %v2417_v7 = vld [vmem:[#allocation11] sm:$0xff]  ;;  %vm941_vm2 = vcmask 588800   ;;  %s4248_s14 = sld [smem:[#allocation54_spill]] }
  0xd2   : > { %v892_v5 = vld [vmem:[%s760_s4] sm:$0xff]  ;;  %v2328_v8 = vld [vmem:[%s760_s4 + $0x8] sm:$0xff]  ;;  %s3283_s23 = smov 64   ;;  %s3284_s0 = smov 32   ;;  %vm1288_vm7 = vcmask 130112   ;;  %vm1311_vm8 = vcmask 1041409  }
  0xd3   : > { %v936_v6 = vpack.c.b16 %v931_v2, %v931_v2  ;;  %v991_v10 = vpack.c.bf16 %v892_v5, %v892_v5  ;;  %v2422_v11 = vld [vmem:[#allocation13 + $0x18] sm:$0xff]  ;;  %v3697_v12 = vpack.c.bf16 %v2328_v8, %v2328_v8  ;;  %v2421_v13 = vld [vmem:[#allocation13 + $0x10] sm:$0xff]  ;;  %v2420_v14 = vld [vmem:[#allocation13 + $0x8] sm:$0xff]  ;;  %s4249_s15 = sld [smem:[#allocation57_spill]]  ;;  %vm1313_vm9 = vcmask 1042434   ;;  %s4045_s18 = scalar_lea.vmem [#allocation25], %s3670_s26 }
  0xd4   : > { %v2419_v15 = vld [vmem:[#allocation13] sm:$0xff]  ;;  %v2426_v50 = vld [vmem:[#allocation20 + $0x8] sm:$0xff]  ;;  %v2497_v61 = vld [vmem:[%s3672_s12 + $0x8] sm:$0xff]   ;;  %s4250_s29 = sld [smem:[#allocation58_spill]]  ;;  %vm1315_vm10 = vcmask 1043459   ;;  %vm1317_vm11 = vcmask 1044484  }
  0xd5   : > { %v947_v9 = vsel %vm945_vm0, %v936_v6, 0  ;;  %1018 = vmatpush.bf16.msra.mxu2 %v2423_v4  ;;  %985 = vmatpush.bf16.msra.mxu1 %v2417_v7  ;;  %v899_v16 = vld [vmem:[%s3652_s7] sm:$0xff]  ;;  %v893_v29 = vld [vmem:[%s770_s10] sm:$0xff]  ;;  %v2439_v5 = vunpack.c.l.bf16 %v2497_v61  ;;  %vm1319_vm12 = vcmask 1045509   ;;  %vm1321_vm13 = vcmask 1046534   ;;  %s4251_s17 = sld [smem:[#allocation56_spill]] }
  0xd6   : > { %952 = vmatpush.bf16.msra.mxu0 %v947_v9  ;;  %v900_v17 = vpack.c.bf16 %v899_v16, %v899_v16  ;;  %v2430_v51 = vld [vmem:[#allocation17 + $0x8] sm:$0xff]  ;;  %1104 = vmatpush.bf16.msra.mxu3 %v2426_v50  ;;  %v2425_v52 = vld [vmem:[#allocation20] sm:$0xff]  ;;  %vm1323_vm14 = vcmask 1047559   ;;  %vm1326_vm15 = vcmask 130048   ;;  %s1950_s21 = scalar_lea.sflag [#allocation24], %s3659_s24 }
  0xd7   : > { %v2673_v24 = vld [vmem:[%s4248_s14] ss:$0 sm:$0xff]  ;;  %v2429_v53 = vld [vmem:[#allocation17] sm:$0xff]  ;;  %v2434_v60 = vld [vmem:[%s3672_s12] sm:$0xff]   ;;  %s4253_s14 = sld [smem:[#allocation60_spill]] }
  0xd8   : > { %2364 = vmatmul.msk.bf16.vlgmr.msra.gmra.mxu2 %vm974_vm1, %v991_v10  ;;  %2355 = vmatmul.msk.bf16.vlgmr.msra.gmra.mxu1 %vm974_vm1, %v3697_v12  ;;  %v2498_v62 = vld [vmem:[%s3672_s12 + $0x10] sm:$0xff]   ;;  %v2436_v1 = vunpack.c.h.bf16 %v2434_v60  ;;  %v2435_v2 = vunpack.c.l.bf16 %v2434_v60  ;;  %v3733_v3 = vld [vmem:[%s3672_s12 + $0x18] sm:$0xff]  }
  0xd9   : > { %1762 = vmatpush.bf16.msrb.mxu1 %v2430_v51  ;;  %v2674_v59 = vld [vmem:[%s4249_s15] ss:$0 sm:$0xff]  ;;  %v2444_v6 = vunpack.c.h.bf16 %v2498_v62 }
  0xda   : > { %953 = vmatpush.bf16.msra.mxu0 %v2422_v11  ;;  %1105 = vmatpush.bf16.msra.mxu3 %v2425_v52  ;;  %v2440_v11 = vunpack.c.h.bf16 %v2497_v61 }
  0xdd   : > { %1763 = vmatpush.bf16.msrb.mxu1 %v2429_v53 }
  0xde   : > { %954 = vmatpush.bf16.msra.mxu0 %v2421_v13  ;;  %v2447_v13 = vunpack.c.l.bf16 %v3733_v3 }
  0xe2   : > { %955 = vmatpush.bf16.msra.mxu0 %v2420_v14 }
  0xe6   : > { %956 = vmatpush.bf16.msra.mxu0 %v2419_v15 }
  0xe9   : > { %2346 = vmatmul.msk.bf16.vlgmr.msra.gmra.mxu0 %vm941_vm2, %v900_v17 }
 0x155   : > { %v987_v18 = vpop.f32.mrf.mxu1 }
 0x15b   : > { %v1020_v19 = vpop.f32.mrf.mxu2 }
 0x15d   : > { %v989_v20 = vpop.f32.mrf.mxu1 }
 0x163   : > { %v1022_v21 = vpop.f32.mrf.mxu2 }
 0x166   : > { %v958_v22 = vpop.f32.mrf.mxu0 }
 0x167   : > { %v988_v23 = vadd.f32 %v987_v18, %v958_v22 }
 0x169   : > { %v1024_v25 = vadd.f32 %v1020_v19, %v988_v23 }
 0x16b   : > { %v1029_v26 = vadd.f32 %v2673_v24, %v1024_v25  ;;  %v2500_v24 = vld [vmem:[%s3672_s12 + $0x20] sm:$0xff]  }
 0x16d   : > { %2677 = vtanh.f32 %v1029_v26  ;;  %v2365_v30 = vmul.f32 -1.442695, %v1029_v26  ;;  %v3745_v26 = vld [vmem:[%s4250_s29] ss:$0 sm:$0xff] }
 0x16e   : > { %v960_v27 = vpop.f32.mrf.mxu0 }
 0x16f   : > { %2679 = vpow2.f32 %v2365_v30  ;;  %v2451_v27 = vunpack.c.l.bf16 %v2500_v24 }
 0x173   : > { %v2678_v28 = vpop.eup %2677 }
 0x174   : > { %1056 = vrot.lane.b32.xlu0 %v2678_v28, %s3283_s23 }
 0x175   : > { %v2680_v31 = vpop.eup %2679 }
 0x176   : > { %v1033_v32 = vadd.f32 1.0, %v2680_v31  ;;  %v2452_v31 = vunpack.c.h.bf16 %v2500_v24 }
 0x178   : > { %2681 = vrcp.f32 %v1033_v32  ;;  %v1045_v38 = vand.u32 2147483648, %v1033_v32  ;;  %vm1039_vm4 = vweird.f32 %v1033_v32  ;;  %v1043_v39 = vand.u32 2147483647, %v1033_v32 }
 0x17a   : > { %v1046_v41 = vor.u32 1.1754944e-38, %v1045_v38  ;;  %vm1044_vm6 = vcmp.eq.f32.partialorder %v1043_v39, 8.507059e+37 }
 0x17c   : > { %1051 = vrot.lane.b32.xlu0 %v893_v29, %s3284_s0  ;;  %v2443_v29 = vunpack.c.l.bf16 %v2498_v62 }
 0x17e   : > { %v2682_v33 = vpop.eup %2681 }
 0x17f   : > { %v1035_v34 = vmul.f32 %v2682_v33, %v1033_v32  ;;  %vm1040_vm3 = vweird.f32 %v2682_v33 }
 0x180   : > { %vm1041_vm5 = vmor %vm1039_vm4, %vm1040_vm3 }
 0x181   : > { %v1036_v35 = vsub.f32 1.0, %v1035_v34 }
 0x183   : > { %v1037_v36 = vmul.f32 %v2682_v33, %v1036_v35 }
 0x185   : > { %v1038_v37 = vadd.f32 %v2682_v33, %v1037_v36 }
 0x187   : > { %v1042_v40 = vsel %vm1041_vm5, %v2682_v33, %v1038_v37 }
 0x188   : > { %v1047_v43 = vsel %vm1044_vm6, %v1046_v41, %v1042_v40  ;;  %v2501_v41 = vld [vmem:[%s3672_s12 + $0x28] sm:$0xff]  }
 0x189   : > { %v2456_v51 = vunpack.c.h.bf16 %v2501_v41 }
 0x1e6   : > { %v1057_v42 = vpop.permute.xlu0 %1056 }
 0x1e7   : > { %v1059_v44 = vmul.f32 %v1057_v42, %v1047_v43 }
 0x1e9   : > { %1061 = vrot.lane.b32.xlu1 %v1059_v44, %s3284_s0 }
 0x1ee   : > { %v1052_v45 = vpop.permute.xlu0 %1051 }
 0x1ef   : > { %v1054_v46 = vmul.f32 %v1052_v45, %v1047_v43 }
 0x25b   : > { %v1062_v47 = vpop.permute.xlu1 %1061 }
 0x25c   : > { %v3711_v48 = vadd.f32 %v1062_v47, %v1054_v46 }
 0x25e   : > { %2683 = vtanh.f32 %v3711_v48 }
 0x264   : > { %v2684_v49 = vpop.eup %2683 }
 0x265   : > { %1067 = vrot.lane.b32.xlu1 %v2684_v49, %s3283_s23  ;;  %v2502_v49 = vld [vmem:[%s3672_s12 + $0x30] sm:$0xff]  }
 0x2d7   : > { %v1068_v54 = vpop.permute.xlu1 %1067 }
 0x2d8   : > { %v3715_v55 = vmul.f32 %v1068_v54, %v1047_v43  ;;  %v2448_v54 = vunpack.c.h.bf16 %v3733_v3 }
 0x2da   : > { %v1071_v56 = vpack.c.bf16 %v3715_v55, %v3715_v55 }
 0x2dc   : > { %1081 = vrot.lane.b32.xlu2 %v1071_v56, %s3284_s0 }
 0x336   : > { %v1082_v57 = vpop.permute.xlu2 %1081 }
 0x337   : > { %2374 = vmatmul.msk.bf16.vlgmr.msra.gmra.mxu3 %vm974_vm1, %v1082_v57  ;;  %2383 = vmatmul.msk.bf16.vlgmr.msrb.gmra.mxu1 %vm974_vm1, %v1082_v57  ;;  %v2459_v57 = vunpack.c.l.bf16 %v2502_v49 }
 0x3b4   : > { %v3722_v58 = vpop.f32.mrf.mxu1 }
 0x3ba   : > { %v1107_v63 = vpop.f32.mrf.mxu3 }
 0x3bb   : > { %v3730_v0 = vadd.f32 %v2674_v59, %v1107_v63 }
 0x3bc   : > { %v1767_v4 = vpop.f32.mrf.mxu1 }
 0x3bd   : > { %v1151_v7 = vperm.slane %v3730_v0, 0  ;;  %v1144_v8 = vrot.slane %v3730_v0, 1  ;;  %v1145_v9 = vrot.slane %v3730_v0, 2  ;;  %v1146_v10 = vrot.slane %v3730_v0, 3 }
 0x3be   : > { %v1147_v21 = vrot.slane %v3730_v0, 4  ;;  %v1148_v37 = vrot.slane %v3730_v0, 5  ;;  %v1149_v45 = vrot.slane %v3730_v0, 6  ;;  %v1150_v62 = vrot.slane %v3730_v0, 7 }
 0x3bf   : > { %v1168_v14 = vadd.f32 %v2436_v1, %v1151_v7  ;;  %v1167_v15 = vadd.f32 %v2435_v2, %v1151_v7  ;;  %v1152_v16 = vperm.slane %v1144_v8, 0  ;;  %v1153_v17 = vperm.slane %v1145_v9, 0  ;;  %v2503_v2 = vld [vmem:[%s3672_s12 + $0x38] sm:$0xff]   ;;  %s881_s12 = scalar_lea.vmem [#allocation23], %s3670_s26 }
 0x3c0   : > { %v1154_v18 = vperm.slane %v1146_v10, 0  ;;  %v1155_v28 = vperm.slane %v1147_v21, 0  ;;  %v1156_v52 = vperm.slane %v1148_v37, 0  ;;  %v1157_v59 = vperm.slane %v1149_v45, 0  ;;  %s1980_s26 = sshll.u32 %s881_s12, 4  ;;  %s1981_s26 = int_to_ptr.vmem [resolvable:$true] %s1980_s26 }
 0x3c1   : > { %2685 = vtanh.f32 %v1168_v14  ;;  %v1169_v19 = vadd.f32 %v2439_v5, %v1152_v16  ;;  %v1172_v20 = vadd.f32 %v2444_v6, %v1153_v17  ;;  %v1170_v23 = vadd.f32 %v2440_v11, %v1152_v16 }
 0x3c2   : > { %v1109_v22 = vpop.f32.mrf.mxu3  ;;  %2687 = vtanh.f32 %v1167_v15  ;;  %v1173_v25 = vadd.f32 %v2447_v13, %v1154_v18  ;;  %v1175_v36 = vadd.f32 %v2451_v27, %v1155_v28  ;;  %v1171_v40 = vadd.f32 %v2443_v29, %v1153_v17 }
 0x3c3   : > { %2689 = vtanh.f32 %v1169_v19  ;;  %v1176_v44 = vadd.f32 %v2452_v31, %v1155_v28  ;;  %v1178_v61 = vadd.f32 %v2456_v51, %v1156_v52  ;;  %v1174_v1 = vadd.f32 %v2448_v54, %v1154_v18 }
 0x3c4   : > { %2691 = vtanh.f32 %v1172_v20  ;;  %v1179_v6 = vadd.f32 %v2459_v57, %v1157_v59  ;;  %v2463_v9 = vunpack.c.l.bf16 %v2503_v2  ;;  %v1158_v10 = vperm.slane %v1150_v62, 0 }
 0x3c5   : > { %2693 = vtanh.f32 %v1170_v23  ;;  %v2455_v11 = vunpack.c.l.bf16 %v2501_v41  ;;  %v2464_v14 = vunpack.c.h.bf16 %v2503_v2  ;;  %v2460_v27 = vunpack.c.h.bf16 %v2502_v49 }
 0x3c6   : > { %2695 = vtanh.f32 %v1173_v25  ;;  %v1181_v16 = vadd.f32 %v2463_v9, %v1158_v10 }
 0x3c7   : > { %v2686_v30 = vpop.eup %2685  ;;  %2697 = vtanh.f32 %v1175_v36  ;;  %v1177_v18 = vadd.f32 %v2455_v11, %v1156_v52  ;;  %v1182_v21 = vadd.f32 %v2464_v14, %v1158_v10  ;;  %v1180_v31 = vadd.f32 %v2460_v27, %v1157_v59 }
 0x3c8   : > { %v2688_v32 = vpop.eup %2687  ;;  %v1204_v33 = vmul.f32 %v2686_v30, %v3745_v26  ;;  %2699 = vtanh.f32 %v1171_v40 }
 0x3c9   : > { %v2690_v34 = vpop.eup %2689  ;;  %v1203_v35 = vmul.f32 %v2688_v32, %v3745_v26  ;;  %2701 = vtanh.f32 %v1176_v44 }
 0x3ca   : > { %v1222_v38 = vsel %vm974_vm1, %v1204_v33, 0.0  ;;  %v1205_v39 = vmul.f32 %v2690_v34, %v3745_v26  ;;  %v2692_v42 = vpop.eup %2691  ;;  %2703 = vtanh.f32 %v1178_v61 }
 0x3cb   : > { %1223 = vadd.xlane.f32.xlu0 %v1222_v38  ;;  %v1219_v43 = vsel %vm974_vm1, %v1203_v35, 0.0  ;;  %v2694_v46 = vpop.eup %2693  ;;  %v1208_v53 = vmul.f32 %v2692_v42, %v3745_v26  ;;  %2705 = vtanh.f32 %v1174_v1 }
 0x3cc   : > { %1220 = vadd.xlane.f32.xlu2 %v1219_v43  ;;  %v1225_v47 = vsel %vm974_vm1, %v1205_v39, 0.0  ;;  %v2696_v50 = vpop.eup %2695  ;;  %v1206_v56 = vmul.f32 %v2694_v46, %v3745_v26  ;;  %2707 = vtanh.f32 %v1179_v6 }
 0x3cd   : > { %1226 = vadd.xlane.f32.xlu1 %v1225_v47  ;;  %v1209_v60 = vmul.f32 %v2696_v50, %v3745_v26  ;;  %v1234_v63 = vsel %vm974_vm1, %v1208_v53, 0.0  ;;  %v2698_v4 = vpop.eup %2697  ;;  %2709 = vtanh.f32 %v1181_v16 }
 0x3ce   : > { %v1228_v5 = vsel %vm974_vm1, %v1206_v56, 0.0  ;;  %v2700_v3 = vpop.eup %2699  ;;  %v1211_v0 = vmul.f32 %v2698_v4, %v3745_v26  ;;  %2711 = vtanh.f32 %v1177_v18  ;;  %v1283_v56 = vlaneseq }
 0x3cf   : > { %v1237_v7 = vsel %vm974_vm1, %v1209_v60, 0.0  ;;  %v2702_v8 = vpop.eup %2701  ;;  %v1207_v13 = vmul.f32 %v2700_v3, %v3745_v26  ;;  %2713 = vtanh.f32 %v1182_v21 }
 0x3d0   : > { %v1212_v15 = vmul.f32 %v2702_v8, %v3745_v26  ;;  %v1243_v17 = vsel %vm974_vm1, %v1211_v0, 0.0  ;;  %v2704_v19 = vpop.eup %2703  ;;  %2715 = vtanh.f32 %v1180_v31  ;;  %v3805_v57 = vand.u32 127, %v1283_v56 }
 0x3d1   : > { %v1231_v20 = vsel %vm974_vm1, %v1207_v13, 0.0  ;;  %v2706_v22 = vpop.eup %2705  ;;  %v1214_v25 = vmul.f32 %v2704_v19, %v3745_v26 }
 0x3d2   : > { %v1246_v23 = vsel %vm974_vm1, %v1212_v15, 0.0  ;;  %v2708_v24 = vpop.eup %2707  ;;  %v1210_v28 = vmul.f32 %v2706_v22, %v3745_v26  ;;  %v3812_v61 = vadd.s32 4294967288, %v3805_v57 }
 0x3d3   : > { %1235 = vadd.xlane.f32.xlu0 %v1234_v63  ;;  %v1215_v29 = vmul.f32 %v2708_v24, %v3745_v26  ;;  %v1252_v30 = vsel %vm974_vm1, %v1214_v25, 0.0  ;;  %v2710_v32 = vpop.eup %2709 }
 0x3d4   : > { %1229 = vadd.xlane.f32.xlu2 %v1228_v5  ;;  %v1240_v33 = vsel %vm974_vm1, %v1210_v28, 0.0  ;;  %v2712_v34 = vpop.eup %2711  ;;  %v1217_v37 = vmul.f32 %v2710_v32, %v3745_v26 }
 0x3d5   : > { %1238 = vadd.xlane.f32.xlu1 %v1237_v7  ;;  %v1255_v35 = vsel %vm974_vm1, %v1215_v29, 0.0  ;;  %v2714_v36 = vpop.eup %2713  ;;  %v1213_v38 = vmul.f32 %v2712_v34, %v3745_v26 }
 0x3d6   : > { %v1218_v39 = vmul.f32 %v2714_v36, %v3745_v26  ;;  %v1261_v40 = vsel %vm974_vm1, %v1217_v37, 0.0  ;;  %v2716_v42 = vpop.eup %2715  ;;  %v3285_v37 = vmov 0  }
 0x3d7   : > { %v1249_v41 = vsel %vm974_vm1, %v1213_v38, 0.0  ;;  %v1216_v44 = vmul.f32 %v2716_v42, %v3745_v26  ;;  %2672 = vset.pattern.permute.xlu2 %v3285_v37  ;;  %2671 = vset.pattern.permute.xlu1 %v3285_v37 }
 0x3d8   : > { %v1264_v43 = vsel %vm974_vm1, %v1218_v39, 0.0  ;;  %2670 = vset.pattern.permute.xlu0 %v3285_v37 }
 0x3d9   : > { %v1258_v45 = vsel %vm974_vm1, %v1216_v44, 0.0 }
 0x3db   : > { %1244 = vadd.xlane.f32.xlu0 %v1243_v17 }
 0x3dc   : > { %1232 = vadd.xlane.f32.xlu2 %v1231_v20 }
 0x3dd   : > { %1247 = vadd.xlane.f32.xlu1 %v1246_v23 }
 0x3e3   : > { %1253 = vadd.xlane.f32.xlu0 %v1252_v30 }
 0x3e4   : > { %1241 = vadd.xlane.f32.xlu2 %v1240_v33 }
 0x3e5   : > { %1256 = vadd.xlane.f32.xlu1 %v1255_v35 }
 0x3eb   : > { %1262 = vadd.xlane.f32.xlu0 %v1261_v40 }
 0x3ec   : > { %1250 = vadd.xlane.f32.xlu2 %v1249_v41 }
 0x3ed   : > { %1265 = vadd.xlane.f32.xlu1 %v1264_v43 }
 0x3f4   : > { %1259 = vadd.xlane.f32.xlu2 %v1258_v45 }
 0x43e   : > { %v3786_v46 = vpop.xlane.xlu0 %1223 }
 0x43f   : > { %v3788_v47 = vpop.xlane.xlu2 %1220  ;;  %v1287_v2 = vperm.slane %v3786_v46, %v3812_v61 }
 0x440   : > { %v3790_v49 = vpop.xlane.xlu1 %1226  ;;  %v1285_v4 = vperm.slane %v3788_v47, %v3805_v57 }
 0x441   : > { %v1290_v5 = vperm.slane %v3790_v49, %v3805_v57 }
 0x442   : > { %v1289_v0 = vsel %vm1288_vm7, %v1287_v2, %v1285_v4 }
 0x446   : > { %v3794_v51 = vpop.xlane.xlu0 %1235 }
 0x447   : > { %v3792_v50 = vpop.xlane.xlu2 %1229  ;;  %v1294_v7 = vperm.slane %v3794_v51, %v3812_v61 }
 0x448   : > { %v3796_v52 = vpop.xlane.xlu1 %1238  ;;  %v1291_v63 = vperm.slane %v3792_v50, %v3812_v61 }
 0x449   : > { %v1296_v9 = vperm.slane %v3796_v52, %v3805_v57 }
 0x44a   : > { %v1292_v8 = vsel %vm1288_vm7, %v1291_v63, %v1290_v5 }
 0x44b   : > { %v1312_v14 = vsel %vm1311_vm8, %v1292_v8, %v1289_v0 }
 0x44e   : > { %v3802_v26 = vpop.xlane.xlu0 %1244 }
 0x44f   : > { %v3798_v53 = vpop.xlane.xlu2 %1232  ;;  %v1299_v19 = vperm.slane %v3802_v26, %v3805_v57 }
 0x450   : > { %v3800_v54 = vpop.xlane.xlu1 %1247  ;;  %v1293_v1 = vperm.slane %v3798_v53, %v3805_v57 }
 0x451   : > { %v1300_v15 = vperm.slane %v3800_v54, %v3812_v61 }
 0x452   : > { %v1295_v10 = vsel %vm1288_vm7, %v1294_v7, %v1293_v1 }
 0x453   : > { %v1314_v17 = vsel %vm1313_vm9, %v1295_v10, %v1312_v14  ;;  %v1301_v25 = vsel %vm1288_vm7, %v1300_v15, %v1299_v19 }
 0x456   : > { %v3814_v62 = vpop.xlane.xlu0 %1253 }
 0x457   : > { %v3807_v59 = vpop.xlane.xlu2 %1241  ;;  %v1303_v18 = vperm.slane %v3814_v62, %v3812_v61 }
 0x458   : > { %v3809_v60 = vpop.xlane.xlu1 %1256  ;;  %v1297_v6 = vperm.slane %v3807_v59, %v3812_v61 }
 0x459   : > { %v1305_v27 = vperm.slane %v3809_v60, %v3805_v57 }
 0x45a   : > { %v1298_v11 = vsel %vm1288_vm7, %v1297_v6, %v1296_v9 }
 0x45b   : > { %v1316_v20 = vsel %vm1315_vm10, %v1298_v11, %v1314_v17 }
 0x45c   : > { %v1318_v30 = vsel %vm1317_vm11, %v1301_v25, %v1316_v20 }
 0x45e   : > { %v3851_v21 = vpop.xlane.xlu0 %1262 }
 0x45f   : > { %v3828_v3 = vpop.xlane.xlu2 %1250  ;;  %v1308_v29 = vperm.slane %v3851_v21, %v3805_v57 }
 0x460   : > { %v1302_v13 = vperm.slane %v3828_v3, %v3805_v57  ;;  %v3843_v16 = vpop.xlane.xlu1 %1265 }
 0x461   : > { %v1309_v23 = vperm.slane %v3843_v16, %v3812_v61 }
 0x462   : > { %v1304_v22 = vsel %vm1288_vm7, %v1303_v18, %v1302_v13 }
 0x463   : > { %v1320_v32 = vsel %vm1319_vm12, %v1304_v22, %v1318_v30  ;;  %v1310_v33 = vsel %vm1288_vm7, %v1309_v23, %v1308_v29 }
 0x467   : > { %v3856_v24 = vpop.xlane.xlu2 %1259 }
 0x468   : > { %v1306_v28 = vperm.slane %v3856_v24, %v3812_v61 }
 0x46a   : > { %v1307_v31 = vsel %vm1288_vm7, %v1306_v28, %v1305_v27 }
 0x46b   : > { %v1322_v34 = vsel %vm1321_vm13, %v1307_v31, %v1320_v32 }
 0x46c   : > { %v1324_v35 = vsel %vm1323_vm14, %v1310_v33, %v1322_v34 }
 0x46d   : > { %v1327_v36 = vsel %vm1326_vm15, %v1324_v35, -inf }
 0x46e   : > { %1328 = vmax.xlane.f32.xlu2 %v1327_v36 }
 0x4e1   : > { %v3872_v38 = vpop.xlane.xlu2 %1328 }
 0x4e2   : > { %v1332_v39 = vperm.slane %v3872_v38, 1  ;;  %v1331_v40 = vperm.slane %v3872_v38, 0  ;;  %v1333_v44 = vperm.slane %v3872_v38, 2  ;;  %v1334_v45 = vperm.slane %v3872_v38, 3 }
 0x4e3   : > { %v1336_v8 = vperm.slane %v3872_v38, 5  ;;  %v1335_v11 = vperm.slane %v3872_v38, 4  ;;  %v1337_v17 = vperm.slane %v3872_v38, 6  ;;  %v1338_v29 = vperm.slane %v3872_v38, 7 }
 0x4e4   : > { %v1349_v41 = vsub.f32 %v3790_v49, %v1332_v39  ;;  %v1348_v42 = vsub.f32 %v3786_v46, %v1331_v40  ;;  %v1347_v43 = vsub.f32 %v3788_v47, %v1331_v40  ;;  %v1351_v4 = vsub.f32 %v3798_v53, %v1333_v44 }
 0x4e5   : > { %v1350_v5 = vsub.f32 %v3792_v50, %v1332_v39  ;;  %v1354_v49 = vsub.f32 %v3807_v59, %v1334_v45  ;;  %v1353_v50 = vsub.f32 %v3796_v52, %v1334_v45  ;;  %v1352_v53 = vsub.f32 %v3794_v51, %v1333_v44 }
 0x4e6   : > { %v1367_v63 = vmul.f32 1.442695, %v1349_v41  ;;  %v1365_v1 = vmul.f32 1.442695, %v1348_v42  ;;  %v1363_v2 = vmul.f32 1.442695, %v1347_v43  ;;  %v1357_v59 = vsub.f32 %v3828_v3, %v1336_v8 }
 0x4e7   : > { %v1371_v6 = vmul.f32 1.442695, %v1351_v4  ;;  %v1369_v46 = vmul.f32 1.442695, %v1350_v5  ;;  %v1377_v47 = vmul.f32 1.442695, %v1354_v49  ;;  %v1356_v51 = vsub.f32 %v3800_v54, %v1335_v11 }
 0x4e8   : > { %2717 = vpow2.f32 %v1367_v63  ;;  %v1375_v0 = vmul.f32 1.442695, %v1353_v50  ;;  %v1373_v13 = vmul.f32 1.442695, %v1352_v53  ;;  %v1383_v15 = vmul.f32 1.442695, %v1357_v59 }
 0x4e9   : > { %2719 = vpow2.f32 %v1365_v1  ;;  %v1355_v3 = vsub.f32 %v3802_v26, %v1335_v11  ;;  %v1360_v19 = vsub.f32 %v3856_v24, %v1337_v17  ;;  %v1381_v20 = vmul.f32 1.442695, %v1356_v51 }
 0x4ea   : > { %2721 = vpow2.f32 %v1363_v2  ;;  %v1359_v54 = vsub.f32 %v3809_v60, %v1337_v17  ;;  %v1358_v26 = vsub.f32 %v3814_v62, %v1336_v8  ;;  %v1362_v60 = vsub.f32 %v3843_v16, %v1338_v29 }
 0x4eb   : > { %2723 = vpow2.f32 %v1371_v6  ;;  %v1379_v22 = vmul.f32 1.442695, %v1355_v3  ;;  %v1389_v25 = vmul.f32 1.442695, %v1360_v19  ;;  %v1361_v62 = vsub.f32 %v3851_v21, %v1338_v29 }
 0x4ec   : > { %2725 = vpow2.f32 %v1369_v46  ;;  %v1387_v24 = vmul.f32 1.442695, %v1359_v54  ;;  %v1385_v30 = vmul.f32 1.442695, %v1358_v26  ;;  %v1393_v34 = vmul.f32 1.442695, %v1362_v60 }
 0x4ed   : > { %2727 = vpow2.f32 %v1377_v47  ;;  %v1391_v35 = vmul.f32 1.442695, %v1361_v62 }
 0x4ee   : > { %v3884_v7 = vpop.eup %2717  ;;  %2729 = vpow2.f32 %v1375_v0 }
 0x4ef   : > { %v3887_v9 = vpop.eup %2719  ;;  %1418 = vperm.xlu2 %2672, %v3884_v7   ;;  %2731 = vpow2.f32 %v1373_v13 }
 0x4f0   : > { %v3890_v10 = vpop.eup %2721  ;;  %1415 = vperm.xlu1 %2671, %v3887_v9   ;;  %2733 = vpow2.f32 %v1383_v15 }
 0x4f1   : > { %1412 = vperm.xlu0 %2670, %v3890_v10   ;;  %v3898_v14 = vpop.eup %2723  ;;  %2735 = vpow2.f32 %v1381_v20 }
 0x4f2   : > { %v3901_v18 = vpop.eup %2725  ;;  %2737 = vpow2.f32 %v1379_v22 }
 0x4f3   : > { %v3904_v52 = vpop.eup %2727  ;;  %2739 = vpow2.f32 %v1389_v25 }
 0x4f4   : > { %v3911_v23 = vpop.eup %2729  ;;  %2741 = vpow2.f32 %v1387_v24 }
 0x4f5   : > { %v3913_v27 = vpop.eup %2731  ;;  %2743 = vpow2.f32 %v1385_v30 }
 0x4f6   : > { %v3916_v28 = vpop.eup %2733  ;;  %2745 = vpow2.f32 %v1393_v34 }
 0x4f7   : > { %1424 = vperm.xlu2 %2672, %v3898_v14   ;;  %v3923_v31 = vpop.eup %2735  ;;  %2747 = vpow2.f32 %v1391_v35 }
 0x4f8   : > { %1421 = vperm.xlu1 %2671, %v3901_v18   ;;  %v3925_v32 = vpop.eup %2737 }
 0x4f9   : > { %1433 = vperm.xlu0 %2670, %v3904_v52   ;;  %v3928_v33 = vpop.eup %2739 }
 0x4fa   : > { %v3934_v36 = vpop.eup %2741 }
 0x4fb   : > { %v3936_v37 = vpop.eup %2743 }
 0x4fc   : > { %v3940_v38 = vpop.eup %2745 }
 0x4fd   : > { %v3942_v16 = vpop.eup %2747 }
 0x4ff   : > { %1430 = vperm.xlu2 %2672, %v3911_v23  }
 0x500   : > { %1427 = vperm.xlu1 %2671, %v3913_v27  }
 0x501   : > { %1442 = vperm.xlu0 %2670, %v3916_v28  }
 0x507   : > { %1439 = vperm.xlu2 %2672, %v3923_v31  }
 0x508   : > { %1436 = vperm.xlu1 %2671, %v3925_v32  }
 0x509   : > { %1451 = vperm.xlu0 %2670, %v3928_v33  }
 0x50f   : > { %1448 = vperm.xlu2 %2672, %v3934_v36  }
 0x510   : > { %1445 = vperm.xlu1 %2671, %v3936_v37  }
 0x517   : > { %1457 = vperm.xlu2 %2672, %v3940_v38  }
 0x518   : > { %1454 = vperm.xlu1 %2671, %v3942_v16  }
 0x549   : > { %v1419_v21 = vpop.permute.xlu2 %1418 }
 0x54a   : > { %v1462_v6 = vperm.slane %v1419_v21, %v3805_v57 }
 0x551   : > { %v1425_v39 = vpop.permute.xlu2 %1424 }
 0x552   : > { %v1465_v8 = vperm.slane %v1425_v39, %v3805_v57 }
 0x559   : > { %v1431_v42 = vpop.permute.xlu2 %1430 }
 0x55a   : > { %v1468_v3 = vperm.slane %v1431_v42, %v3805_v57 }
 0x561   : > { %v1440_v63 = vpop.permute.xlu2 %1439 }
 0x562   : > { %v1416_v40 = vpop.permute.xlu1 %1415  ;;  %v1472_v17 = vperm.slane %v1440_v63, %v3812_v61 }
 0x563   : > { %v1413_v41 = vpop.permute.xlu0 %1412  ;;  %v1460_v46 = vperm.slane %v1416_v40, %v3812_v61 }
 0x564   : > { %v1459_v47 = vperm.slane %v1413_v41, %v3805_v57 }
 0x566   : > { %v1461_v11 = vsel %vm1288_vm7, %v1460_v46, %v1459_v47 }
 0x569   : > { %v1449_v5 = vpop.permute.xlu2 %1448 }
 0x56a   : > { %v1422_v43 = vpop.permute.xlu1 %1421  ;;  %v1477_v62 = vperm.slane %v1449_v5, %v3805_v57 }
 0x56b   : > { %v1434_v44 = vpop.permute.xlu0 %1433  ;;  %v1463_v4 = vperm.slane %v1422_v43, %v3812_v61 }
 0x56c   : > { %v1469_v13 = vperm.slane %v1434_v44, %v3812_v61 }
 0x56d   : > { %v1464_v50 = vsel %vm1288_vm7, %v1463_v4, %v1462_v6 }
 0x56e   : > { %v1483_v51 = vsel %vm1311_vm8, %v1464_v50, %v1461_v11  ;;  %v1470_v54 = vsel %vm1288_vm7, %v1469_v13, %v1468_v3 }
 0x571   : > { %v1458_v24 = vpop.permute.xlu2 %1457 }
 0x572   : > { %v1428_v45 = vpop.permute.xlu1 %1427  ;;  %v1481_v21 = vperm.slane %v1458_v24, %v3812_v61 }
 0x573   : > { %v1443_v2 = vpop.permute.xlu0 %1442  ;;  %v1466_v49 = vperm.slane %v1428_v45, %v3812_v61 }
 0x574   : > { %v1474_v20 = vperm.slane %v1443_v2, %v3805_v57 }
 0x575   : > { %v1467_v53 = vsel %vm1288_vm7, %v1466_v49, %v1465_v8 }
 0x576   : > { %v1484_v19 = vsel %vm1313_vm9, %v1467_v53, %v1483_v51 }
 0x577   : > { %v1485_v29 = vsel %vm1315_vm10, %v1470_v54, %v1484_v19  ;;  %v2506_v19 = vld [vmem:[%s3663_s3 + $0x18] sm:$0xff]  }
 0x578   : > { %v2479_v54 = vunpack.c.l.bf16 %v2506_v19 }
 0x57a   : > { %v1437_v1 = vpop.permute.xlu1 %1436 }
 0x57b   : > { %v1471_v59 = vperm.slane %v1437_v1, %v3805_v57  ;;  %v1452_v22 = vpop.permute.xlu0 %1451 }
 0x57c   : > { %v1478_v30 = vperm.slane %v1452_v22, %v3812_v61 }
 0x57d   : > { %v1473_v25 = vsel %vm1288_vm7, %v1472_v17, %v1471_v59  ;;  %v2504_v17 = vld [vmem:[%s3663_s3 + $0x8] sm:$0xff]  }
 0x57e   : > { %v1486_v60 = vsel %vm1317_vm11, %v1473_v25, %v1485_v29  ;;  %v1479_v40 = vsel %vm1288_vm7, %v1478_v30, %v1477_v62  ;;  %v2471_v3 = vunpack.c.l.bf16 %v2504_v17  ;;  %v2472_v22 = vunpack.c.h.bf16 %v2504_v17 }
 0x57f   : > { %v2480_v29 = vunpack.c.h.bf16 %v2506_v19 }
 0x582   : > { %v1446_v0 = vpop.permute.xlu1 %1445 }
 0x583   : > { %v1475_v15 = vperm.slane %v1446_v0, %v3812_v61 }
 0x585   : > { %v1476_v26 = vsel %vm1288_vm7, %v1475_v15, %v1474_v20 }
 0x586   : > { %v1487_v35 = vsel %vm1319_vm12, %v1476_v26, %v1486_v60 }
 0x587   : > { %v1488_v42 = vsel %vm1321_vm13, %v1479_v40, %v1487_v35 }
 0x58a   : > { %v1455_v34 = vpop.permute.xlu1 %1454 }
 0x58b   : > { %v1480_v39 = vperm.slane %v1455_v34, %v3805_v57 }
 0x58d   : > { %v1482_v41 = vsel %vm1288_vm7, %v1481_v21, %v1480_v39 }
 0x58e   : > { %v1489_v43 = vsel %vm1323_vm14, %v1482_v41, %v1488_v42  ;;  %v2508_v42 = vld [vmem:[%s3663_s3 + $0x28] sm:$0xff]  }
 0x58f   : > { %v1491_v44 = vsel %vm1326_vm15, %v1489_v43, 0.0 }
 0x590   : > { %1492 = vadd.xlane.f32.xlu0 %v1491_v44 }
 0x603   : > { %v1493_v45 = vpop.xlane.xlu0 %1492 }
 0x604   : > { %2749 = vrcp.f32 %v1493_v45 }
 0x60a   : > { %v2750_v63 = vpop.eup %2749 }
 0x60b   : > { %v1501_v1 = vperm.slane %v2750_v63, 5  ;;  %v1496_v2 = vperm.slane %v2750_v63, 0  ;;  %v1497_v5 = vperm.slane %v2750_v63, 1  ;;  %v1498_v46 = vperm.slane %v2750_v63, 2 }
 0x60c   : > { %v1500_v50 = vperm.slane %v2750_v63, 4  ;;  %v1502_v53 = vperm.slane %v2750_v63, 6 }
 0x60d   : > { %v1523_v61 = vmul.f32 %v3936_v37, %v1501_v1  ;;  %v1513_v57 = vmul.f32 %v3887_v9, %v1496_v2  ;;  %v1512_v4 = vmul.f32 %v3890_v10, %v1496_v2  ;;  %v1515_v49 = vmul.f32 %v3901_v18, %v1497_v5 }
 0x60e   : > { %v1514_v6 = vmul.f32 %v3884_v7, %v1497_v5  ;;  %v1517_v47 = vmul.f32 %v3913_v27, %v1498_v46  ;;  %v1516_v8 = vmul.f32 %v3898_v14, %v1498_v46  ;;  %v1499_v9 = vperm.slane %v2750_v63, 3 }
 0x60f   : > { %1617 = vperm.xlu0 %2670, %v1523_v61   ;;  %1567 = vperm.xlu2 %2672, %v1513_v57   ;;  %v1521_v18 = vmul.f32 %v3923_v31, %v1500_v50  ;;  %v1520_v7 = vmul.f32 %v3925_v32, %v1500_v50  ;;  %v1524_v27 = vmul.f32 %v3934_v36, %v1502_v53  ;;  %v2487_v50 = vunpack.c.l.bf16 %v2508_v42 }
 0x610   : > { %1562 = vperm.xlu1 %2671, %v1512_v4   ;;  %v1519_v10 = vmul.f32 %v3904_v52, %v1499_v9  ;;  %v1518_v37 = vmul.f32 %v3911_v23, %v1499_v9  ;;  %v1522_v14 = vmul.f32 %v3916_v28, %v1501_v1  ;;  %v1503_v52 = vperm.slane %v2750_v63, 7 }
 0x611   : > { %v1525_v59 = vmul.f32 %v3928_v33, %v1502_v53  ;;  %v2466_v33 = vld [vmem:[%s3663_s3] sm:$0xff]   ;;  %v2488_v4 = vunpack.c.h.bf16 %v2508_v42 }
 0x612   : > { %v1526_v23 = vmul.f32 %v3942_v16, %v1503_v52  ;;  %v1527_v31 = vmul.f32 %v3940_v38, %v1503_v52  ;;  %v2505_v16 = vld [vmem:[%s3663_s3 + $0x10] sm:$0xff]   ;;  %v2467_v25 = vunpack.c.l.bf16 %v2466_v33  ;;  %v2507_v38 = vld [vmem:[%s3663_s3 + $0x20] sm:$0xff]   ;;  %v2468_v24 = vunpack.c.h.bf16 %v2466_v33 }
 0x613   : > { %v2475_v20 = vunpack.c.l.bf16 %v2505_v16  ;;  %v2476_v26 = vunpack.c.h.bf16 %v2505_v16  ;;  %v2483_v60 = vunpack.c.l.bf16 %v2507_v38  ;;  %v2484_v62 = vunpack.c.h.bf16 %v2507_v38  ;;  %v2432_v33 = vld [vmem:[#allocation19 + $0x8] sm:$0xff] }
 0x614   : > { %1843 = vmatpush.bf16.msrb.mxu3 %v2432_v33 }
 0x617   : > { %1577 = vperm.xlu2 %2672, %v1515_v49  }
 0x618   : > { %1572 = vperm.xlu1 %2671, %v1514_v6  }
 0x61f   : > { %1587 = vperm.xlu2 %2672, %v1517_v47  }
 0x620   : > { %1582 = vperm.xlu1 %2671, %v1516_v8  }
 0x627   : > { %1597 = vperm.xlu2 %2672, %v1519_v10  }
 0x628   : > { %1592 = vperm.xlu1 %2671, %v1518_v37  }
 0x62f   : > { %1607 = vperm.xlu2 %2672, %v1521_v18  }
 0x630   : > { %1602 = vperm.xlu1 %2671, %v1520_v7  }
 0x637   : > { %1622 = vperm.xlu2 %2672, %v1524_v27  }
 0x638   : > { %1612 = vperm.xlu1 %2671, %v1522_v14  }
 0x63f   : > { %1632 = vperm.xlu2 %2672, %v1526_v23   ;;  %v2509_v23 = vld [vmem:[%s3663_s3 + $0x30] sm:$0xff]  }
 0x640   : > { %1627 = vperm.xlu1 %2671, %v1525_v59  }
 0x648   : > { %1637 = vperm.xlu1 %2671, %v1527_v31  }
 0x669   : > { %v1568_v32 = vpop.permute.xlu2 %1567 }
 0x66a   : > { %v1641_v44 = vmul.f32 %v2468_v24, %v1568_v32 }
 0x66c   : > { %v1657_v9 = vsel %vm974_vm1, %v1641_v44, 0.0 }
 0x671   : > { %v1578_v28 = vpop.permute.xlu2 %1577 }
 0x672   : > { %v1643_v35 = vmul.f32 %v2472_v22, %v1578_v28 }
 0x674   : > { %v1666_v57 = vsel %vm974_vm1, %v1643_v35, 0.0 }
 0x679   : > { %v1588_v11 = vpop.permute.xlu2 %1587 }
 0x67a   : > { %v1645_v41 = vmul.f32 %v2476_v26, %v1588_v11  ;;  %v2427_v26 = vld [vmem:[#allocation16] sm:$0xff] }
 0x67c   : > { %v1675_v6 = vsel %vm974_vm1, %v1645_v41, 0.0 }
 0x681   : > { %v1598_v15 = vpop.permute.xlu2 %1597  ;;  %v1618_v46 = vpop.permute.xlu0 %1617 }
 0x682   : > { %v1563_v36 = vpop.permute.xlu1 %1562  ;;  %v1647_v45 = vmul.f32 %v2480_v29, %v1598_v15  ;;  %v1651_v27 = vmul.f32 %v2488_v4, %v1618_v46 }
 0x683   : > { %v1640_v21 = vmul.f32 %v2467_v25, %v1563_v36 }
 0x684   : > { %v1684_v10 = vsel %vm974_vm1, %v1647_v45, 0.0  ;;  %v1702_v11 = vsel %vm974_vm1, %v1651_v27, 0.0 }
 0x685   : > { %v1656_v5 = vsel %vm974_vm1, %v1640_v21, 0.0 }
 0x686   : > { %v1658_v18 = vadd.f32 %v1657_v9, %v1656_v5 }
 0x688   : > { %v1659_v36 = vrot.slane %v1658_v18, 4 }
 0x689   : > { %v1608_v39 = vpop.permute.xlu2 %1607 }
 0x68a   : > { %v1573_v0 = vpop.permute.xlu1 %1572  ;;  %v1649_v2 = vmul.f32 %v2484_v62, %v1608_v39  ;;  %v1660_v22 = vadd.f32 %v1659_v36, %v1658_v18  ;;  %v2329_v39 = vld [vmem:[%s770_s10 + $0x8] sm:$0xff]  ;;  %s4053_s10 = sshll.u32 %s4239_s19, 3  ;;  %s3139_s19 = scalar_lea.hbm %s4253_s14, 64 }
 0x68b   : > { %v1642_v30 = vmul.f32 %v2471_v3, %v1573_v0  ;;  %v2428_v3 = vld [vmem:[#allocation16 + $0x8] sm:$0xff]  ;;  %1877 = vrot.lane.b32.xlu2 %v2329_v39, %s3284_s0 }
 0x68c   : > { %v1693_v7 = vsel %vm974_vm1, %v1649_v2, 0.0  ;;  %1814 = vmatpush.bf16.msrb.mxu2 %v2428_v3 }
 0x68d   : > { %v1665_v63 = vsel %vm974_vm1, %v1642_v30, 0.0 }
 0x68e   : > { %v1667_v47 = vadd.f32 %v1666_v57, %v1665_v63 }
 0x690   : > { %v1668_v52 = vrot.slane %v1667_v47, 4  ;;  %1815 = vmatpush.bf16.msrb.mxu2 %v2427_v26 }
 0x691   : > { %v1623_v28 = vpop.permute.xlu2 %1622 }
 0x692   : > { %v1583_v13 = vpop.permute.xlu1 %1582 }
 0x693   : > { %v1644_v34 = vmul.f32 %v2475_v20, %v1583_v13  ;;  %v2491_v13 = vunpack.c.l.bf16 %v2509_v23  ;;  %v2492_v20 = vunpack.c.h.bf16 %v2509_v23 }
 0x695   : > { %v1674_v61 = vsel %vm974_vm1, %v1644_v34, 0.0  ;;  %v1652_v24 = vmul.f32 %v2491_v13, %v1623_v28 }
 0x696   : > { %v1676_v37 = vadd.f32 %v1675_v6, %v1674_v61 }
 0x697   : > { %v1710_v42 = vsel %vm974_vm1, %v1652_v24, 0.0 }
 0x698   : > { %v1677_v31 = vrot.slane %v1676_v37, 4 }
 0x69a   : > { %v1593_v51 = vpop.permute.xlu1 %1592  ;;  %v1678_v19 = vadd.f32 %v1677_v31, %v1676_v37 }
 0x69b   : > { %v1646_v40 = vmul.f32 %v2479_v54, %v1593_v51  ;;  %v1669_v51 = vadd.f32 %v1668_v52, %v1667_v47  ;;  %v2431_v54 = vld [vmem:[#allocation19] sm:$0xff] }
 0x69c   : > { %v1679_v35 = vrot.slane %v1678_v19, 2  ;;  %1844 = vmatpush.bf16.msrb.mxu3 %v2431_v54 }
 0x69d   : > { %v1683_v49 = vsel %vm974_vm1, %v1646_v40, 0.0  ;;  %v1670_v30 = vrot.slane %v1669_v51, 2  ;;  %v1661_v40 = vrot.slane %v1660_v22, 2 }
 0x69e   : > { %v1685_v53 = vadd.f32 %v1684_v10, %v1683_v49  ;;  %v1680_v57 = vadd.f32 %v1679_v35, %v1678_v19 }
 0x69f   : > { %v1671_v63 = vadd.f32 %v1670_v30, %v1669_v51  ;;  %2401 = vmatmul.msk.bf16.vlgmr.msrb.gmra.mxu3 %vm974_vm1, %v3697_v12  ;;  %v1662_v5 = vadd.f32 %v1661_v40, %v1660_v22 }
 0x6a0   : > { %v1686_v0 = vrot.slane %v1685_v53, 4 }
 0x6a2   : > { %v1603_v43 = vpop.permute.xlu1 %1602  ;;  %v1687_v25 = vadd.f32 %v1686_v0, %v1685_v53 }
 0x6a3   : > { %v1648_v1 = vmul.f32 %v2483_v60, %v1603_v43  ;;  %v2510_v60 = vld [vmem:[%s3663_s3 + $0x38] sm:$0xff]   ;;  %s3286_s3 = smov 96  }
 0x6a4   : > { %v1688_v41 = vrot.slane %v1687_v25, 2  ;;  %v2495_v43 = vunpack.c.l.bf16 %v2510_v60  ;;  %v2496_v4 = vunpack.c.h.bf16 %v2510_v60 }
 0x6a5   : > { %v1692_v8 = vsel %vm974_vm1, %v1648_v1, 0.0  ;;  %v1633_v1 = vpop.permute.xlu2 %1632 }
 0x6a6   : > { %v1694_v14 = vadd.f32 %v1693_v7, %v1692_v8  ;;  %v1689_v49 = vadd.f32 %v1688_v41, %v1687_v25  ;;  %v1654_v46 = vmul.f32 %v2495_v43, %v1633_v1  ;;  %v1672_v8 = vrot.slane %v1671_v63, 1 }
 0x6a7   : > { %v1663_v7 = vrot.slane %v1662_v5, 1 }
 0x6a8   : > { %v1695_v15 = vrot.slane %v1694_v14, 4  ;;  %v1690_v53 = vrot.slane %v1689_v49, 1  ;;  %v1673_v12 = vadd.f32 %v1672_v8, %v1671_v63 }
 0x6a9   : > { %v1664_v28 = vadd.f32 %v1663_v7, %v1662_v5 }
 0x6aa   : > { %v1613_v59 = vpop.permute.xlu1 %1612  ;;  %v1696_v29 = vadd.f32 %v1695_v15, %v1694_v14  ;;  %v1719_v14 = vsel %vm974_vm1, %v1654_v46, 0.0  ;;  %v1691_v0 = vadd.f32 %v1690_v53, %v1689_v49 }
 0x6ab   : > { %v1650_v32 = vmul.f32 %v2487_v50, %v1613_v59  ;;  %v1681_v50 = vrot.slane %v1680_v57, 1  ;;  %v1728_v19 = vpack.c.bf16 %v1664_v28, %v1664_v28 }
 0x6ac   : > { %v1697_v44 = vrot.slane %v1696_v29, 2 }
 0x6ad   : > { %v1701_v17 = vsel %vm974_vm1, %v1650_v32, 0.0  ;;  %v1682_v36 = vadd.f32 %v1681_v50, %v1680_v57  ;;  %v1777_v30 = vunpack.c.l.b16 %v1728_v19 }
 0x6ae   : > { %v1703_v16 = vadd.f32 %v1702_v11, %v1701_v17  ;;  %v1698_v47 = vadd.f32 %v1697_v44, %v1696_v29  ;;  %v1729_v17 = vpack.c.bf16 %v1673_v12, %v1673_v12 }
 0x6af   : > { %v1730_v3 = vpack.c.bf16 %v1682_v36, %v1682_v36 }
 0x6b0   : > { %v1704_v38 = vrot.slane %v1703_v16, 4  ;;  %v1699_v52 = vrot.slane %v1698_v47, 1 }
 0x6b1   : > { %v1779_v24 = vunpack.c.l.b16 %v1730_v3 }
 0x6b2   : > { %v1705_v62 = vadd.f32 %v1704_v38, %v1703_v16  ;;  %v1628_v34 = vpop.permute.xlu1 %1627  ;;  %v1700_v15 = vadd.f32 %v1699_v52, %v1698_v47  ;;  %v1778_v38 = vunpack.c.l.b16 %v1729_v17 }
 0x6b3   : > { %v1653_v21 = vmul.f32 %v2492_v20, %v1628_v34  ;;  %v1731_v20 = vpack.c.bf16 %v1691_v0, %v1691_v0 }
 0x6b4   : > { %v1706_v2 = vrot.slane %v1705_v62, 2  ;;  %v1732_v25 = vpack.c.bf16 %v1700_v15, %v1700_v15  ;;  %v1785_v35 = vsel %vm1311_vm8, %v1778_v38, %v1777_v30 }
 0x6b5   : > { %v1711_v45 = vsel %vm974_vm1, %v1653_v21, 0.0  ;;  %v1780_v60 = vunpack.c.l.b16 %v1731_v20  ;;  %v1786_v40 = vsel %vm1313_vm9, %v1779_v24, %v1785_v35 }
 0x6b6   : > { %v1712_v61 = vadd.f32 %v1711_v45, %v1710_v42  ;;  %v1707_v9 = vadd.f32 %v1706_v2, %v1705_v62  ;;  %v1781_v34 = vunpack.c.l.b16 %v1732_v25 }
 0x6b7   : > { %v1787_v42 = vsel %vm1315_vm10, %v1780_v60, %v1786_v40 }
 0x6b8   : > { %v1713_v6 = vrot.slane %v1712_v61, 4  ;;  %v1708_v59 = vrot.slane %v1707_v9, 1  ;;  %v1788_v44 = vsel %vm1317_vm11, %v1781_v34, %v1787_v42 }
 0x6ba   : > { %v1714_v10 = vadd.f32 %v1713_v6, %v1712_v61  ;;  %v1638_v37 = vpop.permute.xlu1 %1637  ;;  %v1709_v51 = vadd.f32 %v1708_v59, %v1707_v9  ;;  %v2676_v6 = vld [vmem:[%s4251_s17] ss:$0 sm:$0xff] }
 0x6bb   : > { %v1655_v18 = vmul.f32 %v2496_v4, %v1638_v37 }
 0x6bc   : > { %v1715_v27 = vrot.slane %v1714_v10, 2  ;;  %v1733_v54 = vpack.c.bf16 %v1709_v51, %v1709_v51 }
 0x6bd   : > { %v1720_v23 = vsel %vm974_vm1, %v1655_v18, 0.0 }
 0x6be   : > { %v1716_v31 = vadd.f32 %v1715_v27, %v1714_v10  ;;  %v1721_v32 = vadd.f32 %v1720_v23, %v1719_v14  ;;  %v1782_v21 = vunpack.c.l.b16 %v1733_v54 }
 0x6c0   : > { %v1717_v11 = vrot.slane %v1716_v31, 1  ;;  %v1722_v13 = vrot.slane %v1721_v32, 4  ;;  %v1789_v63 = vsel %vm1319_vm12, %v1782_v21, %v1788_v44 }
 0x6c2   : > { %v1723_v16 = vadd.f32 %v1722_v13, %v1721_v32  ;;  %v1718_v33 = vadd.f32 %v1717_v11, %v1716_v31 }
 0x6c4   : > { %v1724_v22 = vrot.slane %v1723_v16, 2  ;;  %v1734_v29 = vpack.c.bf16 %v1718_v33, %v1718_v33 }
 0x6c6   : > { %v1725_v26 = vadd.f32 %v1724_v22, %v1723_v16  ;;  %v1783_v41 = vunpack.c.l.b16 %v1734_v29 }
 0x6c8   : > { %v1726_v62 = vrot.slane %v1725_v26, 1  ;;  %v1790_v1 = vsel %vm1321_vm13, %v1783_v41, %v1789_v63 }
 0x6ca   : > { %v1727_v39 = vadd.f32 %v1726_v62, %v1725_v26 }
 0x6cc   : > { %v1735_v43 = vpack.c.bf16 %v1727_v39, %v1727_v39 }
 0x6ce   : > { %v1784_v45 = vunpack.c.l.b16 %v1735_v43 }
 0x6d0   : > { %v1791_v2 = vsel %vm1323_vm14, %v1784_v45, %v1790_v1 }
 0x6d1   : > { %v1792_v61 = vpack.c.b16 %v1791_v2, %v1791_v2 }
 0x6d3   : > { %2392 = vmatmul.msk.bf16.vlgmr.msrb.gmra.mxu2 %vm974_vm1, %v1792_v61 }
 0x6e5   : > { %v1878_v36 = vpop.permute.xlu2 %1877 }
 0x722   : > { %v1846_v57 = vpop.f32.mrf.mxu3 }
 0x72a   : > { %v1848_v4 = vpop.f32.mrf.mxu3 }
 0x756   : > { %v1817_v5 = vpop.f32.mrf.mxu2 }
 0x757   : > { %v1818_v49 = vadd.f32 %v1817_v5, %v3722_v58 }
 0x759   : > { %v1850_v46 = vadd.f32 %v1846_v57, %v1818_v49 }
 0x75b   : > { %v1855_v47 = vadd.f32 %v2676_v6, %v1850_v46 }
 0x75d   : > { %2751 = vtanh.f32 %v1855_v47  ;;  %v2402_v10 = vmul.f32 -1.442695, %v1855_v47 }
 0x75e   : > { %v1819_v8 = vpop.f32.mrf.mxu2 }
 0x75f   : > { %2753 = vpow2.f32 %v2402_v10 }
 0x763   : > { %v2752_v9 = vpop.eup %2751 }
 0x764   : > { %1882 = vrot.lane.b32.xlu0 %v2752_v9, %s3283_s23 }
 0x765   : > { %v2754_v37 = vpop.eup %2753 }
 0x766   : > { %v1859_v50 = vadd.f32 1.0, %v2754_v37 }
 0x768   : > { %2755 = vrcp.f32 %v1859_v50  ;;  %v1871_v14 = vand.u32 2147483648, %v1859_v50  ;;  %vm1865_vm2 = vweird.f32 %v1859_v50  ;;  %v1869_v52 = vand.u32 2147483647, %v1859_v50 }
 0x76a   : > { %v1872_v12 = vor.u32 1.1754944e-38, %v1871_v14  ;;  %vm1870_vm4 = vcmp.eq.f32.partialorder %v1869_v52, 8.507059e+37 }
 0x76e   : > { %v2756_v18 = vpop.eup %2755 }
 0x76f   : > { %v1861_v7 = vmul.f32 %v2756_v18, %v1859_v50  ;;  %vm1866_vm0 = vweird.f32 %v2756_v18 }
 0x770   : > { %vm1867_vm3 = vmor %vm1865_vm2, %vm1866_vm0 }
 0x771   : > { %v1862_v53 = vsub.f32 1.0, %v1861_v7 }
 0x773   : > { %v1863_v58 = vmul.f32 %v2756_v18, %v1862_v53 }
 0x775   : > { %v1864_v27 = vadd.f32 %v2756_v18, %v1863_v58 }
 0x777   : > { %v1868_v23 = vsel %vm1867_vm3, %v2756_v18, %v1864_v27 }
 0x778   : > { %v1873_v59 = vsel %vm1870_vm4, %v1872_v12, %v1868_v23 }
 0x779   : > { %v1880_v28 = vmul.f32 %v1878_v36, %v1873_v59 }
 0x7d6   : > { %v1883_v31 = vpop.permute.xlu0 %1882 }
 0x7d7   : > { %v1885_v32 = vmul.f32 %v1883_v31, %v1873_v59 }
 0x7d9   : > { %1887 = vrot.lane.b32.xlu1 %v1885_v32, %s3284_s0 }
 0x84b   : > { %v1888_v0 = vpop.permute.xlu1 %1887 }
 0x84c   : > { %v1890_v11 = vadd.f32 %v1888_v0, %v1880_v28 }
 0x84e   : > { %2757 = vtanh.f32 %v1890_v11 }
 0x854   : > { %v2758_v13 = vpop.eup %2757 }
 0x855   : > { %1893 = vrot.lane.b32.xlu0 %v2758_v13, %s3283_s23  ;;  %s1979_s23 = scalar_lea.hbm %s4253_s14, %s4053_s10 }
 0x856   : > { %s1982_s2 = sshll.u32 %s1979_s23, 4  ;;  %s1983_s2 = int_to_ptr.hbm [resolvable:$true] %s1982_s2 }
 0x857   : > { %s3133_s15 = sshra.s32 %s1983_s2, 4  ;;  %s3134_s15 = int_to_ptr.hbm [resolvable:$true] %s3133_s15 }
 0x858   : > { %s3135_s16 = scalar_lea.hbm %s3134_s15, 16  ;;  %p3140_p10 = scmp.lt.s32.totalorder %s3134_s15, %s4253_s14 }
 0x859   : > { %p3136_p6 = scmp.ne.s32.totalorder %s3134_s15, %s3135_s16  ;;  %p3141_p3 = scmp.lt.s32.totalorder %s3139_s19, %s3135_s16 }
 0x85b   : > { %p3137_p9 = pnand %p3136_p6, %p3469_p13  ;;  %p3142_p7 = por %p3141_p3, %p3140_p10 }
 0x85d   : > { %1898 = vrot.lane.b32.xlu0 %v3715_v55, %s3284_s0  ;;  %v1927_v55 = vshrl.u32 %v1283_v56, 7  ;;  %p3138_p5 = pneg %p3137_p9 }
 0x85f   : > { %v1928_v33 = vand.u32 1, %v1927_v55  ;;  %p3143_p8 = pnand %p3142_p7, %p3138_p5 }
 0x861   : > { %vm1929_vm5 = vcmp.eq.s32.totalorder %v1928_v33, 0 }
 0x865   : > { %1914 = vrot.lane.b32.xlu0 %v1890_v11, %s3286_s3 }
 0x8c7   : > { %v1894_v15 = vpop.permute.xlu0 %1893 }
 0x8c8   : > { %v1896_v17 = vmul.f32 %v1894_v15, %v1873_v59 }
 0x8ca   : > { %v1919_v51 = vmax.f32 %v1896_v17, 0.0 }
 0x8cc   : > { %1921 = vrot.lane.b32.xlu2 %v1919_v51, %s3284_s0 }
 0x8cf   : > { %v1899_v16 = vpop.permute.xlu0 %1898 }
 0x8d0   : > { %1901 = vst.msk [vmem:[%s881_s12] sm:$0xff] %vm974_vm1, %v1899_v16 }
 0x8d4   : > { %1903 = vrot.lane.b32.xlu2 %v1896_v17, %s3284_s0 }
 0x8d7   : > { %v1915_v3 = vpop.permute.xlu0 %1914 }
 0x8d8   : > { %2404 = vst.msk [vmem:[%s4045_s18 + $0x8] sm:$0xff] %vm974_vm1, %v1915_v3 }
 0x926   : > { %v1922_v19 = vpop.permute.xlu2 %1921 }
 0x927   : > { %v1924_v20 = vrot.slane %v1922_v19, 7  ;;  %v1925_v22 = vrot.slane %v1922_v19, 1 }
 0x929   : > { %v1932_v25 = vsel %vm1929_vm5, %v1925_v22, %v1924_v20 }
 0x92a   : > { %v1933_v38 = vmul.f32 0.5, %v1932_v25 }
 0x92c   : > { %1935 = vrot.lane.b32.xlu1 %v1933_v38, %s3286_s3 }
 0x92e   : > { %v1904_v54 = vpop.permute.xlu2 %1903 }
 0x92f   : > { %2403 = vst.msk [vmem:[%s881_s12 + $0x8] sm:$0xff] %vm974_vm1, %v1904_v54 }
 0x934   : > { %1909 = vrot.lane.b32.xlu1 %v3711_v48, %s3286_s3 }
 0x935   : > { %3146 = shalt.err (!%p3143_p8)
}
 0x936   : > { %s3287_s17 = smov 128   ;;  %s3288_s3 = smov 512  }
 0x937   : > { %s3289_s12 = smov 8   ;;  %s4254_s23 = sld [smem:[#allocation61_spill]] }
 0x938   : > { %2550 = dma.vmem_to_hbm [thread:$0]  (%p3469_p13), %s1981_s26, 256, %s1983_s2, %s1950_s21, %s3287_s17, %s3288_s3, %s3289_s12  }
 0x939   : > { %s1996_s16 = sshll.u32 %s4045_s18, 4  ;;  %s1997_s16 = int_to_ptr.vmem [resolvable:$true] %s1996_s16 }
 0x93d   : > { %s1995_s15 = scalar_lea.hbm %s4254_s23, %s4053_s10  ;;  %s3167_s7 = scalar_lea.hbm %s4254_s23, 64 }
 0x93e   : > { %s1998_s1 = sshll.u32 %s1995_s15, 4  ;;  %s1999_s1 = int_to_ptr.hbm [resolvable:$true] %s1998_s1 }
 0x93f   : > { %s3161_s29 = sshra.s32 %s1999_s1, 4  ;;  %s3162_s29 = int_to_ptr.hbm [resolvable:$true] %s3161_s29 }
 0x940   : > { %s3163_s19 = scalar_lea.hbm %s3162_s29, 16  ;;  %p3168_p12 = scmp.lt.s32.totalorder %s3162_s29, %s4254_s23 }
 0x941   : > { %p3164_p11 = scmp.ne.s32.totalorder %s3162_s29, %s3163_s19  ;;  %p3169_p1 = scmp.lt.s32.totalorder %s3167_s7, %s3163_s19 }
 0x943   : > { %p3165_p0 = pnand %p3164_p11, %p3469_p13  ;;  %p3170_p6 = por %p3169_p1, %p3168_p12 }
 0x945   : > { %p3166_p2 = pneg %p3165_p0 }
 0x947   : > { %p3171_p9 = pnand %p3170_p6, %p3166_p2 }
 0x99e   : > { %v1936_v48 = vpop.permute.xlu1 %1935 }
 0x99f   : > { %v1938_v56 = vadd.f32 %v1936_v48, %v1896_v17 }
 0x9a1   : > { %1940 = vrot.lane.b32.xlu2 %v1938_v56, %s3284_s0 }
 0x9a6   : > { %v1910_v26 = vpop.permute.xlu1 %1909 }
 0x9a7   : > { %1912 = vst.msk [vmem:[%s4045_s18] sm:$0xff] %vm974_vm1, %v1910_v26 }
 0x9a8   : > { %3174 = shalt.err (!%p3171_p9)
}
 0x9a9   : > { %2551 = dma.vmem_to_hbm [thread:$0]  (%p3469_p13), %s1997_s16, 256, %s1999_s1, %s1950_s21, %s3287_s17, %s3288_s3, %s3289_s12  }
 0x9aa   : > { %s4255_s30 = sld [smem:[#allocation59_spill]]  ;;  %s874_s29 = scalar_lea.vmem [#allocation22], %s2313_s27 }
 0x9ab   : > { %s1967_s19 = sshll.u32 %s874_s29, 4  ;;  %s1945_s7 = scalar_lea.sflag [#allocation4], %s3646_s25  ;;  %s1968_s19 = int_to_ptr.vmem [resolvable:$true] %s1967_s19 }
 0x9b0   : > { %s4256_s15 = smov %s4255_s30  ;;  %s1965_s26 = scalar_lea.hbm %s4255_s30, %s4053_s10 }
 0x9b1   : > { %s1969_s2 = sshll.u32 %s1965_s26, 4  ;;  %s3195_s10 = scalar_lea.hbm %s4256_s15, 32  ;;  %s1970_s2 = int_to_ptr.hbm [resolvable:$true] %s1969_s2 }
 0x9b2   : > { %s3189_s24 = sshra.s32 %s1970_s2, 4  ;;  %s3190_s24 = int_to_ptr.hbm [resolvable:$true] %s3189_s24 }
 0x9b3   : > { %s3191_s22 = scalar_lea.hbm %s3190_s24, 8  ;;  %p3196_p7 = scmp.lt.s32.totalorder %s3190_s24, %s4256_s15 }
 0x9b4   : > { %p3192_p5 = scmp.ne.s32.totalorder %s3190_s24, %s3191_s22  ;;  %p3197_p8 = scmp.lt.s32.totalorder %s3195_s10, %s3191_s22 }
 0x9b6   : > { %p3193_p10 = pnand %p3192_p5, %p3469_p13  ;;  %p3198_p11 = por %p3197_p8, %p3196_p7 }
 0x9b8   : > { %p3194_p3 = pneg %p3193_p10 }
 0x9ba   : > { %p3199_p0 = pnand %p3198_p11, %p3194_p3 }
 0x9fb   : > { %v1941_v24 = vpop.permute.xlu2 %1940 }
 0x9fc   : > { %1943 = vst.msk [vmem:[%s874_s29] sm:$0xff] %vm974_vm1, %v1941_v24 }
 0x9fd   : > { %3202 = shalt.err (!%p3199_p0)
}
 0x9fe   : > { %2549 = dma.vmem_to_hbm [thread:$0]  (%p3469_p13), %s1968_s19, 128, %s1970_s2, %s1945_s7  }
 0x9ff PF: > { %s4257_s25 = sld [smem:[#allocation38_spill]] }
 0xa00   : > { %s4258_s12 = sld [smem:[#allocation35_spill]] }
 0xa05   : > { %p2618_p2 = scmp.ge.s32.totalorder %s4257_s25, 2 }
 0xa06   : > { %s2013_s1 = sand.u32 1, %s4258_s12  }
 0xa07   : > { %p2594_p12 = pnand %p2618_p2, %p3479_p4  ;;  %s2014_s0 = scalar_lea.sflag [#allocation4], %s2013_s1 }
 0xa09   : > { %p2595_p1 = pneg %p2594_p12 }
 0xa0b   : > { %3248 = dma.done.wait (%p2595_p1), %s2014_s0, 128  }
 0xa0c   : > { %3250 = vsyncadd (%p2595_p1), %s2014_s0, 4294967168  ;;  %s4260_s18 = sadd.s32 4294967294, %s4257_s25  }
 0xa0d   : > { %s2023_s28 = sand.u32 1, %s4260_s18  }
 0xa0e   : > { %s2024_s30 = scalar_lea.sflag [#allocation24], %s2023_s28 }
 0xa0f   : > { %3252 = dma.done.wait (%p2595_p1), %s2024_s30, 512  }
 0xa10   : > { %3254 = vsyncadd (%p2595_p1), %s2024_s30, 4294966784  ;;  %s4261_s30 = sld [smem:[#allocation41_spill]] }
 0xa11   : > { %s4262_s27 = sld [smem:[#allocation36_spill]] }
 0xa12   : > { %s4263_s28 = sld [smem:[#allocation37_spill]] }
 0xa13   : > { %s4264_s29 = sld [smem:[#allocation42_spill]] }
 0xa16   : > { %p45_p13 = scmp.ge.s32.totalorder %s4261_s30, 6  }
 0xa18   :  { %47 = sbr.rel (!%p45_p13) target bundleno = 31 (0x1f), region = 241 }
 0xa1d   :  { %2040 = vsyncpa [#allocation3], 1 }
 0xa1e   :  { %2042 = vsyncpa [#allocation3 + $0x1], 1 }
 0xa1f   :  { %2043 = vsyncpa [#allocation6], 1 }
 0xa20   :  { %2045 = vsyncpa [#allocation6 + $0x1], 1 }
 0xa21   :  { %2046 = vsyncpa [#allocation9], 1 }
 0xa22   :  { %2048 = vsyncpa [#allocation9 + $0x1], 1 }
 0xa23   :  { %2049 = vsyncpa [#allocation12], 1 }
 0xa24   :  { %2050 = vsyncpa [#allocation15], 1 }
 0xa25   :  { %2051 = vsyncpa [#allocation18], 1 }
 0xa26   :  { %2052 = vsyncpa [#allocation21], 1 }
 0xa27   :  { %2053 = vsyncpa [#allocation4], 1 }
 0xa28   :  { %2055 = vsyncpa [#allocation4 + $0x1], 1 }
 0xa29   :  { %2056 = vsyncpa [#allocation24], 1 }
 0xa2a   :  { %2058 = vsyncpa [#allocation24 + $0x1], 1 }

</bundles_post_ra>
